<compile_context>
chip_gen: v5e
topology: v5e:2x2
jax: 0.10.0
libtpu: 0.0.40
codegen_flags: <defaults>
</compile_context>

<pallas_src>
import functools

import jax
import jax.numpy as jnp
from jax import lax
from jax.experimental import pallas as pl
from jax.experimental.pallas import tpu as pltpu

LAMBDA_ATTN = 10.0      # module default
COSINE_TEMP = 0.05      # cfg.MODEL.cosine_cls_temp (CosineClassifier default)
NORM_EPS = 1e-12        # F.normalize eps


# --------------------------------------------------------------------------
# Kernel 1: fused cross-image attention (both pairs, whole batch block)
# --------------------------------------------------------------------------
def fused_pair_attn_kernel(img1_ref, img2a_ref, img2o_ref, out_ref,
                           *, lambda_attn):
    img1 = img1_ref[...].astype(jnp.float32)     # (bb, D, L)
    img2a = img2a_ref[...].astype(jnp.float32)   # (bb, D, L)
    img2o = img2o_ref[...].astype(jnp.float32)   # (bb, D, L)

    def l2norm_feat(x):
        # F.normalize along the feature dim (axis=1): x / max(||x||, eps)
        ssq = jnp.sum(x * x, axis=1, keepdims=True)
        return x * lax.rsqrt(jnp.maximum(ssq, NORM_EPS * NORM_EPS))

    n1 = l2norm_feat(img1)                       # normalized once, shared

    def one_pair(img2):
        n2 = l2norm_feat(img2)
        # relevance[b, i, j] = sum_d n1[b, d, i] * n2[b, d, j]   (bb, L, L)
        rel = jnp.einsum('bdi,bdj->bij', n1, n2,
                         preferred_element_type=jnp.float32)
        s = rel * lambda_attn

        # softmax over dim=2 (rows)
        m_row = jnp.max(s, axis=2, keepdims=True)
        e_row = jnp.exp(s - m_row)
        row_attn = e_row * pl.reciprocal(jnp.sum(e_row, axis=2, keepdims=True))

        # softmax over dim=1 (columns)
        m_col = jnp.max(s, axis=1, keepdims=True)
        e_col = jnp.exp(s - m_col)
        col_attn = e_col * pl.reciprocal(jnp.sum(e_col, axis=1, keepdims=True))

        # softmax(-s) over dim=2, reusing e_row:
        #   exp(-(s - m_row)) == 1 / e_row ; normalization cancels m_row.
        inv_e = pl.reciprocal(e_row)
        inv_attn = inv_e * pl.reciprocal(jnp.sum(inv_e, axis=2, keepdims=True))

        sim12 = jnp.sum(row_attn, axis=1)        # (bb, L)
        sim21 = jnp.sum(col_attn, axis=2)        # (bb, L)
        diff12 = jnp.sum(inv_attn, axis=1)       # (bb, L)

        sim12 = sim12 * pl.reciprocal(
            jnp.sum(sim12, axis=1, keepdims=True) + 1e-8)
        sim21 = sim21 * pl.reciprocal(
            jnp.sum(sim21, axis=1, keepdims=True) + 1e-8)
        diff12 = diff12 * pl.reciprocal(
            jnp.sum(diff12, axis=1, keepdims=True) + 1e-8)

        # (image * attn).sum(spatial)  -> (bb, D)
        sim_vec1 = jnp.sum(img1 * sim21[:, None, :], axis=2)
        sim_vec2 = jnp.sum(img2 * sim12[:, None, :], axis=2)
        diff_vec2 = jnp.sum(img2 * diff12[:, None, :], axis=2)
        return sim_vec1, sim_vec2, diff_vec2

    sv1_a, sv2_a, diff_o = one_pair(img2a)       # pair (img1, img2_a)
    sv1_o, sv2_o, diff_a = one_pair(img2o)       # pair (img1, img2_o)

    # packed output slab (6, bb, D)
    out_ref[0] = sv1_a
    out_ref[1] = sv2_a
    out_ref[2] = diff_o
    out_ref[3] = sv1_o
    out_ref[4] = sv2_o
    out_ref[5] = diff_a


def fused_pair_attention(img1, img2_a, img2_o, lambda_attn=LAMBDA_ATTN):
    """Both forward_attn passes fused.  Returns packed (6, B, D):
       [sim_vec1_a, sim_vec2_a, diff_o, sim_vec1_o, sim_vec2_o, diff_a]."""
    B, D, L = img1.shape

    # batch-block size: keeps a 'parallel' grid axis for larger batches
    bb = 1
    for cand in (8, 4, 2, 1):
        if B % cand == 0:
            bb = cand
            break
    grid = (B // bb,)

    img_spec = pl.BlockSpec((bb, D, L), lambda i: (i, 0, 0))
    out_spec = pl.BlockSpec((6, bb, D), lambda i: (0, i, 0))

    # advisory cost estimate + VMEM budget sized from the tile footprint
    flops = 2 * B * (2 * D * L * L + 16 * L * L + 6 * D * L)
    transc = 2 * B * 2 * L * L
    bytes_acc = 4 * (3 * B * D * L + 6 * B * D)
    vmem_est = 4 * (2 * 3 * bb * D * L + 2 * 6 * bb * D + 16 * bb * L * L)
    vmem_limit = int(min(max(vmem_est, 16 << 20), 64 << 20))

    packed = pl.pallas_call(
        functools.partial(fused_pair_attn_kernel, lambda_attn=lambda_attn),
        grid=grid,
        in_specs=[img_spec, img_spec, img_spec],
        out_specs=out_spec,
        out_shape=jax.ShapeDtypeStruct((6, B, D), jnp.float32),
        compiler_params=pltpu.CompilerParams(
            dimension_semantics=("parallel",),
            vmem_limit_bytes=vmem_limit),
        cost_estimate=pl.CostEstimate(
            flops=int(flops), transcendentals=int(transc),
            bytes_accessed=int(bytes_acc)),
    )(img1, img2_a, img2_o)
    return packed


# --------------------------------------------------------------------------
# Kernel 2: fused per-branch classifier head
#   (class-embedding MLP, sim_*_embed of sv1/sv2/diff, cosine classifier)
# --------------------------------------------------------------------------
def branch_head_kernel(sv1_ref, sv2_ref, diff_ref, emb_ref,
                       sim_w_ref, sim_b_ref, mlp_w_ref, mlp_b_ref,
                       feat1_ref, feat2_ref, diff_e_ref, pred1_ref, pred2_ref,
                       *, temp):
    def linear(x, w, b):
        # x: (N, Din), w: (Dout, Din), b: (1, Dout) — contract 1 vs 1 (no .T)
        return lax.dot_general(x, w, (((1,), (1,)), ((), ())),
                               preferred_element_type=jnp.float32) + b

    def l2norm_rows(x):
        ssq = jnp.sum(x * x, axis=1, keepdims=True)
        return x * lax.rsqrt(jnp.maximum(ssq, NORM_EPS * NORM_EPS))

    sim_w = sim_w_ref[...]
    sim_b = sim_b_ref[...]

    feat1 = linear(sv1_ref[...], sim_w, sim_b)          # (B, E)
    feat2 = linear(sv2_ref[...], sim_w, sim_b)          # (B, E)
    diff_e = linear(diff_ref[...], sim_w, sim_b)        # (B, E)
    weight = linear(emb_ref[...], mlp_w_ref[...], mlp_b_ref[...])   # (C, E)

    wn = l2norm_rows(weight)
    inv_t = 1.0 / temp
    pred1 = lax.dot_general(l2norm_rows(feat1), wn, (((1,), (1,)), ((), ())),
                            preferred_element_type=jnp.float32) * inv_t
    pred2 = lax.dot_general(l2norm_rows(feat2), wn, (((1,), (1,)), ((), ())),
                            preferred_element_type=jnp.float32) * inv_t

    feat1_ref[...] = feat1
    feat2_ref[...] = feat2
    diff_e_ref[...] = diff_e
    pred1_ref[...] = pred1
    pred2_ref[...] = pred2


def branch_head(sv1, sv2, diff, emb_table, sim_w, sim_b, mlp_w, mlp_b,
                temp=COSINE_TEMP):
    B = sv1.shape[0]
    E = sim_w.shape[0]
    C = emb_table.shape[0]
    return pl.pallas_call(
        functools.partial(branch_head_kernel, temp=temp),
        out_shape=(jax.ShapeDtypeStruct((B, E), jnp.float32),   # feat1
                   jax.ShapeDtypeStruct((B, E), jnp.float32),   # feat2
                   jax.ShapeDtypeStruct((B, E), jnp.float32),   # diff embed
                   jax.ShapeDtypeStruct((B, C), jnp.float32),   # pred1
                   jax.ShapeDtypeStruct((B, C), jnp.float32)),  # pred2
    )(sv1, sv2, diff, emb_table, sim_w, sim_b.reshape(1, E),
      mlp_w, mlp_b.reshape(1, E))


# --------------------------------------------------------------------------
# Plain-JAX glue: masked cross-entropy / accuracy
# (equals PyTorch's loss/acc over `x[mask]` when mask.sum() > 0)
# --------------------------------------------------------------------------
def masked_cross_entropy(logits, labels, mask_f):
    lse = jax.nn.logsumexp(logits, axis=1)
    picked = jnp.take_along_axis(logits, labels[:, None], axis=1)[:, 0]
    nll = lse - picked
    return jnp.sum(nll * mask_f) / jnp.sum(mask_f)


def masked_accuracy(logits, labels, mask_f):
    pred = jnp.argmax(logits, axis=1)
    correct = (pred == labels).astype(jnp.float32)
    return jnp.sum(correct * mask_f) / jnp.sum(mask_f)


# --------------------------------------------------------------------------
# ImagePairComparison.forward
# --------------------------------------------------------------------------
def image_pair_comparison_forward(params, img1, img2_a, img2_o,
                                  attr1, obj1, mask_task):
    packed = fused_pair_attention(img1, img2_a, img2_o)
    sv1_a, sv2_a, diff_o = packed[0], packed[1], packed[2]
    sv1_o, sv2_o, diff_a = packed[3], packed[4], packed[5]

    mask = (mask_task == 1)
    mask_f = mask.astype(jnp.float32)

    # ---------------- attr branch (use_attr_loss=True) -----------------
    # attr_embedder(arange(num_attrs)) == full embedding table;
    # wordemb_compose_dropout == 0 -> attr_mlp is a plain Linear.
    (attr_feat1, attr_feat2, diff_a_emb,
     attr_pred1, attr_pred2) = branch_head(
        sv1_a, sv2_a, diff_a, params["attr_emb_table"],
        params["sim_attr_w"], params["sim_attr_b"],
        params["attr_mlp_w"], params["attr_mlp_b"])

    # ---------------- obj branch (use_obj_loss=True) --------------------
    (obj_feat1, obj_feat2, diff_o_emb,
     obj_pred1, obj_pred2) = branch_head(
        sv1_o, sv2_o, diff_o, params["obj_emb_table"],
        params["sim_obj_w"], params["sim_obj_b"],
        params["obj_mlp_w"], params["obj_mlp_b"])

    out = {
        "mask": mask,
        "diff_a": diff_a_emb,      # sim_attr_embed(diff_a)
        "diff_o": diff_o_emb,      # sim_obj_embed(diff_o)
        "loss_attr": (masked_cross_entropy(attr_pred1, attr1, mask_f) +
                      masked_cross_entropy(attr_pred2, attr1, mask_f)) / 2.0,
        "acc_attr": (masked_accuracy(attr_pred1, attr1, mask_f) +
                     masked_accuracy(attr_pred2, attr1, mask_f)) / 2.0,
        "loss_obj": (masked_cross_entropy(obj_pred1, obj1, mask_f) +
                     masked_cross_entropy(obj_pred2, obj1, mask_f)) / 2.0,
        "acc_obj": (masked_accuracy(obj_pred1, obj1, mask_f) +
                    masked_accuracy(obj_pred2, obj1, mask_f)) / 2.0,
        # TODO(synk): PyTorch returns attr_feat*/obj_feat* only for masked
        # rows (dynamic shape); we return full-batch feats plus 'mask' —
        # the losses/accuracies above already apply the mask exactly.
        "attr_feat1": attr_feat1,
        "attr_feat2": attr_feat2,
        "obj_feat1": obj_feat1,
        "obj_feat2": obj_feat2,
    }
    return out


# --------------------------------------------------------------------------
if __name__ == "__main__":
    key = jax.random.PRNGKey(0)

    # small shapes consistent with the module:
    #   img*: (bs, img_dim, L)  -- L = flattened spatial positions
    B, D, L = 4, 32, 16
    EMB_DIM, WORD_DIM = 32, 32
    NUM_ATTRS, NUM_OBJS = 10, 12

    keys = jax.random.split(key, 16)

    def w_init(k, shape, scale=0.05):
        return scale * jax.random.normal(k, shape, dtype=jnp.float32)

    params = {
        # sim_attr_embed / sim_obj_embed : Linear(feat_dim -> emb_dim)
        "sim_attr_w": w_init(keys[0], (EMB_DIM, D)),
        "sim_attr_b": w_init(keys[1], (EMB_DIM,)),
        "sim_obj_w": w_init(keys[2], (EMB_DIM, D)),
        "sim_obj_b": w_init(keys[3], (EMB_DIM,)),
        # attr_mlp / obj_mlp : Linear(word_dim -> emb_dim)
        "attr_mlp_w": w_init(keys[4], (EMB_DIM, WORD_DIM)),
        "attr_mlp_b": w_init(keys[5], (EMB_DIM,)),
        "obj_mlp_w": w_init(keys[6], (EMB_DIM, WORD_DIM)),
        "obj_mlp_b": w_init(keys[7], (EMB_DIM,)),
        # attr/obj embedding tables (embedder(arange(N)) == table)
        "attr_emb_table": w_init(keys[8], (NUM_ATTRS, WORD_DIM), 1.0),
        "obj_emb_table": w_init(keys[9], (NUM_OBJS, WORD_DIM), 1.0),
    }

    img1 = jax.random.normal(keys[10], (B, D, L), dtype=jnp.float32)
    img2_a = jax.random.normal(keys[11], (B, D, L), dtype=jnp.float32)
    img2_o = jax.random.normal(keys[12], (B, D, L), dtype=jnp.float32)
    attr1 = jax.random.randint(keys[13], (B,), 0, NUM_ATTRS, dtype=jnp.int32)
    obj1 = jax.random.randint(keys[14], (B,), 0, NUM_OBJS, dtype=jnp.int32)
    mask_task = jnp.array([1, 0, 1, 1], dtype=jnp.int32)

    fwd = jax.jit(image_pair_comparison_forward)
    out = fwd(params, img1, img2_a, img2_o, attr1, obj1, mask_task)
    jax.block_until_ready(out)
    print("KERNEL_OK")
</pallas_src>

<mosaic_0001>
module attributes {stable_mosaic.version = 11 : i64} {
  func.func @fused_pair_attn_kernel(%arg0: i32, %arg1: memref<4x32x16xf32, #tpu.memory_space<vmem>>, %arg2: memref<4x32x16xf32, #tpu.memory_space<vmem>>, %arg3: memref<4x32x16xf32, #tpu.memory_space<vmem>>, %arg4: memref<6x4x32xf32, #tpu.memory_space<vmem>>) attributes {dimension_semantics = [#tpu.dimension_semantics<parallel>], iteration_bounds = array<i64: 1>, scalar_prefetch = 0 : i64, scratch_operands = 0 : i64, tpu.core_type = #tpu.core_type<tc>, window_params = [{transform_indices = @transform_0, window_bounds = array<i64: 4, 32, 16>}, {transform_indices = @transform_1, window_bounds = array<i64: 4, 32, 16>}, {transform_indices = @transform_2, window_bounds = array<i64: 4, 32, 16>}, {transform_indices = @transform_3, window_bounds = array<i64: 6, 4, 32>}]} {
    %c0 = arith.constant 0 : index
    %c0_0 = arith.constant 0 : index
    %c0_1 = arith.constant 0 : index
    %0 = vector.load %arg1[%c0, %c0_0, %c0_1] : memref<4x32x16xf32, #tpu.memory_space<vmem>>, vector<4x32x16xf32>
    %c0_2 = arith.constant 0 : index
    %c0_3 = arith.constant 0 : index
    %c0_4 = arith.constant 0 : index
    %1 = vector.load %arg2[%c0_2, %c0_3, %c0_4] : memref<4x32x16xf32, #tpu.memory_space<vmem>>, vector<4x32x16xf32>
    %c0_5 = arith.constant 0 : index
    %c0_6 = arith.constant 0 : index
    %c0_7 = arith.constant 0 : index
    %2 = vector.load %arg3[%c0_5, %c0_6, %c0_7] : memref<4x32x16xf32, #tpu.memory_space<vmem>>, vector<4x32x16xf32>
    %3 = arith.mulf %0, %0 : vector<4x32x16xf32>
    %cst = arith.constant dense<0.000000e+00> : vector<4x16xf32>
    %4 = vector.multi_reduction <add>, %3, %cst [1] : vector<4x32x16xf32> to vector<4x16xf32>
    %5 = vector.shape_cast %4 : vector<4x16xf32> to vector<4x1x16xf32>
    %cst_8 = arith.constant 1.000000e-24 : f32
    %6 = vector.broadcast %cst_8 : f32 to vector<4x1x16xf32>
    %7 = arith.maximumf %5, %6 : vector<4x1x16xf32>
    %8 = math.rsqrt %7 : vector<4x1x16xf32>
    %9 = vector.broadcast %8 : vector<4x1x16xf32> to vector<4x32x16xf32>
    %10 = arith.mulf %0, %9 : vector<4x32x16xf32>
    %11 = arith.mulf %1, %1 : vector<4x32x16xf32>
    %cst_9 = arith.constant dense<0.000000e+00> : vector<4x16xf32>
    %12 = vector.multi_reduction <add>, %11, %cst_9 [1] : vector<4x32x16xf32> to vector<4x16xf32>
    %13 = vector.shape_cast %12 : vector<4x16xf32> to vector<4x1x16xf32>
    %cst_10 = arith.constant 1.000000e-24 : f32
    %14 = vector.broadcast %cst_10 : f32 to vector<4x1x16xf32>
    %15 = arith.maximumf %13, %14 : vector<4x1x16xf32>
    %16 = math.rsqrt %15 : vector<4x1x16xf32>
    %17 = vector.broadcast %16 : vector<4x1x16xf32> to vector<4x32x16xf32>
    %18 = arith.mulf %1, %17 : vector<4x32x16xf32>
    "tpu.trace_start"() <{level = 10 : i32, message = "bdi,bdj->bij"}> : () -> ()
    %cst_11 = arith.constant dense<0.000000e+00> : vector<4x16x16xf32>
    %19 = tpu.matmul %10, %18, %cst_11 {dimension_numbers = #tpu.dot_dimension_numbers<[1], [1], [2], [2], [0, 0, 0, 2, 1, 2], [0], [0]>} : vector<4x32x16xf32>, vector<4x32x16xf32>, vector<4x16x16xf32> -> vector<4x16x16xf32>
    "tpu.trace_stop"() : () -> ()
    %cst_12 = arith.constant 1.000000e+01 : f32
    %20 = vector.broadcast %cst_12 : f32 to vector<4x16x16xf32>
    %21 = arith.mulf %19, %20 : vector<4x16x16xf32>
    %cst_13 = arith.constant dense<0xFF800000> : vector<4x16xf32>
    %22 = vector.multi_reduction <maximumf>, %21, %cst_13 [2] : vector<4x16x16xf32> to vector<4x16xf32>
    %23 = vector.shape_cast %22 : vector<4x16xf32> to vector<4x16x1xf32>
    %24 = vector.broadcast %23 : vector<4x16x1xf32> to vector<4x16x16xf32>
    %25 = arith.subf %21, %24 : vector<4x16x16xf32>
    %26 = math.exp %25 : vector<4x16x16xf32>
    %cst_14 = arith.constant dense<0.000000e+00> : vector<4x16xf32>
    %27 = vector.multi_reduction <add>, %26, %cst_14 [2] : vector<4x16x16xf32> to vector<4x16xf32>
    %28 = vector.shape_cast %27 : vector<4x16xf32> to vector<4x16x1xf32>
    %29 = tpu.reciprocal %28 : vector<4x16x1xf32> -> vector<4x16x1xf32>
    %30 = vector.broadcast %29 : vector<4x16x1xf32> to vector<4x16x16xf32>
    %31 = arith.mulf %26, %30 : vector<4x16x16xf32>
    %cst_15 = arith.constant dense<0xFF800000> : vector<4x16xf32>
    %32 = vector.multi_reduction <maximumf>, %21, %cst_15 [1] : vector<4x16x16xf32> to vector<4x16xf32>
    %33 = vector.shape_cast %32 : vector<4x16xf32> to vector<4x1x16xf32>
    %34 = vector.broadcast %33 : vector<4x1x16xf32> to vector<4x16x16xf32>
    %35 = arith.subf %21, %34 : vector<4x16x16xf32>
    %36 = math.exp %35 : vector<4x16x16xf32>
    %cst_16 = arith.constant dense<0.000000e+00> : vector<4x16xf32>
    %37 = vector.multi_reduction <add>, %36, %cst_16 [1] : vector<4x16x16xf32> to vector<4x16xf32>
    %38 = vector.shape_cast %37 : vector<4x16xf32> to vector<4x1x16xf32>
    %39 = tpu.reciprocal %38 : vector<4x1x16xf32> -> vector<4x1x16xf32>
    %40 = vector.broadcast %39 : vector<4x1x16xf32> to vector<4x16x16xf32>
    %41 = arith.mulf %36, %40 : vector<4x16x16xf32>
    %42 = tpu.reciprocal %26 : vector<4x16x16xf32> -> vector<4x16x16xf32>
    %cst_17 = arith.constant dense<0.000000e+00> : vector<4x16xf32>
    %43 = vector.multi_reduction <add>, %42, %cst_17 [2] : vector<4x16x16xf32> to vector<4x16xf32>
    %44 = vector.shape_cast %43 : vector<4x16xf32> to vector<4x16x1xf32>
    %45 = tpu.reciprocal %44 : vector<4x16x1xf32> -> vector<4x16x1xf32>
    %46 = vector.broadcast %45 : vector<4x16x1xf32> to vector<4x16x16xf32>
    %47 = arith.mulf %42, %46 : vector<4x16x16xf32>
    %cst_18 = arith.constant dense<0.000000e+00> : vector<4x16xf32>
    %48 = vector.multi_reduction <add>, %31, %cst_18 [1] : vector<4x16x16xf32> to vector<4x16xf32>
    %cst_19 = arith.constant dense<0.000000e+00> : vector<4x16xf32>
    %49 = vector.multi_reduction <add>, %41, %cst_19 [2] : vector<4x16x16xf32> to vector<4x16xf32>
    %cst_20 = arith.constant dense<0.000000e+00> : vector<4x16xf32>
    %50 = vector.multi_reduction <add>, %47, %cst_20 [1] : vector<4x16x16xf32> to vector<4x16xf32>
    %cst_21 = arith.constant dense<0.000000e+00> : vector<4xf32>
    %51 = vector.multi_reduction <add>, %48, %cst_21 [1] : vector<4x16xf32> to vector<4xf32>
    %52 = vector.shape_cast %51 : vector<4xf32> to vector<4x1xf32>
    %cst_22 = arith.constant 9.99999993E-9 : f32
    %53 = vector.broadcast %cst_22 : f32 to vector<4x1xf32>
    %54 = arith.addf %52, %53 : vector<4x1xf32>
    %55 = tpu.reciprocal %54 : vector<4x1xf32> -> vector<4x1xf32>
    %56 = vector.broadcast %55 : vector<4x1xf32> to vector<4x16xf32>
    %57 = arith.mulf %48, %56 : vector<4x16xf32>
    %cst_23 = arith.constant dense<0.000000e+00> : vector<4xf32>
    %58 = vector.multi_reduction <add>, %49, %cst_23 [1] : vector<4x16xf32> to vector<4xf32>
    %59 = vector.shape_cast %58 : vector<4xf32> to vector<4x1xf32>
    %cst_24 = arith.constant 9.99999993E-9 : f32
    %60 = vector.broadcast %cst_24 : f32 to vector<4x1xf32>
    %61 = arith.addf %59, %60 : vector<4x1xf32>
    %62 = tpu.reciprocal %61 : vector<4x1xf32> -> vector<4x1xf32>
    %63 = vector.broadcast %62 : vector<4x1xf32> to vector<4x16xf32>
    %64 = arith.mulf %49, %63 : vector<4x16xf32>
    %cst_25 = arith.constant dense<0.000000e+00> : vector<4xf32>
    %65 = vector.multi_reduction <add>, %50, %cst_25 [1] : vector<4x16xf32> to vector<4xf32>
    %66 = vector.shape_cast %65 : vector<4xf32> to vector<4x1xf32>
    %cst_26 = arith.constant 9.99999993E-9 : f32
    %67 = vector.broadcast %cst_26 : f32 to vector<4x1xf32>
    %68 = arith.addf %66, %67 : vector<4x1xf32>
    %69 = tpu.reciprocal %68 : vector<4x1xf32> -> vector<4x1xf32>
    %70 = vector.broadcast %69 : vector<4x1xf32> to vector<4x16xf32>
    %71 = arith.mulf %50, %70 : vector<4x16xf32>
    %72 = vector.shape_cast %64 : vector<4x16xf32> to vector<4x1x16xf32>
    %73 = vector.broadcast %72 : vector<4x1x16xf32> to vector<4x32x16xf32>
    %74 = arith.mulf %0, %73 : vector<4x32x16xf32>
    %cst_27 = arith.constant dense<0.000000e+00> : vector<4x32xf32>
    %75 = vector.multi_reduction <add>, %74, %cst_27 [2] : vector<4x32x16xf32> to vector<4x32xf32>
    %76 = vector.shape_cast %57 : vector<4x16xf32> to vector<4x1x16xf32>
    %77 = vector.broadcast %76 : vector<4x1x16xf32> to vector<4x32x16xf32>
    %78 = arith.mulf %1, %77 : vector<4x32x16xf32>
    %cst_28 = arith.constant dense<0.000000e+00> : vector<4x32xf32>
    %79 = vector.multi_reduction <add>, %78, %cst_28 [2] : vector<4x32x16xf32> to vector<4x32xf32>
    %80 = vector.shape_cast %71 : vector<4x16xf32> to vector<4x1x16xf32>
    %81 = vector.broadcast %80 : vector<4x1x16xf32> to vector<4x32x16xf32>
    %82 = arith.mulf %1, %81 : vector<4x32x16xf32>
    %cst_29 = arith.constant dense<0.000000e+00> : vector<4x32xf32>
    %83 = vector.multi_reduction <add>, %82, %cst_29 [2] : vector<4x32x16xf32> to vector<4x32xf32>
    %84 = arith.mulf %2, %2 : vector<4x32x16xf32>
    %cst_30 = arith.constant dense<0.000000e+00> : vector<4x16xf32>
    %85 = vector.multi_reduction <add>, %84, %cst_30 [1] : vector<4x32x16xf32> to vector<4x16xf32>
    %86 = vector.shape_cast %85 : vector<4x16xf32> to vector<4x1x16xf32>
    %cst_31 = arith.constant 1.000000e-24 : f32
    %87 = vector.broadcast %cst_31 : f32 to vector<4x1x16xf32>
    %88 = arith.maximumf %86, %87 : vector<4x1x16xf32>
    %89 = math.rsqrt %88 : vector<4x1x16xf32>
    %90 = vector.broadcast %89 : vector<4x1x16xf32> to vector<4x32x16xf32>
    %91 = arith.mulf %2, %90 : vector<4x32x16xf32>
    "tpu.trace_start"() <{level = 10 : i32, message = "bdi,bdj->bij"}> : () -> ()
    %cst_32 = arith.constant dense<0.000000e+00> : vector<4x16x16xf32>
    %92 = tpu.matmul %10, %91, %cst_32 {dimension_numbers = #tpu.dot_dimension_numbers<[1], [1], [2], [2], [0, 0, 0, 2, 1, 2], [0], [0]>} : vector<4x32x16xf32>, vector<4x32x16xf32>, vector<4x16x16xf32> -> vector<4x16x16xf32>
    "tpu.trace_stop"() : () -> ()
    %cst_33 = arith.constant 1.000000e+01 : f32
    %93 = vector.broadcast %cst_33 : f32 to vector<4x16x16xf32>
    %94 = arith.mulf %92, %93 : vector<4x16x16xf32>
    %cst_34 = arith.constant dense<0xFF800000> : vector<4x16xf32>
    %95 = vector.multi_reduction <maximumf>, %94, %cst_34 [2] : vector<4x16x16xf32> to vector<4x16xf32>
    %96 = vector.shape_cast %95 : vector<4x16xf32> to vector<4x16x1xf32>
    %97 = vector.broadcast %96 : vector<4x16x1xf32> to vector<4x16x16xf32>
    %98 = arith.subf %94, %97 : vector<4x16x16xf32>
    %99 = math.exp %98 : vector<4x16x16xf32>
    %cst_35 = arith.constant dense<0.000000e+00> : vector<4x16xf32>
    %100 = vector.multi_reduction <add>, %99, %cst_35 [2] : vector<4x16x16xf32> to vector<4x16xf32>
    %101 = vector.shape_cast %100 : vector<4x16xf32> to vector<4x16x1xf32>
    %102 = tpu.reciprocal %101 : vector<4x16x1xf32> -> vector<4x16x1xf32>
    %103 = vector.broadcast %102 : vector<4x16x1xf32> to vector<4x16x16xf32>
    %104 = arith.mulf %99, %103 : vector<4x16x16xf32>
    %cst_36 = arith.constant dense<0xFF800000> : vector<4x16xf32>
    %105 = vector.multi_reduction <maximumf>, %94, %cst_36 [1] : vector<4x16x16xf32> to vector<4x16xf32>
    %106 = vector.shape_cast %105 : vector<4x16xf32> to vector<4x1x16xf32>
    %107 = vector.broadcast %106 : vector<4x1x16xf32> to vector<4x16x16xf32>
    %108 = arith.subf %94, %107 : vector<4x16x16xf32>
    %109 = math.exp %108 : vector<4x16x16xf32>
    %cst_37 = arith.constant dense<0.000000e+00> : vector<4x16xf32>
    %110 = vector.multi_reduction <add>, %109, %cst_37 [1] : vector<4x16x16xf32> to vector<4x16xf32>
    %111 = vector.shape_cast %110 : vector<4x16xf32> to vector<4x1x16xf32>
    %112 = tpu.reciprocal %111 : vector<4x1x16xf32> -> vector<4x1x16xf32>
    %113 = vector.broadcast %112 : vector<4x1x16xf32> to vector<4x16x16xf32>
    %114 = arith.mulf %109, %113 : vector<4x16x16xf32>
    %115 = tpu.reciprocal %99 : vector<4x16x16xf32> -> vector<4x16x16xf32>
    %cst_38 = arith.constant dense<0.000000e+00> : vector<4x16xf32>
    %116 = vector.multi_reduction <add>, %115, %cst_38 [2] : vector<4x16x16xf32> to vector<4x16xf32>
    %117 = vector.shape_cast %116 : vector<4x16xf32> to vector<4x16x1xf32>
    %118 = tpu.reciprocal %117 : vector<4x16x1xf32> -> vector<4x16x1xf32>
    %119 = vector.broadcast %118 : vector<4x16x1xf32> to vector<4x16x16xf32>
    %120 = arith.mulf %115, %119 : vector<4x16x16xf32>
    %cst_39 = arith.constant dense<0.000000e+00> : vector<4x16xf32>
    %121 = vector.multi_reduction <add>, %104, %cst_39 [1] : vector<4x16x16xf32> to vector<4x16xf32>
    %cst_40 = arith.constant dense<0.000000e+00> : vector<4x16xf32>
    %122 = vector.multi_reduction <add>, %114, %cst_40 [2] : vector<4x16x16xf32> to vector<4x16xf32>
    %cst_41 = arith.constant dense<0.000000e+00> : vector<4x16xf32>
    %123 = vector.multi_reduction <add>, %120, %cst_41 [1] : vector<4x16x16xf32> to vector<4x16xf32>
    %cst_42 = arith.constant dense<0.000000e+00> : vector<4xf32>
    %124 = vector.multi_reduction <add>, %121, %cst_42 [1] : vector<4x16xf32> to vector<4xf32>
    %125 = vector.shape_cast %124 : vector<4xf32> to vector<4x1xf32>
    %cst_43 = arith.constant 9.99999993E-9 : f32
    %126 = vector.broadcast %cst_43 : f32 to vector<4x1xf32>
    %127 = arith.addf %125, %126 : vector<4x1xf32>
    %128 = tpu.reciprocal %127 : vector<4x1xf32> -> vector<4x1xf32>
    %129 = vector.broadcast %128 : vector<4x1xf32> to vector<4x16xf32>
    %130 = arith.mulf %121, %129 : vector<4x16xf32>
    %cst_44 = arith.constant dense<0.000000e+00> : vector<4xf32>
    %131 = vector.multi_reduction <add>, %122, %cst_44 [1] : vector<4x16xf32> to vector<4xf32>
    %132 = vector.shape_cast %131 : vector<4xf32> to vector<4x1xf32>
    %cst_45 = arith.constant 9.99999993E-9 : f32
    %133 = vector.broadcast %cst_45 : f32 to vector<4x1xf32>
    %134 = arith.addf %132, %133 : vector<4x1xf32>
    %135 = tpu.reciprocal %134 : vector<4x1xf32> -> vector<4x1xf32>
    %136 = vector.broadcast %135 : vector<4x1xf32> to vector<4x16xf32>
    %137 = arith.mulf %122, %136 : vector<4x16xf32>
    %cst_46 = arith.constant dense<0.000000e+00> : vector<4xf32>
    %138 = vector.multi_reduction <add>, %123, %cst_46 [1] : vector<4x16xf32> to vector<4xf32>
    %139 = vector.shape_cast %138 : vector<4xf32> to vector<4x1xf32>
    %cst_47 = arith.constant 9.99999993E-9 : f32
    %140 = vector.broadcast %cst_47 : f32 to vector<4x1xf32>
    %141 = arith.addf %139, %140 : vector<4x1xf32>
    %142 = tpu.reciprocal %141 : vector<4x1xf32> -> vector<4x1xf32>
    %143 = vector.broadcast %142 : vector<4x1xf32> to vector<4x16xf32>
    %144 = arith.mulf %123, %143 : vector<4x16xf32>
    %145 = vector.shape_cast %137 : vector<4x16xf32> to vector<4x1x16xf32>
    %146 = vector.broadcast %145 : vector<4x1x16xf32> to vector<4x32x16xf32>
    %147 = arith.mulf %0, %146 : vector<4x32x16xf32>
    %cst_48 = arith.constant dense<0.000000e+00> : vector<4x32xf32>
    %148 = vector.multi_reduction <add>, %147, %cst_48 [2] : vector<4x32x16xf32> to vector<4x32xf32>
    %149 = vector.shape_cast %130 : vector<4x16xf32> to vector<4x1x16xf32>
    %150 = vector.broadcast %149 : vector<4x1x16xf32> to vector<4x32x16xf32>
    %151 = arith.mulf %2, %150 : vector<4x32x16xf32>
    %cst_49 = arith.constant dense<0.000000e+00> : vector<4x32xf32>
    %152 = vector.multi_reduction <add>, %151, %cst_49 [2] : vector<4x32x16xf32> to vector<4x32xf32>
    %153 = vector.shape_cast %144 : vector<4x16xf32> to vector<4x1x16xf32>
    %154 = vector.broadcast %153 : vector<4x1x16xf32> to vector<4x32x16xf32>
    %155 = arith.mulf %2, %154 : vector<4x32x16xf32>
    %cst_50 = arith.constant dense<0.000000e+00> : vector<4x32xf32>
    %156 = vector.multi_reduction <add>, %155, %cst_50 [2] : vector<4x32x16xf32> to vector<4x32xf32>
    %c0_51 = arith.constant 0 : index
    %c0_52 = arith.constant 0 : index
    %c0_53 = arith.constant 0 : index
    %157 = vector.load %arg4[%c0_51, %c0_52, %c0_53] : memref<6x4x32xf32, #tpu.memory_space<vmem>>, vector<1x4x32xf32>
    %158 = vector.shape_cast %157 : vector<1x4x32xf32> to vector<4x32xf32>
    %159 = vector.shape_cast %75 : vector<4x32xf32> to vector<1x4x32xf32>
    tpu.vector_store %arg4[%c0_51, %c0_52, %c0_53], %159 {strides = array<i32>} : memref<6x4x32xf32, #tpu.memory_space<vmem>>, vector<1x4x32xf32>,
    %c1 = arith.constant 1 : index
    %c0_54 = arith.constant 0 : index
    %c0_55 = arith.constant 0 : index
    %160 = vector.load %arg4[%c1, %c0_54, %c0_55] : memref<6x4x32xf32, #tpu.memory_space<vmem>>, vector<1x4x32xf32>
    %161 = vector.shape_cast %160 : vector<1x4x32xf32> to vector<4x32xf32>
    %162 = vector.shape_cast %79 : vector<4x32xf32> to vector<1x4x32xf32>
    tpu.vector_store %arg4[%c1, %c0_54, %c0_55], %162 {strides = array<i32>} : memref<6x4x32xf32, #tpu.memory_space<vmem>>, vector<1x4x32xf32>,
    %c2 = arith.constant 2 : index
    %c0_56 = arith.constant 0 : index
    %c0_57 = arith.constant 0 : index
    %163 = vector.load %arg4[%c2, %c0_56, %c0_57] : memref<6x4x32xf32, #tpu.memory_space<vmem>>, vector<1x4x32xf32>
    %164 = vector.shape_cast %163 : vector<1x4x32xf32> to vector<4x32xf32>
    %165 = vector.shape_cast %83 : vector<4x32xf32> to vector<1x4x32xf32>
    tpu.vector_store %arg4[%c2, %c0_56, %c0_57], %165 {strides = array<i32>} : memref<6x4x32xf32, #tpu.memory_space<vmem>>, vector<1x4x32xf32>,
    %c3 = arith.constant 3 : index
    %c0_58 = arith.constant 0 : index
    %c0_59 = arith.constant 0 : index
    %166 = vector.load %arg4[%c3, %c0_58, %c0_59] : memref<6x4x32xf32, #tpu.memory_space<vmem>>, vector<1x4x32xf32>
    %167 = vector.shape_cast %166 : vector<1x4x32xf32> to vector<4x32xf32>
    %168 = vector.shape_cast %148 : vector<4x32xf32> to vector<1x4x32xf32>
    tpu.vector_store %arg4[%c3, %c0_58, %c0_59], %168 {strides = array<i32>} : memref<6x4x32xf32, #tpu.memory_space<vmem>>, vector<1x4x32xf32>,
    %c4 = arith.constant 4 : index
    %c0_60 = arith.constant 0 : index
    %c0_61 = arith.constant 0 : index
    %169 = vector.load %arg4[%c4, %c0_60, %c0_61] : memref<6x4x32xf32, #tpu.memory_space<vmem>>, vector<1x4x32xf32>
    %170 = vector.shape_cast %169 : vector<1x4x32xf32> to vector<4x32xf32>
    %171 = vector.shape_cast %152 : vector<4x32xf32> to vector<1x4x32xf32>
    tpu.vector_store %arg4[%c4, %c0_60, %c0_61], %171 {strides = array<i32>} : memref<6x4x32xf32, #tpu.memory_space<vmem>>, vector<1x4x32xf32>,
    %c5 = arith.constant 5 : index
    %c0_62 = arith.constant 0 : index
    %c0_63 = arith.constant 0 : index
    %172 = vector.load %arg4[%c5, %c0_62, %c0_63] : memref<6x4x32xf32, #tpu.memory_space<vmem>>, vector<1x4x32xf32>
    %173 = vector.shape_cast %172 : vector<1x4x32xf32> to vector<4x32xf32>
    %174 = vector.shape_cast %156 : vector<4x32xf32> to vector<1x4x32xf32>
    tpu.vector_store %arg4[%c5, %c0_62, %c0_63], %174 {strides = array<i32>} : memref<6x4x32xf32, #tpu.memory_space<vmem>>, vector<1x4x32xf32>,
    return
  }
  func.func @transform_0(%arg0: i32) -> (i32, i32, i32) {
    %c0_i32 = arith.constant 0 : i32
    %c0_i32_0 = arith.constant 0 : i32
    %c0_i32_1 = arith.constant 0 : i32
    return %arg0, %c0_i32, %c0_i32_0 : i32, i32, i32
  }
  func.func @transform_1(%arg0: i32) -> (i32, i32, i32) {
    %c0_i32 = arith.constant 0 : i32
    %c0_i32_0 = arith.constant 0 : i32
    %c0_i32_1 = arith.constant 0 : i32
    return %arg0, %c0_i32, %c0_i32_0 : i32, i32, i32
  }
  func.func @transform_2(%arg0: i32) -> (i32, i32, i32) {
    %c0_i32 = arith.constant 0 : i32
    %c0_i32_0 = arith.constant 0 : i32
    %c0_i32_1 = arith.constant 0 : i32
    return %arg0, %c0_i32, %c0_i32_0 : i32, i32, i32
  }
  func.func @transform_3(%arg0: i32) -> (i32, i32, i32) {
    %c0_i32 = arith.constant 0 : i32
    %c0_i32_0 = arith.constant 0 : i32
    %c0_i32_1 = arith.constant 0 : i32
    return %c0_i32, %arg0, %c0_i32_0 : i32, i32, i32
  }
}

module attributes {stable_mosaic.version = 11 : i64} {
  func.func @branch_head_kernel(%arg0: memref<4x32xf32, #tpu.memory_space<vmem>>, %arg1: memref<4x32xf32, #tpu.memory_space<vmem>>, %arg2: memref<4x32xf32, #tpu.memory_space<vmem>>, %arg3: memref<10x32xf32, #tpu.memory_space<vmem>>, %arg4: memref<32x32xf32, #tpu.memory_space<vmem>>, %arg5: memref<1x32xf32, #tpu.memory_space<vmem>>, %arg6: memref<32x32xf32, #tpu.memory_space<vmem>>, %arg7: memref<1x32xf32, #tpu.memory_space<vmem>>, %arg8: memref<4x32xf32, #tpu.memory_space<vmem>>, %arg9: memref<4x32xf32, #tpu.memory_space<vmem>>, %arg10: memref<4x32xf32, #tpu.memory_space<vmem>>, %arg11: memref<4x10xf32, #tpu.memory_space<vmem>>, %arg12: memref<4x10xf32, #tpu.memory_space<vmem>>) attributes {dimension_semantics = [], scalar_prefetch = 0 : i64, scratch_operands = 0 : i64, tpu.core_type = #tpu.core_type<tc>} {
    %c0 = arith.constant 0 : index
    %c0_0 = arith.constant 0 : index
    %0 = vector.load %arg4[%c0, %c0_0] : memref<32x32xf32, #tpu.memory_space<vmem>>, vector<32x32xf32>
    %c0_1 = arith.constant 0 : index
    %c0_2 = arith.constant 0 : index
    %1 = vector.load %arg5[%c0_1, %c0_2] : memref<1x32xf32, #tpu.memory_space<vmem>>, vector<1x32xf32>
    %c0_3 = arith.constant 0 : index
    %c0_4 = arith.constant 0 : index
    %2 = vector.load %arg0[%c0_3, %c0_4] : memref<4x32xf32, #tpu.memory_space<vmem>>, vector<4x32xf32>
    %cst = arith.constant dense<0.000000e+00> : vector<4x32xf32>
    %3 = tpu.matmul %2, %0, %cst {dimension_numbers = #tpu.dot_dimension_numbers<[1], [1], [0], [0], [0, 0, 1, 0], [], []>} : vector<4x32xf32>, vector<32x32xf32>, vector<4x32xf32> -> vector<4x32xf32>
    %4 = vector.broadcast %1 : vector<1x32xf32> to vector<4x32xf32>
    %5 = arith.addf %3, %4 : vector<4x32xf32>
    %c0_5 = arith.constant 0 : index
    %c0_6 = arith.constant 0 : index
    %6 = vector.load %arg1[%c0_5, %c0_6] : memref<4x32xf32, #tpu.memory_space<vmem>>, vector<4x32xf32>
    %cst_7 = arith.constant dense<0.000000e+00> : vector<4x32xf32>
    %7 = tpu.matmul %6, %0, %cst_7 {dimension_numbers = #tpu.dot_dimension_numbers<[1], [1], [0], [0], [0, 0, 1, 0], [], []>} : vector<4x32xf32>, vector<32x32xf32>, vector<4x32xf32> -> vector<4x32xf32>
    %8 = vector.broadcast %1 : vector<1x32xf32> to vector<4x32xf32>
    %9 = arith.addf %7, %8 : vector<4x32xf32>
    %c0_8 = arith.constant 0 : index
    %c0_9 = arith.constant 0 : index
    %10 = vector.load %arg2[%c0_8, %c0_9] : memref<4x32xf32, #tpu.memory_space<vmem>>, vector<4x32xf32>
    %cst_10 = arith.constant dense<0.000000e+00> : vector<4x32xf32>
    %11 = tpu.matmul %10, %0, %cst_10 {dimension_numbers = #tpu.dot_dimension_numbers<[1], [1], [0], [0], [0, 0, 1, 0], [], []>} : vector<4x32xf32>, vector<32x32xf32>, vector<4x32xf32> -> vector<4x32xf32>
    %12 = vector.broadcast %1 : vector<1x32xf32> to vector<4x32xf32>
    %13 = arith.addf %11, %12 : vector<4x32xf32>
    %c0_11 = arith.constant 0 : index
    %c0_12 = arith.constant 0 : index
    %14 = vector.load %arg3[%c0_11, %c0_12] : memref<10x32xf32, #tpu.memory_space<vmem>>, vector<10x32xf32>
    %c0_13 = arith.constant 0 : index
    %c0_14 = arith.constant 0 : index
    %15 = vector.load %arg6[%c0_13, %c0_14] : memref<32x32xf32, #tpu.memory_space<vmem>>, vector<32x32xf32>
    %c0_15 = arith.constant 0 : index
    %c0_16 = arith.constant 0 : index
    %16 = vector.load %arg7[%c0_15, %c0_16] : memref<1x32xf32, #tpu.memory_space<vmem>>, vector<1x32xf32>
    %cst_17 = arith.constant dense<0.000000e+00> : vector<10x32xf32>
    %17 = tpu.matmul %14, %15, %cst_17 {dimension_numbers = #tpu.dot_dimension_numbers<[1], [1], [0], [0], [0, 0, 1, 0], [], []>} : vector<10x32xf32>, vector<32x32xf32>, vector<10x32xf32> -> vector<10x32xf32>
    %18 = vector.broadcast %16 : vector<1x32xf32> to vector<10x32xf32>
    %19 = arith.addf %17, %18 : vector<10x32xf32>
    %20 = arith.mulf %19, %19 : vector<10x32xf32>
    %cst_18 = arith.constant dense<0.000000e+00> : vector<10xf32>
    %21 = vector.multi_reduction <add>, %20, %cst_18 [1] : vector<10x32xf32> to vector<10xf32>
    %22 = vector.shape_cast %21 : vector<10xf32> to vector<10x1xf32>
    %cst_19 = arith.constant 1.000000e-24 : f32
    %23 = vector.broadcast %cst_19 : f32 to vector<10x1xf32>
    %24 = arith.maximumf %22, %23 : vector<10x1xf32>
    %25 = math.rsqrt %24 : vector<10x1xf32>
    %26 = vector.broadcast %25 : vector<10x1xf32> to vector<10x32xf32>
    %27 = arith.mulf %19, %26 : vector<10x32xf32>
    %28 = arith.mulf %5, %5 : vector<4x32xf32>
    %cst_20 = arith.constant dense<0.000000e+00> : vector<4xf32>
    %29 = vector.multi_reduction <add>, %28, %cst_20 [1] : vector<4x32xf32> to vector<4xf32>
    %30 = vector.shape_cast %29 : vector<4xf32> to vector<4x1xf32>
    %cst_21 = arith.constant 1.000000e-24 : f32
    %31 = vector.broadcast %cst_21 : f32 to vector<4x1xf32>
    %32 = arith.maximumf %30, %31 : vector<4x1xf32>
    %33 = math.rsqrt %32 : vector<4x1xf32>
    %34 = vector.broadcast %33 : vector<4x1xf32> to vector<4x32xf32>
    %35 = arith.mulf %5, %34 : vector<4x32xf32>
    %cst_22 = arith.constant dense<0.000000e+00> : vector<4x10xf32>
    %36 = tpu.matmul %35, %27, %cst_22 {dimension_numbers = #tpu.dot_dimension_numbers<[1], [1], [0], [0], [0, 0, 1, 0], [], []>} : vector<4x32xf32>, vector<10x32xf32>, vector<4x10xf32> -> vector<4x10xf32>
    %cst_23 = arith.constant 2.000000e+01 : f32
    %37 = vector.broadcast %cst_23 : f32 to vector<4x10xf32>
    %38 = arith.mulf %36, %37 : vector<4x10xf32>
    %39 = arith.mulf %9, %9 : vector<4x32xf32>
    %cst_24 = arith.constant dense<0.000000e+00> : vector<4xf32>
    %40 = vector.multi_reduction <add>, %39, %cst_24 [1] : vector<4x32xf32> to vector<4xf32>
    %41 = vector.shape_cast %40 : vector<4xf32> to vector<4x1xf32>
    %cst_25 = arith.constant 1.000000e-24 : f32
    %42 = vector.broadcast %cst_25 : f32 to vector<4x1xf32>
    %43 = arith.maximumf %41, %42 : vector<4x1xf32>
    %44 = math.rsqrt %43 : vector<4x1xf32>
    %45 = vector.broadcast %44 : vector<4x1xf32> to vector<4x32xf32>
    %46 = arith.mulf %9, %45 : vector<4x32xf32>
    %cst_26 = arith.constant dense<0.000000e+00> : vector<4x10xf32>
    %47 = tpu.matmul %46, %27, %cst_26 {dimension_numbers = #tpu.dot_dimension_numbers<[1], [1], [0], [0], [0, 0, 1, 0], [], []>} : vector<4x32xf32>, vector<10x32xf32>, vector<4x10xf32> -> vector<4x10xf32>
    %cst_27 = arith.constant 2.000000e+01 : f32
    %48 = vector.broadcast %cst_27 : f32 to vector<4x10xf32>
    %49 = arith.mulf %47, %48 : vector<4x10xf32>
    %c0_28 = arith.constant 0 : index
    %c0_29 = arith.constant 0 : index
    %50 = vector.load %arg8[%c0_28, %c0_29] : memref<4x32xf32, #tpu.memory_space<vmem>>, vector<4x32xf32>
    tpu.vector_store %arg8[%c0_28, %c0_29], %5 {strides = array<i32>} : memref<4x32xf32, #tpu.memory_space<vmem>>, vector<4x32xf32>,
    %c0_30 = arith.constant 0 : index
    %c0_31 = arith.constant 0 : index
    %51 = vector.load %arg9[%c0_30, %c0_31] : memref<4x32xf32, #tpu.memory_space<vmem>>, vector<4x32xf32>
    tpu.vector_store %arg9[%c0_30, %c0_31], %9 {strides = array<i32>} : memref<4x32xf32, #tpu.memory_space<vmem>>, vector<4x32xf32>,
    %c0_32 = arith.constant 0 : index
    %c0_33 = arith.constant 0 : index
    %52 = vector.load %arg10[%c0_32, %c0_33] : memref<4x32xf32, #tpu.memory_space<vmem>>, vector<4x32xf32>
    tpu.vector_store %arg10[%c0_32, %c0_33], %13 {strides = array<i32>} : memref<4x32xf32, #tpu.memory_space<vmem>>, vector<4x32xf32>,
    %c0_34 = arith.constant 0 : index
    %c0_35 = arith.constant 0 : index
    %53 = vector.load %arg11[%c0_34, %c0_35] : memref<4x10xf32, #tpu.memory_space<vmem>>, vector<4x10xf32>
    tpu.vector_store %arg11[%c0_34, %c0_35], %38 {strides = array<i32>} : memref<4x10xf32, #tpu.memory_space<vmem>>, vector<4x10xf32>,
    %c0_36 = arith.constant 0 : index
    %c0_37 = arith.constant 0 : index
    %54 = vector.load %arg12[%c0_36, %c0_37] : memref<4x10xf32, #tpu.memory_space<vmem>>, vector<4x10xf32>
    tpu.vector_store %arg12[%c0_36, %c0_37], %49 {strides = array<i32>} : memref<4x10xf32, #tpu.memory_space<vmem>>, vector<4x10xf32>,
    return
  }
}

module attributes {stable_mosaic.version = 11 : i64} {
  func.func @branch_head_kernel(%arg0: memref<4x32xf32, #tpu.memory_space<vmem>>, %arg1: memref<4x32xf32, #tpu.memory_space<vmem>>, %arg2: memref<4x32xf32, #tpu.memory_space<vmem>>, %arg3: memref<12x32xf32, #tpu.memory_space<vmem>>, %arg4: memref<32x32xf32, #tpu.memory_space<vmem>>, %arg5: memref<1x32xf32, #tpu.memory_space<vmem>>, %arg6: memref<32x32xf32, #tpu.memory_space<vmem>>, %arg7: memref<1x32xf32, #tpu.memory_space<vmem>>, %arg8: memref<4x32xf32, #tpu.memory_space<vmem>>, %arg9: memref<4x32xf32, #tpu.memory_space<vmem>>, %arg10: memref<4x32xf32, #tpu.memory_space<vmem>>, %arg11: memref<4x12xf32, #tpu.memory_space<vmem>>, %arg12: memref<4x12xf32, #tpu.memory_space<vmem>>) attributes {dimension_semantics = [], scalar_prefetch = 0 : i64, scratch_operands = 0 : i64, tpu.core_type = #tpu.core_type<tc>} {
    %c0 = arith.constant 0 : index
    %c0_0 = arith.constant 0 : index
    %0 = vector.load %arg4[%c0, %c0_0] : memref<32x32xf32, #tpu.memory_space<vmem>>, vector<32x32xf32>
    %c0_1 = arith.constant 0 : index
    %c0_2 = arith.constant 0 : index
    %1 = vector.load %arg5[%c0_1, %c0_2] : memref<1x32xf32, #tpu.memory_space<vmem>>, vector<1x32xf32>
    %c0_3 = arith.constant 0 : index
    %c0_4 = arith.constant 0 : index
    %2 = vector.load %arg0[%c0_3, %c0_4] : memref<4x32xf32, #tpu.memory_space<vmem>>, vector<4x32xf32>
    %cst = arith.constant dense<0.000000e+00> : vector<4x32xf32>
    %3 = tpu.matmul %2, %0, %cst {dimension_numbers = #tpu.dot_dimension_numbers<[1], [1], [0], [0], [0, 0, 1, 0], [], []>} : vector<4x32xf32>, vector<32x32xf32>, vector<4x32xf32> -> vector<4x32xf32>
    %4 = vector.broadcast %1 : vector<1x32xf32> to vector<4x32xf32>
    %5 = arith.addf %3, %4 : vector<4x32xf32>
    %c0_5 = arith.constant 0 : index
    %c0_6 = arith.constant 0 : index
    %6 = vector.load %arg1[%c0_5, %c0_6] : memref<4x32xf32, #tpu.memory_space<vmem>>, vector<4x32xf32>
    %cst_7 = arith.constant dense<0.000000e+00> : vector<4x32xf32>
    %7 = tpu.matmul %6, %0, %cst_7 {dimension_numbers = #tpu.dot_dimension_numbers<[1], [1], [0], [0], [0, 0, 1, 0], [], []>} : vector<4x32xf32>, vector<32x32xf32>, vector<4x32xf32> -> vector<4x32xf32>
    %8 = vector.broadcast %1 : vector<1x32xf32> to vector<4x32xf32>
    %9 = arith.addf %7, %8 : vector<4x32xf32>
    %c0_8 = arith.constant 0 : index
    %c0_9 = arith.constant 0 : index
    %10 = vector.load %arg2[%c0_8, %c0_9] : memref<4x32xf32, #tpu.memory_space<vmem>>, vector<4x32xf32>
    %cst_10 = arith.constant dense<0.000000e+00> : vector<4x32xf32>
    %11 = tpu.matmul %10, %0, %cst_10 {dimension_numbers = #tpu.dot_dimension_numbers<[1], [1], [0], [0], [0, 0, 1, 0], [], []>} : vector<4x32xf32>, vector<32x32xf32>, vector<4x32xf32> -> vector<4x32xf32>
    %12 = vector.broadcast %1 : vector<1x32xf32> to vector<4x32xf32>
    %13 = arith.addf %11, %12 : vector<4x32xf32>
    %c0_11 = arith.constant 0 : index
    %c0_12 = arith.constant 0 : index
    %14 = vector.load %arg3[%c0_11, %c0_12] : memref<12x32xf32, #tpu.memory_space<vmem>>, vector<12x32xf32>
    %c0_13 = arith.constant 0 : index
    %c0_14 = arith.constant 0 : index
    %15 = vector.load %arg6[%c0_13, %c0_14] : memref<32x32xf32, #tpu.memory_space<vmem>>, vector<32x32xf32>
    %c0_15 = arith.constant 0 : index
    %c0_16 = arith.constant 0 : index
    %16 = vector.load %arg7[%c0_15, %c0_16] : memref<1x32xf32, #tpu.memory_space<vmem>>, vector<1x32xf32>
    %cst_17 = arith.constant dense<0.000000e+00> : vector<12x32xf32>
    %17 = tpu.matmul %14, %15, %cst_17 {dimension_numbers = #tpu.dot_dimension_numbers<[1], [1], [0], [0], [0, 0, 1, 0], [], []>} : vector<12x32xf32>, vector<32x32xf32>, vector<12x32xf32> -> vector<12x32xf32>
    %18 = vector.broadcast %16 : vector<1x32xf32> to vector<12x32xf32>
    %19 = arith.addf %17, %18 : vector<12x32xf32>
    %20 = arith.mulf %19, %19 : vector<12x32xf32>
    %cst_18 = arith.constant dense<0.000000e+00> : vector<12xf32>
    %21 = vector.multi_reduction <add>, %20, %cst_18 [1] : vector<12x32xf32> to vector<12xf32>
    %22 = vector.shape_cast %21 : vector<12xf32> to vector<12x1xf32>
    %cst_19 = arith.constant 1.000000e-24 : f32
    %23 = vector.broadcast %cst_19 : f32 to vector<12x1xf32>
    %24 = arith.maximumf %22, %23 : vector<12x1xf32>
    %25 = math.rsqrt %24 : vector<12x1xf32>
    %26 = vector.broadcast %25 : vector<12x1xf32> to vector<12x32xf32>
    %27 = arith.mulf %19, %26 : vector<12x32xf32>
    %28 = arith.mulf %5, %5 : vector<4x32xf32>
    %cst_20 = arith.constant dense<0.000000e+00> : vector<4xf32>
    %29 = vector.multi_reduction <add>, %28, %cst_20 [1] : vector<4x32xf32> to vector<4xf32>
    %30 = vector.shape_cast %29 : vector<4xf32> to vector<4x1xf32>
    %cst_21 = arith.constant 1.000000e-24 : f32
    %31 = vector.broadcast %cst_21 : f32 to vector<4x1xf32>
    %32 = arith.maximumf %30, %31 : vector<4x1xf32>
    %33 = math.rsqrt %32 : vector<4x1xf32>
    %34 = vector.broadcast %33 : vector<4x1xf32> to vector<4x32xf32>
    %35 = arith.mulf %5, %34 : vector<4x32xf32>
    %cst_22 = arith.constant dense<0.000000e+00> : vector<4x12xf32>
    %36 = tpu.matmul %35, %27, %cst_22 {dimension_numbers = #tpu.dot_dimension_numbers<[1], [1], [0], [0], [0, 0, 1, 0], [], []>} : vector<4x32xf32>, vector<12x32xf32>, vector<4x12xf32> -> vector<4x12xf32>
    %cst_23 = arith.constant 2.000000e+01 : f32
    %37 = vector.broadcast %cst_23 : f32 to vector<4x12xf32>
    %38 = arith.mulf %36, %37 : vector<4x12xf32>
    %39 = arith.mulf %9, %9 : vector<4x32xf32>
    %cst_24 = arith.constant dense<0.000000e+00> : vector<4xf32>
    %40 = vector.multi_reduction <add>, %39, %cst_24 [1] : vector<4x32xf32> to vector<4xf32>
    %41 = vector.shape_cast %40 : vector<4xf32> to vector<4x1xf32>
    %cst_25 = arith.constant 1.000000e-24 : f32
    %42 = vector.broadcast %cst_25 : f32 to vector<4x1xf32>
    %43 = arith.maximumf %41, %42 : vector<4x1xf32>
    %44 = math.rsqrt %43 : vector<4x1xf32>
    %45 = vector.broadcast %44 : vector<4x1xf32> to vector<4x32xf32>
    %46 = arith.mulf %9, %45 : vector<4x32xf32>
    %cst_26 = arith.constant dense<0.000000e+00> : vector<4x12xf32>
    %47 = tpu.matmul %46, %27, %cst_26 {dimension_numbers = #tpu.dot_dimension_numbers<[1], [1], [0], [0], [0, 0, 1, 0], [], []>} : vector<4x32xf32>, vector<12x32xf32>, vector<4x12xf32> -> vector<4x12xf32>
    %cst_27 = arith.constant 2.000000e+01 : f32
    %48 = vector.broadcast %cst_27 : f32 to vector<4x12xf32>
    %49 = arith.mulf %47, %48 : vector<4x12xf32>
    %c0_28 = arith.constant 0 : index
    %c0_29 = arith.constant 0 : index
    %50 = vector.load %arg8[%c0_28, %c0_29] : memref<4x32xf32, #tpu.memory_space<vmem>>, vector<4x32xf32>
    tpu.vector_store %arg8[%c0_28, %c0_29], %5 {strides = array<i32>} : memref<4x32xf32, #tpu.memory_space<vmem>>, vector<4x32xf32>,
    %c0_30 = arith.constant 0 : index
    %c0_31 = arith.constant 0 : index
    %51 = vector.load %arg9[%c0_30, %c0_31] : memref<4x32xf32, #tpu.memory_space<vmem>>, vector<4x32xf32>
    tpu.vector_store %arg9[%c0_30, %c0_31], %9 {strides = array<i32>} : memref<4x32xf32, #tpu.memory_space<vmem>>, vector<4x32xf32>,
    %c0_32 = arith.constant 0 : index
    %c0_33 = arith.constant 0 : index
    %52 = vector.load %arg10[%c0_32, %c0_33] : memref<4x32xf32, #tpu.memory_space<vmem>>, vector<4x32xf32>
    tpu.vector_store %arg10[%c0_32, %c0_33], %13 {strides = array<i32>} : memref<4x32xf32, #tpu.memory_space<vmem>>, vector<4x32xf32>,
    %c0_34 = arith.constant 0 : index
    %c0_35 = arith.constant 0 : index
    %53 = vector.load %arg11[%c0_34, %c0_35] : memref<4x12xf32, #tpu.memory_space<vmem>>, vector<4x12xf32>
    tpu.vector_store %arg11[%c0_34, %c0_35], %38 {strides = array<i32>} : memref<4x12xf32, #tpu.memory_space<vmem>>, vector<4x12xf32>,
    %c0_36 = arith.constant 0 : index
    %c0_37 = arith.constant 0 : index
    %54 = vector.load %arg12[%c0_36, %c0_37] : memref<4x12xf32, #tpu.memory_space<vmem>>, vector<4x12xf32>
    tpu.vector_store %arg12[%c0_36, %c0_37], %49 {strides = array<i32>} : memref<4x12xf32, #tpu.memory_space<vmem>>, vector<4x12xf32>,
    return
  }
}

</mosaic_0001>

<bundles_post_ra>
// kernel: image_pair_comparison_forward.4
= control target key start
LH: loop header
LB: loop body
LE: loop exit
PB: predicated region body
PF: predicated region fallthrough
CT: control target
= control target key end

     0   :  { %18 = vsyncpa [#allocation3], 0  ;;  %vm45_vm0 = vcmask 261120   ;;  %s660_s0 = inlined_call_operand.vmem [shape: f32[4,32], index: 0, kind: input, shape index: {}]   ;;  %s661_s1 = inlined_call_operand.vmem [shape: f32[4,32], index: 1, kind: input, shape index: {}]   ;;  %s662_s2 = inlined_call_operand.vmem [shape: f32[4,32], index: 2, kind: input, shape index: {}]   ;;  %s663_s3 = inlined_call_operand.vmem [shape: f32[10,32], index: 3, kind: input, shape index: {}]   ;;  %s664_s4 = inlined_call_operand.vmem [shape: f32[32,32], index: 4, kind: input, shape index: {}]   ;;  %s665_s5 = inlined_call_operand.vmem [shape: f32[1,32], index: 5, kind: input, shape index: {}]   ;;  %s666_s6 = inlined_call_operand.vmem [shape: f32[32,32], index: 6, kind: input, shape index: {}]   ;;  %s667_s7 = inlined_call_operand.vmem [shape: f32[1,32], index: 7, kind: input, shape index: {}]   ;;  %s668_s8 = inlined_call_operand.hbm [shape: f32[4,32], index: 8, kind: output, shape index: {0}]   ;;  %s669_s9 = inlined_call_operand.hbm [shape: f32[4,32], index: 9, kind: output, shape index: {1}]   ;;  %s670_s10 = inlined_call_operand.hbm [shape: f32[4,32], index: 10, kind: output, shape index: {2}]   ;;  %s671_s11 = inlined_call_operand.vmem [shape: f32[4,10], index: 11, kind: output, shape index: {3}]   ;;  %s672_s12 = inlined_call_operand.vmem [shape: f32[4,10], index: 12, kind: output, shape index: {4}]  }
   0x1   :  { %v39_v0 = vld [vmem:[%s664_s4 + $0x18] sm:$0xff]  ;;  %v38_v2 = vld [vmem:[%s664_s4 + $0x10] sm:$0xff] }
   0x2   :  { %v134_v1 = vld [vmem:[%s666_s6 + $0x18] sm:$0xff]  ;;  %361 = vmatpush.xpose.msk.msra.mxu0 %vm45_vm0, %v39_v0  ;;  %v133_v3 = vld [vmem:[%s666_s6 + $0x10] sm:$0xff]  ;;  %366 = vmatpush.xpose.msk.msra.mxu1 %vm45_vm0, %v39_v0 }
   0x3   :  { %376 = vmatpush.xpose.msk.msra.mxu3 %vm45_vm0, %v134_v1  ;;  %371 = vmatpush.xpose.msk.msra.mxu2 %vm45_vm0, %v39_v0 }
   0x6   :  { %362 = vmatpush.xpose.msk.msra.mxu0 %vm45_vm0, %v38_v2 }
   0x7   :  { %377 = vmatpush.xpose.msk.msra.mxu3 %vm45_vm0, %v133_v3 }
   0x8   :  { %19 = vsyncpa [#allocation5], 0  ;;  %v37_v4 = vld [vmem:[%s664_s4 + $0x8] sm:$0xff]  ;;  %367 = vmatpush.xpose.msk.msra.mxu1 %vm45_vm0, %v38_v2  ;;  %372 = vmatpush.xpose.msk.msra.mxu2 %vm45_vm0, %v38_v2  ;;  %v36_v6 = vld [vmem:[%s664_s4] sm:$0xff]  ;;  %vm214_vm1 = vcmask 257024   ;;  %vm185_vm2 = vcmask 254976  }
   0x9   :  { %v132_v5 = vld [vmem:[%s666_s6 + $0x8] sm:$0xff]  ;;  %v131_v7 = vld [vmem:[%s666_s6] sm:$0xff]  ;;  %s324_s29 = sshll.u32 %s669_s9, 4  ;;  %s313_s14 = sshll.u32 %s668_s8, 4  ;;  %vm303_vm15 = vcmask 76800   ;;  %s325_s29 = int_to_ptr.hbm [resolvable:$true] %s324_s29  ;;  %s314_s14 = int_to_ptr.hbm [resolvable:$true] %s313_s14 }
   0xa   :  { %363 = vmatpush.xpose.msk.msra.mxu0 %vm45_vm0, %v37_v4  ;;  %v41_v8 = vld [vmem:[%s660_s0] sm:$0xf]  ;;  %v130_v11 = vld [vmem:[%s663_s3 + $0x8] sm:$0x3]  ;;  %s478_s15 = smov [#allocation2]   ;;  %s479_s17 = smov [#allocation6]  }
   0xb   :  { %378 = vmatpush.xpose.msk.msra.mxu3 %vm45_vm0, %v132_v5  ;;  %v129_v9 = vld [vmem:[%s663_s3] sm:$0xff]  ;;  %s311_s16 = sshll.u32 %s478_s15, 4  ;;  %s333_s18 = sshll.u32 %s479_s17, 4  ;;  %s312_s16 = int_to_ptr.vmem [resolvable:$true] %s311_s16  ;;  %s334_s18 = int_to_ptr.vmem [resolvable:$true] %s333_s18 }
   0xc   :  { %368 = vmatpush.xpose.msk.msra.mxu1 %vm45_vm0, %v37_v4  ;;  %373 = vmatpush.xpose.msk.msra.mxu2 %vm45_vm0, %v37_v4  ;;  %v81_v10 = vld [vmem:[%s661_s1] sm:$0xf]  ;;  %s335_s20 = sshll.u32 %s670_s10, 4  ;;  %s336_s20 = int_to_ptr.hbm [resolvable:$true] %s335_s20 }
   0xd   :  { %v604_v12 = vld [vmem:[%s665_s5] ss:$0 sm:$0xff] }
   0xe   :  { %364 = vmatpush.xpose.msk.msra.mxu0 %vm45_vm0, %v36_v6  ;;  %v392_v22 = vld [vmem:[%s667_s7] ss:$0 sm:$0xff] }
   0xf   :  { %379 = vmatpush.xpose.msk.msra.mxu3 %vm45_vm0, %v131_v7  ;;  %v105_v32 = vld [vmem:[%s662_s2] sm:$0xf]  ;;  %s477_s2 = smov [#allocation4]  }
  0x10   :  { %369 = vmatpush.xpose.msk.msra.mxu1 %vm45_vm0, %v36_v6  ;;  %374 = vmatpush.xpose.msk.msra.mxu2 %vm45_vm0, %v36_v6  ;;  %s322_s7 = sshll.u32 %s477_s2, 4  ;;  %s323_s7 = int_to_ptr.vmem [resolvable:$true] %s322_s7 }
  0x11   :  { %365 = vmatmul.msk.f32.vlgmr.msra.gmra.mxu0 %vm45_vm0, %v41_v8 }
  0x12   :  { %380 = vmatmul.msk.f32.vlgmr.msra.gmra.mxu3 %vm45_vm0, %v129_v9 }
  0x13   :  { %370 = vmatmul.msk.f32.vlgmr.msra.gmra.mxu1 %vm45_vm0, %v81_v10  ;;  %375 = vmatmul.msk.f32.vlgmr.msra.gmra.mxu2 %vm45_vm0, %v105_v32 }
  0x1a   :  { %381 = vmatmul.msk.f32.gmra.mxu3 %vm45_vm0, %v130_v11 }
  0x8e   :  { %v78_v13 = vpop.f32.mrf.mxu0 }
  0x8f   :  { %v607_v14 = vadd.f32 %v604_v12, %v78_v13 }
  0x90   :  { %v102_v15 = vpop.f32.mrf.mxu1 }
  0x91   :  { %v610_v16 = vadd.f32 %v604_v12, %v102_v15  ;;  %v213_v17 = vmul.f32 %v607_v14, %v607_v14  ;;  %300 = vst.msk [vmem:[#allocation2] sm:$0xf] %vm214_vm1, %v607_v14 }
  0x92   :  { %316 = dma.vmem_to_hbm [thread:$0]  %s312_s16, 64, %s314_s14, [#allocation3]  }
  0x93   :  { %301 = vst.msk [vmem:[#allocation4] sm:$0xf] %vm214_vm1, %v610_v16  ;;  %v215_v18 = vsel %vm214_vm1, %v213_v17, 0.0  ;;  %v260_v20 = vmul.f32 %v610_v16, %v610_v16 }
  0x94   :  { %216 = vadd.xlane.f32.xlu1 %v215_v18  ;;  %327 = dma.vmem_to_hbm [thread:$0]  %s323_s7, 64, %s325_s29, [#allocation5]  }
  0x95   :  { %v174_v19 = vpop.f32.mrf.mxu3  ;;  %v261_v21 = vsel %vm214_vm1, %v260_v20, 0.0 }
  0x96   :  { %v625_v26 = vadd.f32 %v392_v22, %v174_v19  ;;  %v126_v7 = vpop.f32.mrf.mxu2 }
  0x97   :  { %v127_v8 = vadd.f32 %v604_v12, %v126_v7 }
  0x98   :  { %v180_v28 = vmul.f32 %v625_v26, %v625_v26 }
  0x99   :  { %302 = vst.msk [vmem:[#allocation6] sm:$0xf] %vm214_vm1, %v127_v8 }
  0x9a   :  { %v182_v29 = vsel %vm45_vm0, %v180_v28, 0.0  ;;  %338 = dma.vmem_to_hbm [thread:$0]  %s334_s18, 64, %s336_s20, [#allocation5]  }
  0x9c   :  { %262 = vadd.xlane.f32.xlu1 %v261_v21 }
  0x9d   :  { %v177_v23 = vpop.f32.mrf.mxu3 }
  0x9e   :  { %v178_v24 = vadd.f32 %v392_v22, %v177_v23 }
  0xa0   :  { %v181_v25 = vmul.f32 %v178_v24, %v178_v24 }
  0xa2   :  { %v186_v27 = vsel %vm185_vm2, %v181_v25, 0.0 }
  0xa3   :  { %187 = vadd.xlane.f32.xlu0 %v186_v27 }
  0xab   :  { %183 = vadd.xlane.f32.xlu0 %v182_v29 }
 0x107   :  { %v217_v30 = vpop.xlane.xlu1 %216 }
 0x108   :  { %v218_v33 = vmax.f32 %v217_v30, 1e-24 }
 0x10a   :  { %393 = vrsqrt.f32 %v218_v33  ;;  %vm225_vm6 = vweird.f32 %v218_v33 }
 0x10f   :  { %v263_v31 = vpop.xlane.xlu1 %262 }
 0x110   :  { %v264_v34 = vmax.f32 %v263_v31, 1e-24  ;;  %v394_v37 = vpop.eup %393 }
 0x111   :  { %v220_v41 = vmul.f32 %v394_v37, %v218_v33  ;;  %vm226_vm7 = vweird.f32 %v394_v37 }
 0x112   :  { %395 = vrsqrt.f32 %v264_v34  ;;  %vm271_vm8 = vweird.f32 %v264_v34  ;;  %vm227_vm11 = vmor %vm225_vm6, %vm226_vm7 }
 0x113   :  { %v221_v46 = vmul.f32 %v394_v37, %v220_v41 }
 0x115   :  { %v222_v51 = vmul.f32 0.5, %v221_v46 }
 0x116   :  { %v188_v35 = vpop.xlane.xlu0 %187 }
 0x117   :  { %v190_v36 = vmax.f32 %v188_v35, 1e-24  ;;  %v223_v57 = vsub.f32 1.5, %v222_v51 }
 0x118   :  { %v396_v38 = vpop.eup %395 }
 0x119   :  { %397 = vrsqrt.f32 %v190_v36  ;;  %v266_v42 = vmul.f32 %v396_v38, %v264_v34  ;;  %vm207_vm4 = vweird.f32 %v190_v36  ;;  %vm272_vm9 = vweird.f32 %v396_v38 }
 0x11a   :  { %v224_v62 = vmul.f32 %v394_v37, %v223_v57  ;;  %vm273_vm12 = vmor %vm271_vm8, %vm272_vm9 }
 0x11b   :  { %v267_v47 = vmul.f32 %v396_v38, %v266_v42 }
 0x11c   :  { %v228_v2 = vsel %vm227_vm11, %v394_v37, %v224_v62 }
 0x11d   :  { %v268_v52 = vmul.f32 0.5, %v267_v47  ;;  %v229_v5 = vmul.f32 %v228_v2, %v607_v14 }
 0x11e   :  { %v184_v39 = vpop.xlane.xlu0 %183 }
 0x11f   :  { %v398_v40 = vpop.eup %397  ;;  %v189_v43 = vmax.f32 %v184_v39, 1e-24  ;;  %v269_v58 = vsub.f32 1.5, %v268_v52 }
 0x120   :  { %v202_v44 = vmul.f32 %v398_v40, %v190_v36  ;;  %vm208_vm3 = vweird.f32 %v398_v40 }
 0x121   :  { %399 = vrsqrt.f32 %v189_v43  ;;  %vm209_vm5 = vmor %vm207_vm4, %vm208_vm3  ;;  %v270_v63 = vmul.f32 %v396_v38, %v269_v58  ;;  %vm197_vm13 = vweird.f32 %v189_v43 }
 0x122   :  { %v203_v45 = vmul.f32 %v398_v40, %v202_v44 }
 0x123   :  { %v274_v3 = vsel %vm273_vm12, %v396_v38, %v270_v63 }
 0x124   :  { %v204_v48 = vmul.f32 0.5, %v203_v45  ;;  %v275_v6 = vmul.f32 %v274_v3, %v610_v16 }
 0x126   :  { %v205_v49 = vsub.f32 1.5, %v204_v48 }
 0x127   :  { %v400_v50 = vpop.eup %399 }
 0x128   :  { %v192_v53 = vmul.f32 %v400_v50, %v189_v43  ;;  %v206_v54 = vmul.f32 %v398_v40, %v205_v49  ;;  %vm198_vm10 = vweird.f32 %v400_v50 }
 0x129   :  { %vm199_vm14 = vmor %vm197_vm13, %vm198_vm10 }
 0x12a   :  { %v193_v55 = vmul.f32 %v400_v50, %v192_v53  ;;  %v210_v56 = vsel %vm209_vm5, %v398_v40, %v206_v54 }
 0x12b   :  { %v212_v59 = vmul.f32 %v210_v56, %v178_v24 }
 0x12c   :  { %v194_v60 = vmul.f32 0.5, %v193_v55 }
 0x12d   :  { %382 = vmatpush.xpose.msk.msrb.mxu0 %vm45_vm0, %v212_v59  ;;  %385 = vmatpush.xpose.msk.msrb.mxu1 %vm45_vm0, %v212_v59 }
 0x12e   :  { %v195_v61 = vsub.f32 1.5, %v194_v60 }
 0x130   :  { %v196_v0 = vmul.f32 %v400_v50, %v195_v61 }
 0x132   :  { %v200_v1 = vsel %vm199_vm14, %v400_v50, %v196_v0 }
 0x133   :  { %v211_v4 = vmul.f32 %v200_v1, %v625_v26 }
 0x135   :  { %383 = vmatpush.xpose.msk.msrb.mxu0 %vm45_vm0, %v211_v4  ;;  %386 = vmatpush.xpose.msk.msrb.mxu1 %vm45_vm0, %v211_v4 }
 0x138   :  { %384 = vmatmul.msk.f32.vlgmr.msrb.gmra.mxu0 %vm45_vm0, %v229_v5  ;;  %387 = vmatmul.msk.f32.vlgmr.msrb.gmra.mxu1 %vm45_vm0, %v275_v6 }
 0x1b5   :  { %v256_v9 = vpop.f32.mrf.mxu0  ;;  %v296_v10 = vpop.f32.mrf.mxu1 }
 0x1b6   :  { %v259_v11 = vmul.f32 20.0, %v256_v9  ;;  %v299_v13 = vmul.f32 20.0, %v296_v10 }
 0x1b8   :  { %304 = vst.msk [vmem:[%s671_s11] sm:$0xf] %vm303_vm15, %v259_v11 }
 0x1b9   :  { %305 = vst.msk [vmem:[%s672_s12] sm:$0xf] %vm303_vm15, %v299_v13 }
 0x1ba   :  { %473 = dma.done.wait [#allocation3], 64  }
 0x1bb   :  { %474 = vsyncadd [#allocation3], 4294967232 }
 0x1bc   :  { %475 = dma.done.wait [#allocation5], 128  }
 0x1bd   :  { %476 = vsyncadd [#allocation5], 4294967168 }
 0x1be   :  { %359 = vsyncpa [#allocation3], 1 }
 0x1bf   :  { %360 = vsyncpa [#allocation5], 1 }

// kernel: image_pair_comparison_forward.5
= control target key start
LH: loop header
LB: loop body
LE: loop exit
PB: predicated region body
PF: predicated region fallthrough
CT: control target
= control target key end

     0   :  { %18 = vsyncpa [#allocation3], 0  ;;  %vm45_vm0 = vcmask 261120   ;;  %s660_s0 = inlined_call_operand.vmem [shape: f32[4,32], index: 0, kind: input, shape index: {}]   ;;  %s661_s1 = inlined_call_operand.vmem [shape: f32[4,32], index: 1, kind: input, shape index: {}]   ;;  %s662_s2 = inlined_call_operand.vmem [shape: f32[4,32], index: 2, kind: input, shape index: {}]   ;;  %s663_s3 = inlined_call_operand.vmem [shape: f32[12,32], index: 3, kind: input, shape index: {}]   ;;  %s664_s4 = inlined_call_operand.vmem [shape: f32[32,32], index: 4, kind: input, shape index: {}]   ;;  %s665_s5 = inlined_call_operand.vmem [shape: f32[1,32], index: 5, kind: input, shape index: {}]   ;;  %s666_s6 = inlined_call_operand.vmem [shape: f32[32,32], index: 6, kind: input, shape index: {}]   ;;  %s667_s7 = inlined_call_operand.vmem [shape: f32[1,32], index: 7, kind: input, shape index: {}]   ;;  %s668_s8 = inlined_call_operand.hbm [shape: f32[4,32], index: 8, kind: output, shape index: {0}]   ;;  %s669_s9 = inlined_call_operand.hbm [shape: f32[4,32], index: 9, kind: output, shape index: {1}]   ;;  %s670_s10 = inlined_call_operand.hbm [shape: f32[4,32], index: 10, kind: output, shape index: {2}]   ;;  %s671_s11 = inlined_call_operand.vmem [shape: f32[4,12], index: 11, kind: output, shape index: {3}]   ;;  %s672_s12 = inlined_call_operand.vmem [shape: f32[4,12], index: 12, kind: output, shape index: {4}]  }
   0x1   :  { %v39_v0 = vld [vmem:[%s664_s4 + $0x18] sm:$0xff]  ;;  %v38_v2 = vld [vmem:[%s664_s4 + $0x10] sm:$0xff] }
   0x2   :  { %v134_v1 = vld [vmem:[%s666_s6 + $0x18] sm:$0xff]  ;;  %360 = vmatpush.xpose.msk.msra.mxu0 %vm45_vm0, %v39_v0  ;;  %v133_v3 = vld [vmem:[%s666_s6 + $0x10] sm:$0xff]  ;;  %365 = vmatpush.xpose.msk.msra.mxu1 %vm45_vm0, %v39_v0 }
   0x3   :  { %375 = vmatpush.xpose.msk.msra.mxu3 %vm45_vm0, %v134_v1  ;;  %370 = vmatpush.xpose.msk.msra.mxu2 %vm45_vm0, %v39_v0 }
   0x6   :  { %361 = vmatpush.xpose.msk.msra.mxu0 %vm45_vm0, %v38_v2 }
   0x7   :  { %376 = vmatpush.xpose.msk.msra.mxu3 %vm45_vm0, %v133_v3 }
   0x8   :  { %19 = vsyncpa [#allocation5], 0  ;;  %v37_v4 = vld [vmem:[%s664_s4 + $0x8] sm:$0xff]  ;;  %366 = vmatpush.xpose.msk.msra.mxu1 %vm45_vm0, %v38_v2  ;;  %371 = vmatpush.xpose.msk.msra.mxu2 %vm45_vm0, %v38_v2  ;;  %v36_v6 = vld [vmem:[%s664_s4] sm:$0xff]  ;;  %vm185_vm1 = vcmask 257024   ;;  %s323_s29 = sshll.u32 %s669_s9, 4  ;;  %s324_s29 = int_to_ptr.hbm [resolvable:$true] %s323_s29 }
   0x9   :  { %v132_v5 = vld [vmem:[%s666_s6 + $0x8] sm:$0xff]  ;;  %v131_v7 = vld [vmem:[%s666_s6] sm:$0xff]  ;;  %s312_s14 = sshll.u32 %s668_s8, 4  ;;  %s477_s15 = smov [#allocation2]   ;;  %vm302_vm14 = vcmask 93184   ;;  %s313_s14 = int_to_ptr.hbm [resolvable:$true] %s312_s14 }
   0xa   :  { %362 = vmatpush.xpose.msk.msra.mxu0 %vm45_vm0, %v37_v4  ;;  %v41_v8 = vld [vmem:[%s660_s0] sm:$0xf]  ;;  %v130_v11 = vld [vmem:[%s663_s3 + $0x8] sm:$0xf]  ;;  %s310_s16 = sshll.u32 %s477_s15, 4  ;;  %s478_s17 = smov [#allocation6]   ;;  %s311_s16 = int_to_ptr.vmem [resolvable:$true] %s310_s16 }
   0xb   :  { %377 = vmatpush.xpose.msk.msra.mxu3 %vm45_vm0, %v132_v5  ;;  %v129_v9 = vld [vmem:[%s663_s3] sm:$0xff]  ;;  %s332_s18 = sshll.u32 %s478_s17, 4  ;;  %s334_s20 = sshll.u32 %s670_s10, 4  ;;  %s333_s18 = int_to_ptr.vmem [resolvable:$true] %s332_s18  ;;  %s335_s20 = int_to_ptr.hbm [resolvable:$true] %s334_s20 }
   0xc   :  { %367 = vmatpush.xpose.msk.msra.mxu1 %vm45_vm0, %v37_v4  ;;  %372 = vmatpush.xpose.msk.msra.mxu2 %vm45_vm0, %v37_v4  ;;  %v81_v10 = vld [vmem:[%s661_s1] sm:$0xf] }
   0xd   :  { %v603_v12 = vld [vmem:[%s665_s5] ss:$0 sm:$0xff] }
   0xe   :  { %363 = vmatpush.xpose.msk.msra.mxu0 %vm45_vm0, %v36_v6  ;;  %v391_v22 = vld [vmem:[%s667_s7] ss:$0 sm:$0xff] }
   0xf   :  { %378 = vmatpush.xpose.msk.msra.mxu3 %vm45_vm0, %v131_v7  ;;  %v105_v32 = vld [vmem:[%s662_s2] sm:$0xf]  ;;  %s476_s2 = smov [#allocation4]  }
  0x10   :  { %368 = vmatpush.xpose.msk.msra.mxu1 %vm45_vm0, %v36_v6  ;;  %373 = vmatpush.xpose.msk.msra.mxu2 %vm45_vm0, %v36_v6  ;;  %s321_s7 = sshll.u32 %s476_s2, 4  ;;  %s322_s7 = int_to_ptr.vmem [resolvable:$true] %s321_s7 }
  0x11   :  { %364 = vmatmul.msk.f32.vlgmr.msra.gmra.mxu0 %vm45_vm0, %v41_v8 }
  0x12   :  { %379 = vmatmul.msk.f32.vlgmr.msra.gmra.mxu3 %vm45_vm0, %v129_v9 }
  0x13   :  { %369 = vmatmul.msk.f32.vlgmr.msra.gmra.mxu1 %vm45_vm0, %v81_v10  ;;  %374 = vmatmul.msk.f32.vlgmr.msra.gmra.mxu2 %vm45_vm0, %v105_v32 }
  0x1a   :  { %380 = vmatmul.msk.f32.gmra.mxu3 %vm45_vm0, %v130_v11 }
  0x8e   :  { %v78_v13 = vpop.f32.mrf.mxu0 }
  0x8f   :  { %v606_v14 = vadd.f32 %v603_v12, %v78_v13 }
  0x90   :  { %v102_v15 = vpop.f32.mrf.mxu1 }
  0x91   :  { %v609_v16 = vadd.f32 %v603_v12, %v102_v15  ;;  %v213_v17 = vmul.f32 %v606_v14, %v606_v14  ;;  %299 = vst.msk [vmem:[#allocation2] sm:$0xf] %vm185_vm1, %v606_v14 }
  0x92   :  { %315 = dma.vmem_to_hbm [thread:$0]  %s311_s16, 64, %s313_s14, [#allocation3]  }
  0x93   :  { %300 = vst.msk [vmem:[#allocation4] sm:$0xf] %vm185_vm1, %v609_v16  ;;  %v214_v18 = vsel %vm185_vm1, %v213_v17, 0.0  ;;  %v259_v20 = vmul.f32 %v609_v16, %v609_v16 }
  0x94   :  { %215 = vadd.xlane.f32.xlu1 %v214_v18  ;;  %326 = dma.vmem_to_hbm [thread:$0]  %s322_s7, 64, %s324_s29, [#allocation5]  }
  0x95   :  { %v174_v19 = vpop.f32.mrf.mxu3  ;;  %v260_v21 = vsel %vm185_vm1, %v259_v20, 0.0 }
  0x96   :  { %v624_v26 = vadd.f32 %v391_v22, %v174_v19  ;;  %v126_v7 = vpop.f32.mrf.mxu2 }
  0x97   :  { %v127_v8 = vadd.f32 %v603_v12, %v126_v7 }
  0x98   :  { %v180_v28 = vmul.f32 %v624_v26, %v624_v26 }
  0x99   :  { %301 = vst.msk [vmem:[#allocation6] sm:$0xf] %vm185_vm1, %v127_v8 }
  0x9a   :  { %v182_v29 = vsel %vm45_vm0, %v180_v28, 0.0  ;;  %337 = dma.vmem_to_hbm [thread:$0]  %s333_s18, 64, %s335_s20, [#allocation5]  }
  0x9c   :  { %261 = vadd.xlane.f32.xlu1 %v260_v21 }
  0x9d   :  { %v177_v23 = vpop.f32.mrf.mxu3 }
  0x9e   :  { %v178_v24 = vadd.f32 %v391_v22, %v177_v23 }
  0xa0   :  { %v181_v25 = vmul.f32 %v178_v24, %v178_v24 }
  0xa2   :  { %v186_v27 = vsel %vm185_vm1, %v181_v25, 0.0 }
  0xa3   :  { %187 = vadd.xlane.f32.xlu0 %v186_v27 }
  0xab   :  { %183 = vadd.xlane.f32.xlu0 %v182_v29 }
 0x107   :  { %v216_v30 = vpop.xlane.xlu1 %215 }
 0x108   :  { %v217_v33 = vmax.f32 %v216_v30, 1e-24 }
 0x10a   :  { %392 = vrsqrt.f32 %v217_v33  ;;  %vm224_vm5 = vweird.f32 %v217_v33 }
 0x10f   :  { %v262_v31 = vpop.xlane.xlu1 %261 }
 0x110   :  { %v263_v34 = vmax.f32 %v262_v31, 1e-24  ;;  %v393_v37 = vpop.eup %392 }
 0x111   :  { %v219_v41 = vmul.f32 %v393_v37, %v217_v33  ;;  %vm225_vm6 = vweird.f32 %v393_v37 }
 0x112   :  { %394 = vrsqrt.f32 %v263_v34  ;;  %vm270_vm7 = vweird.f32 %v263_v34  ;;  %vm226_vm10 = vmor %vm224_vm5, %vm225_vm6 }
 0x113   :  { %v220_v46 = vmul.f32 %v393_v37, %v219_v41 }
 0x115   :  { %v221_v51 = vmul.f32 0.5, %v220_v46 }
 0x116   :  { %v188_v35 = vpop.xlane.xlu0 %187 }
 0x117   :  { %v190_v36 = vmax.f32 %v188_v35, 1e-24  ;;  %v222_v57 = vsub.f32 1.5, %v221_v51 }
 0x118   :  { %v395_v38 = vpop.eup %394 }
 0x119   :  { %396 = vrsqrt.f32 %v190_v36  ;;  %v265_v42 = vmul.f32 %v395_v38, %v263_v34  ;;  %vm207_vm3 = vweird.f32 %v190_v36  ;;  %vm271_vm8 = vweird.f32 %v395_v38 }
 0x11a   :  { %v223_v62 = vmul.f32 %v393_v37, %v222_v57  ;;  %vm272_vm11 = vmor %vm270_vm7, %vm271_vm8 }
 0x11b   :  { %v266_v47 = vmul.f32 %v395_v38, %v265_v42 }
 0x11c   :  { %v227_v2 = vsel %vm226_vm10, %v393_v37, %v223_v62 }
 0x11d   :  { %v267_v52 = vmul.f32 0.5, %v266_v47  ;;  %v228_v5 = vmul.f32 %v227_v2, %v606_v14 }
 0x11e   :  { %v184_v39 = vpop.xlane.xlu0 %183 }
 0x11f   :  { %v397_v40 = vpop.eup %396  ;;  %v189_v43 = vmax.f32 %v184_v39, 1e-24  ;;  %v268_v58 = vsub.f32 1.5, %v267_v52 }
 0x120   :  { %v202_v44 = vmul.f32 %v397_v40, %v190_v36  ;;  %vm208_vm2 = vweird.f32 %v397_v40 }
 0x121   :  { %398 = vrsqrt.f32 %v189_v43  ;;  %vm209_vm4 = vmor %vm207_vm3, %vm208_vm2  ;;  %v269_v63 = vmul.f32 %v395_v38, %v268_v58  ;;  %vm197_vm12 = vweird.f32 %v189_v43 }
 0x122   :  { %v203_v45 = vmul.f32 %v397_v40, %v202_v44 }
 0x123   :  { %v273_v3 = vsel %vm272_vm11, %v395_v38, %v269_v63 }
 0x124   :  { %v204_v48 = vmul.f32 0.5, %v203_v45  ;;  %v274_v6 = vmul.f32 %v273_v3, %v609_v16 }
 0x126   :  { %v205_v49 = vsub.f32 1.5, %v204_v48 }
 0x127   :  { %v399_v50 = vpop.eup %398 }
 0x128   :  { %v192_v53 = vmul.f32 %v399_v50, %v189_v43  ;;  %v206_v54 = vmul.f32 %v397_v40, %v205_v49  ;;  %vm198_vm9 = vweird.f32 %v399_v50 }
 0x129   :  { %vm199_vm13 = vmor %vm197_vm12, %vm198_vm9 }
 0x12a   :  { %v193_v55 = vmul.f32 %v399_v50, %v192_v53  ;;  %v210_v56 = vsel %vm209_vm4, %v397_v40, %v206_v54 }
 0x12b   :  { %v212_v59 = vmul.f32 %v210_v56, %v178_v24 }
 0x12c   :  { %v194_v60 = vmul.f32 0.5, %v193_v55 }
 0x12d   :  { %381 = vmatpush.xpose.msk.msrb.mxu0 %vm45_vm0, %v212_v59  ;;  %384 = vmatpush.xpose.msk.msrb.mxu1 %vm45_vm0, %v212_v59 }
 0x12e   :  { %v195_v61 = vsub.f32 1.5, %v194_v60 }
 0x130   :  { %v196_v0 = vmul.f32 %v399_v50, %v195_v61 }
 0x132   :  { %v200_v1 = vsel %vm199_vm13, %v399_v50, %v196_v0 }
 0x133   :  { %v211_v4 = vmul.f32 %v200_v1, %v624_v26 }
 0x135   :  { %382 = vmatpush.xpose.msk.msrb.mxu0 %vm45_vm0, %v211_v4  ;;  %385 = vmatpush.xpose.msk.msrb.mxu1 %vm45_vm0, %v211_v4 }
 0x138   :  { %383 = vmatmul.msk.f32.vlgmr.msrb.gmra.mxu0 %vm45_vm0, %v228_v5  ;;  %386 = vmatmul.msk.f32.vlgmr.msrb.gmra.mxu1 %vm45_vm0, %v274_v6 }
 0x1b5   :  { %v255_v9 = vpop.f32.mrf.mxu0  ;;  %v295_v10 = vpop.f32.mrf.mxu1 }
 0x1b6   :  { %v258_v11 = vmul.f32 20.0, %v255_v9  ;;  %v298_v13 = vmul.f32 20.0, %v295_v10 }
 0x1b8   :  { %303 = vst.msk [vmem:[%s671_s11] sm:$0xf] %vm302_vm14, %v258_v11 }
 0x1b9   :  { %304 = vst.msk [vmem:[%s672_s12] sm:$0xf] %vm302_vm14, %v298_v13 }
 0x1ba   :  { %472 = dma.done.wait [#allocation3], 64  }
 0x1bb   :  { %473 = vsyncadd [#allocation3], 4294967232 }
 0x1bc   :  { %474 = dma.done.wait [#allocation5], 128  }
 0x1bd   :  { %475 = vsyncadd [#allocation5], 4294967168 }
 0x1be   :  { %358 = vsyncpa [#allocation3], 1 }
 0x1bf   :  { %359 = vsyncpa [#allocation5], 1 }

// kernel: image_pair_comparison_forward.3
= control target key start
LH: loop header
LB: loop body
LE: loop exit
PB: predicated region body
PF: predicated region fallthrough
CT: control target
= control target key end

     0   :  { %vm78_vm0 = vcmask 130048   ;;  %s6885_s0 = inlined_call_operand.vmem [shape: f32[4,32,16], index: 0, kind: input, shape index: {}]   ;;  %s6886_s1 = inlined_call_operand.vmem [shape: f32[4,32,16], index: 1, kind: input, shape index: {}]   ;;  %s6887_s2 = inlined_call_operand.vmem [shape: f32[4,32,16], index: 2, kind: input, shape index: {}]   ;;  %s6888_s3 = inlined_call_operand.vmem [shape: f32[6,4,32], index: 3, kind: output, shape index: {}]  }
   0x1   :  { %v3636_v0 = vld [vmem:[%s6885_s0 + $0x40] sm:$0xff]  ;;  %v3641_v1 = vld [vmem:[%s6885_s0 + $0x48] sm:$0xff]  ;;  %v3646_v2 = vld [vmem:[%s6885_s0 + $0x50] sm:$0xff] }
   0x2   :  { %v3651_v3 = vld [vmem:[%s6885_s0 + $0x58] sm:$0xff]  ;;  %v70_v4 = vmul.f32 %v3636_v0, %v3636_v0  ;;  %v71_v5 = vmul.f32 %v3641_v1, %v3641_v1  ;;  %v72_v6 = vmul.f32 %v3646_v2, %v3646_v2  ;;  %v3662_v7 = vld [vmem:[%s6885_s0 + $0x20] sm:$0xff]  ;;  %v3667_v8 = vld [vmem:[%s6885_s0 + $0x28] sm:$0xff] }
   0x3   :  { %v73_v9 = vmul.f32 %v3651_v3, %v3651_v3  ;;  %v3674_v10 = vld [vmem:[%s6885_s0 + $0x30] sm:$0xff]  ;;  %v3679_v11 = vld [vmem:[%s6885_s0 + $0x38] sm:$0xff]  ;;  %v66_v12 = vmul.f32 %v3662_v7, %v3662_v7  ;;  %v67_v13 = vmul.f32 %v3667_v8, %v3667_v8  ;;  %v3688_v14 = vld [vmem:[%s6885_s0] sm:$0xff] }
   0x4   :  { %v105_v15 = vsel %vm78_vm0, %v70_v4, 0.0  ;;  %v106_v16 = vsel %vm78_vm0, %v71_v5, 0.0  ;;  %v108_v17 = vsel %vm78_vm0, %v72_v6, 0.0  ;;  %v68_v18 = vmul.f32 %v3674_v10, %v3674_v10  ;;  %v3698_v19 = vld [vmem:[%s6885_s0 + $0x8] sm:$0xff]  ;;  %v3703_v20 = vld [vmem:[%s6885_s0 + $0x10] sm:$0xff]  ;;  %v3712_v25 = vld [vmem:[%s6885_s0 + $0x18] sm:$0xff] }
   0x5   :  { %v107_v21 = vadd.f32 %v106_v16, %v105_v15  ;;  %v110_v22 = vsel %vm78_vm0, %v73_v9, 0.0  ;;  %v69_v23 = vmul.f32 %v3679_v11, %v3679_v11  ;;  %v92_v24 = vsel %vm78_vm0, %v66_v12, 0.0  ;;  %v3717_v26 = vld [vmem:[%s6885_s0 + $0x60] sm:$0xff]  ;;  %v3731_v35 = vld [vmem:[%s6885_s0 + $0x68] sm:$0xff]  ;;  %v3736_v36 = vld [vmem:[%s6885_s0 + $0x70] sm:$0xff] }
   0x6   :  { %v93_v27 = vsel %vm78_vm0, %v67_v13, 0.0  ;;  %v95_v28 = vsel %vm78_vm0, %v68_v18, 0.0  ;;  %v62_v29 = vmul.f32 %v3688_v14, %v3688_v14  ;;  %v63_v30 = vmul.f32 %v3698_v19, %v3698_v19  ;;  %v3748_v45 = vld [vmem:[%s6885_s0 + $0x78] sm:$0xff] }
   0x7   :  { %v109_v31 = vadd.f32 %v108_v17, %v107_v21  ;;  %v94_v32 = vadd.f32 %v93_v27, %v92_v24  ;;  %v97_v33 = vsel %vm78_vm0, %v69_v23, 0.0  ;;  %v64_v34 = vmul.f32 %v3703_v20, %v3703_v20 }
   0x8   :  { %v65_v37 = vmul.f32 %v3712_v25, %v3712_v25  ;;  %v79_v38 = vsel %vm78_vm0, %v62_v29, 0.0  ;;  %v80_v39 = vsel %vm78_vm0, %v63_v30, 0.0  ;;  %v74_v40 = vmul.f32 %v3717_v26, %v3717_v26 }
   0x9   :  { %v111_v41 = vadd.f32 %v110_v22, %v109_v31  ;;  %v96_v42 = vadd.f32 %v95_v28, %v94_v32  ;;  %v81_v43 = vadd.f32 %v80_v39, %v79_v38  ;;  %v82_v44 = vsel %vm78_vm0, %v64_v34, 0.0 }
   0xa   :  { %v84_v46 = vsel %vm78_vm0, %v65_v37, 0.0  ;;  %v75_v47 = vmul.f32 %v3731_v35, %v3731_v35  ;;  %v76_v48 = vmul.f32 %v3736_v36, %v3736_v36  ;;  %v77_v49 = vmul.f32 %v3748_v45, %v3748_v45 }
   0xb   :  { %v112_v50 = vrot.slane %v111_v41, 4  ;;  %v98_v51 = vadd.f32 %v97_v33, %v96_v42  ;;  %v83_v52 = vadd.f32 %v82_v44, %v81_v43  ;;  %v118_v53 = vsel %vm78_vm0, %v74_v40, 0.0 }
   0xc   :  { %v119_v54 = vsel %vm78_vm0, %v75_v47, 0.0  ;;  %v121_v55 = vsel %vm78_vm0, %v76_v48, 0.0  ;;  %v123_v60 = vsel %vm78_vm0, %v77_v49, 0.0 }
   0xd   :  { %v113_v56 = vadd.f32 %v112_v50, %v111_v41  ;;  %v99_v57 = vrot.slane %v98_v51, 4  ;;  %v85_v58 = vadd.f32 %v84_v46, %v83_v52  ;;  %v120_v59 = vadd.f32 %v119_v54, %v118_v53 }
   0xf   :  { %v114_v61 = vrot.slane %v113_v56, 2  ;;  %v100_v62 = vadd.f32 %v99_v57, %v98_v51  ;;  %v86_v63 = vrot.slane %v85_v58, 4  ;;  %v122_v4 = vadd.f32 %v121_v55, %v120_v59 }
  0x11   :  { %v115_v5 = vadd.f32 %v114_v61, %v113_v56  ;;  %v101_v6 = vrot.slane %v100_v62, 2  ;;  %v87_v9 = vadd.f32 %v86_v63, %v85_v58  ;;  %v124_v12 = vadd.f32 %v123_v60, %v122_v4 }
  0x13   :  { %v116_v13 = vrot.slane %v115_v5, 1  ;;  %v102_v15 = vadd.f32 %v101_v6, %v100_v62  ;;  %v88_v16 = vrot.slane %v87_v9, 2  ;;  %v125_v17 = vrot.slane %v124_v12, 4 }
  0x15   :  { %v117_v18 = vadd.f32 %v116_v13, %v115_v5  ;;  %v103_v21 = vrot.slane %v102_v15, 1  ;;  %v89_v22 = vadd.f32 %v88_v16, %v87_v9  ;;  %v126_v23 = vadd.f32 %v125_v17, %v124_v12 }
  0x17   :  { %v133_v24 = vmax.f32 %v117_v18, 1e-24  ;;  %v104_v27 = vadd.f32 %v103_v21, %v102_v15  ;;  %v90_v28 = vrot.slane %v89_v22, 1  ;;  %v127_v31 = vrot.slane %v126_v23, 2 }
  0x19   :  { %3352 = vrsqrt.f32 %v133_v24  ;;  %v132_v29 = vmax.f32 %v104_v27, 1e-24  ;;  %v91_v30 = vadd.f32 %v90_v28, %v89_v22  ;;  %v128_v33 = vadd.f32 %v127_v31, %v126_v23 }
  0x1a   :  { %vm161_vm1 = vweird.f32 %v133_v24 }
  0x1b   :  { %3354 = vrsqrt.f32 %v132_v29  ;;  %v131_v32 = vmax.f32 %v91_v30, 1e-24  ;;  %v129_v39 = vrot.slane %v128_v33, 1  ;;  %vm151_vm3 = vweird.f32 %v132_v29 }
  0x1d   :  { %3356 = vrsqrt.f32 %v131_v32  ;;  %v130_v47 = vadd.f32 %v129_v39, %v128_v33  ;;  %vm141_vm6 = vweird.f32 %v131_v32 }
  0x1f   :  { %v3353_v34 = vpop.eup %3352  ;;  %v134_v54 = vmax.f32 %v130_v47, 1e-24 }
  0x20   :  { %v156_v37 = vmul.f32 %v3353_v34, %v133_v24  ;;  %vm162_vm2 = vweird.f32 %v3353_v34 }
  0x21   :  { %v3355_v38 = vpop.eup %3354  ;;  %vm163_vm5 = vmor %vm161_vm1, %vm162_vm2  ;;  %3358 = vrsqrt.f32 %v134_v54  ;;  %vm171_vm10 = vweird.f32 %v134_v54 }
  0x22   :  { %v157_v40 = vmul.f32 %v3353_v34, %v156_v37  ;;  %v146_v41 = vmul.f32 %v3355_v38, %v132_v29  ;;  %vm152_vm4 = vweird.f32 %v3355_v38 }
  0x23   :  { %v3357_v42 = vpop.eup %3356  ;;  %vm153_vm8 = vmor %vm151_vm3, %vm152_vm4 }
  0x24   :  { %v158_v43 = vmul.f32 0.5, %v157_v40  ;;  %v147_v44 = vmul.f32 %v3355_v38, %v146_v41  ;;  %v136_v46 = vmul.f32 %v3357_v42, %v131_v32  ;;  %vm142_vm7 = vweird.f32 %v3357_v42 }
  0x25   :  { %vm143_vm9 = vmor %vm141_vm6, %vm142_vm7 }
  0x26   :  { %v159_v48 = vsub.f32 1.5, %v158_v43  ;;  %v148_v49 = vmul.f32 0.5, %v147_v44  ;;  %v137_v50 = vmul.f32 %v3357_v42, %v136_v46 }
  0x27   :  { %v3359_v5 = vpop.eup %3358 }
  0x28   :  { %v160_v51 = vmul.f32 %v3353_v34, %v159_v48  ;;  %v149_v52 = vsub.f32 1.5, %v148_v49  ;;  %v138_v53 = vmul.f32 0.5, %v137_v50  ;;  %v166_v9 = vmul.f32 %v3359_v5, %v134_v54  ;;  %v3801_v54 = vld [vmem:[%s6886_s1 + $0x8] sm:$0xff] }
  0x29   :  { %vm172_vm11 = vweird.f32 %v3359_v5 }
  0x2a   :  { %v164_v55 = vsel %vm163_vm5, %v3353_v34, %v160_v51  ;;  %v150_v56 = vmul.f32 %v3355_v38, %v149_v52  ;;  %v139_v57 = vsub.f32 1.5, %v138_v53  ;;  %vm173_vm12 = vmor %vm171_vm10, %vm172_vm11 }
  0x2b   :  { %v183_v58 = vmul.f32 %v164_v55, %v3636_v0  ;;  %v184_v4 = vmul.f32 %v164_v55, %v3641_v1  ;;  %v185_v12 = vmul.f32 %v164_v55, %v3646_v2  ;;  %v186_v1 = vmul.f32 %v164_v55, %v3651_v3  ;;  %v39_v3 = vld [vmem:[%s6886_s1 + $0x48] sm:$0xff]  ;;  %v3806_v55 = vld [vmem:[%s6886_s1 + $0x20] sm:$0xff] }
  0x2c   :  { %v154_v59 = vsel %vm153_vm8, %v3355_v38, %v150_v56  ;;  %v140_v60 = vmul.f32 %v3357_v42, %v139_v57  ;;  %v200_v18 = vmul.f32 %v39_v3, %v39_v3  ;;  %v192_v57 = vmul.f32 %v3801_v54, %v3801_v54 }
  0x2d   :  { %442 = vxpose.xlu2.b32.start [1/4] (short) (narrow) %v183_v58, 16  ;;  %v179_v61 = vmul.f32 %v154_v59, %v3662_v7  ;;  %v180_v6 = vmul.f32 %v154_v59, %v3667_v8  ;;  %v167_v7 = vmul.f32 %v3359_v5, %v166_v9  ;;  %v181_v13 = vmul.f32 %v154_v59, %v3674_v10  ;;  %v38_v10 = vld [vmem:[%s6886_s1 + $0x40] sm:$0xff]  ;;  %v3815_v58 = vld [vmem:[%s6886_s1 + $0x28] sm:$0xff] }
  0x2e   :  { %v144_v62 = vsel %vm143_vm9, %v3357_v42, %v140_v60  ;;  %v182_v16 = vmul.f32 %v154_v59, %v3679_v11  ;;  %v40_v11 = vld [vmem:[%s6886_s1 + $0x50] sm:$0xff]  ;;  %v199_v17 = vmul.f32 %v38_v10, %v38_v10  ;;  %v234_v24 = vsel %vm78_vm0, %v200_v18, 0.0 }
  0x2f   :  { %381 = vxpose.xlu1.b32.start [1/4] (short) (narrow) %v179_v61, 16  ;;  %v175_v63 = vmul.f32 %v144_v62, %v3688_v14  ;;  %v176_v0 = vmul.f32 %v144_v62, %v3698_v19  ;;  %v177_v14 = vmul.f32 %v144_v62, %v3703_v20  ;;  %v168_v15 = vmul.f32 0.5, %v167_v7  ;;  %v3822_v60 = vld [vmem:[%s6886_s1 + $0x10] sm:$0xff] }
  0x30   :  { %v178_v19 = vmul.f32 %v144_v62, %v3712_v25  ;;  %v41_v25 = vld [vmem:[%s6886_s1 + $0x58] sm:$0xff]  ;;  %v201_v21 = vmul.f32 %v40_v11, %v40_v11  ;;  %v233_v23 = vsel %vm78_vm0, %v199_v17, 0.0  ;;  %v195_v59 = vmul.f32 %v3806_v55, %v3806_v55  ;;  %v3827_v61 = vld [vmem:[%s6886_s1 + $0x30] sm:$0xff] }
  0x31   :  { %319 = vxpose.xlu0.b32.start [1/4] (short) (narrow) %v175_v63, 16  ;;  %v169_v8 = vsub.f32 1.5, %v168_v15  ;;  %v202_v22 = vmul.f32 %v41_v25, %v41_v25  ;;  %v235_v29 = vadd.f32 %v234_v24, %v233_v23  ;;  %v196_v62 = vmul.f32 %v3815_v58, %v3815_v58  ;;  %v3874_v18 = vld [vmem:[%s6887_s2 + $0x50] sm:$0xff] }
  0x32   :  { %v236_v27 = vsel %vm78_vm0, %v201_v21, 0.0  ;;  %v193_v63 = vmul.f32 %v3822_v60, %v3822_v60  ;;  %v220_v7 = vsel %vm78_vm0, %v195_v59, 0.0 }
  0x33   :  { %v170_v2 = vmul.f32 %v3359_v5, %v169_v8  ;;  %v238_v30 = vsel %vm78_vm0, %v202_v22, 0.0  ;;  %v237_v31 = vadd.f32 %v236_v27, %v235_v29  ;;  %v1697_v22 = vmul.f32 %v3874_v18, %v3874_v18 }
  0x34   :  { %v210_v15 = vsel %vm78_vm0, %v193_v63, 0.0 }
  0x35   :  { %443 = vxpose.xlu2.b32.cont [2/4] (short) (narrow) %v184_v4, 16  ;;  %v174_v20 = vsel %vm173_vm12, %v3359_v5, %v170_v2  ;;  %v239_v32 = vadd.f32 %v238_v30, %v237_v31  ;;  %v208_v5 = vsel %vm78_vm0, %v192_v57, 0.0 }
  0x36   :  { %v187_v28 = vmul.f32 %v174_v20, %v3717_v26  ;;  %v188_v34 = vmul.f32 %v174_v20, %v3731_v35  ;;  %v189_v41 = vmul.f32 %v174_v20, %v3736_v36  ;;  %v190_v26 = vmul.f32 %v174_v20, %v3748_v45  ;;  %v3796_v45 = vld [vmem:[%s6886_s1] sm:$0xff] }
  0x37   :  { %382 = vxpose.xlu1.b32.cont [2/4] (short) (narrow) %v180_v6, 16  ;;  %v240_v33 = vrot.slane %v239_v32, 4  ;;  %v191_v56 = vmul.f32 %v3796_v45, %v3796_v45  ;;  %v197_v6 = vmul.f32 %v3827_v61, %v3827_v61 }
  0x39   :  { %320 = vxpose.xlu0.b32.cont [2/4] (short) (narrow) %v176_v0, 16  ;;  %v241_v37 = vadd.f32 %v240_v33, %v239_v32  ;;  %v207_v4 = vsel %vm78_vm0, %v191_v56, 0.0  ;;  %v3840_v0 = vld [vmem:[%s6886_s1 + $0x18] sm:$0xff]  ;;  %v1732_v32 = vsel %vm78_vm0, %v1697_v22, 0.0 }
  0x3a   :  { %v209_v9 = vadd.f32 %v208_v5, %v207_v4 }
  0x3b   :  { %v242_v38 = vrot.slane %v241_v37, 2 }
  0x3c   :  { %v211_v2 = vadd.f32 %v210_v15, %v209_v9 }
  0x3d   :  { %444 = vxpose.xlu2.b32.cont [3/4] (short) (narrow) %v185_v12, 16  ;;  %v243_v39 = vadd.f32 %v242_v38, %v241_v37  ;;  %v3845_v12 = vld [vmem:[%s6886_s1 + $0x38] sm:$0xff] }
  0x3f   :  { %383 = vxpose.xlu1.b32.cont [3/4] (short) (narrow) %v181_v13, 16  ;;  %v244_v40 = vrot.slane %v243_v39, 1  ;;  %v221_v13 = vsel %vm78_vm0, %v196_v62, 0.0 }
  0x40   :  { %v222_v8 = vadd.f32 %v221_v13, %v220_v7  ;;  %v3939_v7 = vld [vmem:[%s6887_s2 + $0x38] sm:$0xff] }
  0x41   :  { %321 = vxpose.xlu0.b32.cont [3/4] (short) (narrow) %v177_v14, 16  ;;  %v245_v42 = vadd.f32 %v244_v40, %v243_v39  ;;  %v194_v14 = vmul.f32 %v3840_v0, %v3840_v0 }
  0x43   :  { %v261_v43 = vmax.f32 %v245_v42, 1e-24  ;;  %v212_v20 = vsel %vm78_vm0, %v194_v14, 0.0 }
  0x44   :  { %v213_v21 = vadd.f32 %v212_v20, %v211_v2 }
  0x45   :  { %445 = vxpose.xlu2.b32.end [4/4] (short) (narrow) %v186_v1, 16  ;;  %3360 = vrsqrt.f32 %v261_v43  ;;  %vm289_vm13 = vweird.f32 %v261_v43  ;;  %v198_v1 = vmul.f32 %v3845_v12, %v3845_v12 }
  0x46   :  { %v214_v30 = vrot.slane %v213_v21, 4 }
  0x47   :  { %384 = vxpose.xlu1.b32.end [4/4] (short) (narrow) %v182_v16, 16  ;;  %v3857_v16 = vld [vmem:[%s6887_s2 + $0x40] sm:$0xff]  ;;  %v225_v17 = vsel %vm78_vm0, %v198_v1, 0.0 }
  0x48   :  { %v215_v37 = vadd.f32 %v214_v30, %v213_v21 }
  0x49   :  { %322 = vxpose.xlu0.b32.end [4/4] (short) (narrow) %v178_v19, 16  ;;  %v3862_v19 = vld [vmem:[%s6887_s2 + $0x48] sm:$0xff] }
  0x4b   :  { %v3361_v44 = vpop.eup %3360 }
  0x4c   :  { %v284_v46 = vmul.f32 %v3361_v44, %v261_v43  ;;  %vm290_vm14 = vweird.f32 %v3361_v44 }
  0x4d   :  { %vm291_vm15 = vmor %vm289_vm13, %vm290_vm14 }
  0x4e   :  { %v285_v47 = vmul.f32 %v3361_v44, %v284_v46  ;;  %v3897_v46 = vld [vmem:[%s6887_s2 + $0x8] sm:$0xff] }
  0x50   :  { %v286_v48 = vmul.f32 0.5, %v285_v47  ;;  %v3902_v47 = vld [vmem:[%s6887_s2 + $0x20] sm:$0xff] }
  0x51   :  { %503 = vxpose.xlu0.b32.start [1/4] (short) (narrow) %v187_v28, 16  ;;  %v3883_v28 = vld [vmem:[%s6887_s2 + $0x58] sm:$0xff]  ;;  %v1691_v56 = vmul.f32 %v3902_v47, %v3902_v47 }
  0x52   :  { %v287_v35 = vsub.f32 1.5, %v286_v48  ;;  %v1698_v31 = vmul.f32 %v3883_v28, %v3883_v28 }
  0x53   :  { %v1716_v14 = vsel %vm78_vm0, %v1691_v56, 0.0 }
  0x54   :  { %v288_v49 = vmul.f32 %v3361_v44, %v287_v35  ;;  %v1734_v38 = vsel %vm78_vm0, %v1698_v31, 0.0 }
  0x56   :  { %v292_v50 = vsel %vm291_vm15, %v3361_v44, %v288_v49  ;;  %v3892_v44 = vld [vmem:[%s6887_s2] sm:$0xff] }
  0x57   :  { %v314_v51 = vmul.f32 %v292_v50, %v41_v25  ;;  %v313_v52 = vmul.f32 %v292_v50, %v40_v11  ;;  %v312_v36 = vmul.f32 %v292_v50, %v39_v3  ;;  %v311_v53 = vmul.f32 %v292_v50, %v38_v10 }
  0x58   :  { %v223_v10 = vsel %vm78_vm0, %v197_v6, 0.0  ;;  %v1695_v3 = vmul.f32 %v3857_v16, %v3857_v16  ;;  %v1696_v11 = vmul.f32 %v3862_v19, %v3862_v19  ;;  %v1687_v49 = vmul.f32 %v3892_v44, %v3892_v44  ;;  %v3933_v6 = vld [vmem:[%s6887_s2 + $0x18] sm:$0xff] }
  0x59   :  { %504 = vxpose.xlu0.b32.cont [2/4] (short) (narrow) %v188_v34, 16  ;;  %492 = vmatpush.msra.mxu2 %v314_v51  ;;  %v224_v25 = vadd.f32 %v223_v10, %v222_v8  ;;  %v1688_v50 = vmul.f32 %v3897_v46, %v3897_v46  ;;  %v3911_v51 = vld [vmem:[%s6887_s2 + $0x28] sm:$0xff]  ;;  %v1690_v8 = vmul.f32 %v3933_v6, %v3933_v6 }
  0x5a   :  { %v1729_v23 = vsel %vm78_vm0, %v1695_v3, 0.0  ;;  %v1730_v24 = vsel %vm78_vm0, %v1696_v11, 0.0  ;;  %v1692_v57 = vmul.f32 %v3911_v51, %v3911_v51  ;;  %v1703_v4 = vsel %vm78_vm0, %v1687_v49, 0.0 }
  0x5b   :  { %493 = vmatpush.msra.mxu2 %v313_v52  ;;  %v226_v27 = vadd.f32 %v225_v17, %v224_v25  ;;  %v1731_v29 = vadd.f32 %v1730_v24, %v1729_v23  ;;  %v1704_v9 = vsel %vm78_vm0, %v1688_v50, 0.0  ;;  %v1694_v11 = vmul.f32 %v3939_v7, %v3939_v7 }
  0x5c   :  { %v1705_v2 = vadd.f32 %v1704_v9, %v1703_v4  ;;  %v1717_v20 = vsel %vm78_vm0, %v1692_v57, 0.0  ;;  %v1708_v22 = vsel %vm78_vm0, %v1690_v8, 0.0  ;;  %v3969_v57 = vld [vmem:[%s6886_s1 + $0x70] sm:$0xff] }
  0x5d   :  { %494 = vmatpush.msra.mxu2 %v312_v36  ;;  %v227_v33 = vrot.slane %v226_v27, 4  ;;  %v1733_v34 = vadd.f32 %v1732_v32, %v1731_v29  ;;  %v3916_v36 = vld [vmem:[%s6887_s2 + $0x10] sm:$0xff]  ;;  %v1718_v23 = vadd.f32 %v1717_v20, %v1716_v14  ;;  %v1721_v30 = vsel %vm78_vm0, %v1694_v11, 0.0  ;;  %v3980_v14 = vld [vmem:[%s6886_s1 + $0x78] sm:$0xff] }
  0x5e   :  { %v1689_v63 = vmul.f32 %v3916_v36, %v3916_v36  ;;  %v205_v9 = vmul.f32 %v3969_v57, %v3969_v57  ;;  %v206_v11 = vmul.f32 %v3980_v14, %v3980_v14 }
  0x5f   :  { %495 = vmatpush.msra.mxu2 %v311_v53  ;;  %v228_v39 = vadd.f32 %v227_v33, %v226_v27  ;;  %v1735_v40 = vadd.f32 %v1734_v38, %v1733_v34  ;;  %v3921_v53 = vld [vmem:[%s6887_s2 + $0x30] sm:$0xff] }
  0x60   :  { %v1693_v13 = vmul.f32 %v3921_v53, %v3921_v53  ;;  %v1706_v3 = vsel %vm78_vm0, %v1689_v63, 0.0 }
  0x61   :  { %505 = vxpose.xlu0.b32.cont [3/4] (short) (narrow) %v189_v41, 16  ;;  %v216_v41 = vrot.slane %v215_v37, 2  ;;  %v229_v42 = vrot.slane %v228_v39, 2  ;;  %v1736_v43 = vrot.slane %v1735_v40, 4  ;;  %v1707_v21 = vadd.f32 %v1706_v3, %v1705_v2 }
  0x62   :  { %v1719_v24 = vsel %vm78_vm0, %v1693_v13, 0.0 }
  0x63   :  { %v230_v48 = vadd.f32 %v229_v42, %v228_v39  ;;  %v1737_v35 = vadd.f32 %v1736_v43, %v1735_v40  ;;  %v1709_v29 = vadd.f32 %v1708_v22, %v1707_v21  ;;  %v1720_v31 = vadd.f32 %v1719_v24, %v1718_v23 }
  0x65   :  { %v231_v59 = vrot.slane %v230_v48, 1  ;;  %v1738_v62 = vrot.slane %v1737_v35, 2  ;;  %v1710_v33 = vrot.slane %v1709_v29, 4  ;;  %v1722_v34 = vadd.f32 %v1721_v30, %v1720_v31 }
  0x66   :  { %v249_v30 = vsel %vm78_vm0, %v205_v9, 0.0 }
  0x67   :  { %v232_v15 = vadd.f32 %v231_v59, %v230_v48  ;;  %v1739_v1 = vadd.f32 %v1738_v62, %v1737_v35  ;;  %v1723_v39 = vrot.slane %v1722_v34, 4  ;;  %v3959_v48 = vld [vmem:[%s6886_s1 + $0x60] sm:$0xff]  ;;  %v3964_v35 = vld [vmem:[%s6886_s1 + $0x68] sm:$0xff] }
  0x68   :  { %v203_v59 = vmul.f32 %v3959_v48, %v3959_v48 }
  0x69   :  { %506 = vxpose.xlu0.b32.end [4/4] (short) (narrow) %v190_v26, 16  ;;  %v217_v26 = vadd.f32 %v216_v41, %v215_v37  ;;  %v260_v25 = vmax.f32 %v232_v15, 1e-24  ;;  %v1740_v17 = vrot.slane %v1739_v1, 1  ;;  %v1711_v37 = vadd.f32 %v1710_v33, %v1709_v29 }
  0x6b   :  { %v218_v52 = vrot.slane %v217_v26, 1  ;;  %v1741_v27 = vadd.f32 %v1740_v17, %v1739_v1  ;;  %v1712_v42 = vrot.slane %v1711_v37, 2  ;;  %vm279_vm3 = vweird.f32 %v260_v25 }
  0x6d   :  { %v219_v5 = vadd.f32 %v218_v52, %v217_v26  ;;  %v3953_v32 = vmax.f32 %v1741_v27, 1e-24  ;;  %v1724_v26 = vadd.f32 %v1723_v39, %v1722_v34  ;;  %v1713_v50 = vadd.f32 %v1712_v42, %v1711_v37 }
  0x6e   :  { %v251_v42 = vsel %vm78_vm0, %v206_v11, 0.0 }
  0x6f   :  { %v259_v10 = vmax.f32 %v219_v5, 1e-24  ;;  %v1725_v56 = vrot.slane %v1724_v26, 2  ;;  %v1714_v4 = vrot.slane %v1713_v50, 1  ;;  %v204_v5 = vmul.f32 %v3964_v35, %v3964_v35 }
  0x70   :  { %vm1785_vm7 = vweird.f32 %v3953_v32 }
  0x71   :  { %3362 = vrsqrt.f32 %v259_v10  ;;  %vm269_vm1 = vweird.f32 %v259_v10  ;;  %v1715_v8 = vadd.f32 %v1714_v4, %v1713_v50  ;;  %v1726_v3 = vadd.f32 %v1725_v56, %v1724_v26 }
  0x72   :  { %3364 = vrsqrt.f32 %v260_v25  ;;  %v247_v21 = vsel %vm78_vm0, %v204_v5, 0.0 }
  0x73   :  { %3366 = vrsqrt.f32 %v3953_v32  ;;  %v3986_v17 = vmax.f32 %v1715_v8, 1e-24  ;;  %v1727_v23 = vrot.slane %v1726_v3, 1 }
  0x75   :  { %3368 = vrsqrt.f32 %v3986_v17  ;;  %v1728_v37 = vadd.f32 %v1727_v23, %v1726_v3  ;;  %vm1765_vm10 = vweird.f32 %v3986_v17 }
  0x77   :  { %v3363_v38 = vpop.eup %3362 }
  0x78   :  { %v3365_v40 = vpop.eup %3364  ;;  %v264_v41 = vmul.f32 %v3363_v38, %v259_v10  ;;  %vm270_vm2 = vweird.f32 %v3363_v38  ;;  %v246_v10 = vsel %vm78_vm0, %v203_v59, 0.0 }
  0x79   :  { %v274_v43 = vmul.f32 %v3365_v40, %v260_v25  ;;  %v3367_v62 = vpop.eup %3366  ;;  %vm280_vm4 = vweird.f32 %v3365_v40  ;;  %vm271_vm5 = vmor %vm269_vm1, %vm270_vm2  ;;  %v248_v24 = vadd.f32 %v247_v21, %v246_v10  ;;  %vm351_vm1 = vcmask 261120  }
  0x7a   :  { %v265_v49 = vmul.f32 %v3363_v38, %v264_v41  ;;  %v1780_v1 = vmul.f32 %v3367_v62, %v3953_v32  ;;  %vm281_vm6 = vmor %vm279_vm3, %vm280_vm4  ;;  %vm1786_vm8 = vweird.f32 %v3367_v62 }
  0x7b   :  { %v275_v52 = vmul.f32 %v3365_v40, %v274_v43  ;;  %vm1787_vm9 = vmor %vm1785_vm7, %vm1786_vm8  ;;  %v3369_v26 = vpop.eup %3368 }
  0x7c   :  { %v266_v63 = vmul.f32 0.5, %v265_v49  ;;  %v1781_v25 = vmul.f32 %v3367_v62, %v1780_v1  ;;  %v1760_v50 = vmul.f32 %v3369_v26, %v3986_v17  ;;  %vm1766_vm11 = vweird.f32 %v3369_v26 }
  0x7d   :  { %v276_v13 = vmul.f32 0.5, %v275_v52  ;;  %vm1767_vm12 = vmor %vm1765_vm10, %vm1766_vm11 }
  0x7e   :  { %v267_v15 = vsub.f32 1.5, %v266_v63  ;;  %v1782_v29 = vmul.f32 0.5, %v1781_v25  ;;  %v4022_v63 = vld [vmem:[%s6887_s2 + $0x70] sm:$0xff] }
  0x7f   :  { %v277_v2 = vsub.f32 1.5, %v276_v13  ;;  %v4031_v13 = vld [vmem:[%s6887_s2 + $0x78] sm:$0xff] }
  0x80   :  { %v268_v20 = vmul.f32 %v3363_v38, %v267_v15  ;;  %v1783_v43 = vsub.f32 1.5, %v1782_v29  ;;  %v1701_v15 = vmul.f32 %v4022_v63, %v4022_v63 }
  0x81   :  { %v278_v22 = vmul.f32 %v3365_v40, %v277_v2 }
  0x82   :  { %v272_v27 = vsel %vm271_vm5, %v3363_v38, %v268_v20  ;;  %v1745_v25 = vsel %vm78_vm0, %v1701_v15, 0.0 }
  0x83   :  { %v306_v31 = vmul.f32 %v272_v27, %v3840_v0  ;;  %v282_v33 = vsel %vm281_vm6, %v3365_v40, %v278_v22  ;;  %v305_v34 = vmul.f32 %v272_v27, %v3822_v60  ;;  %v304_v38 = vmul.f32 %v272_v27, %v3801_v54 }
  0x84   :  { %v310_v39 = vmul.f32 %v282_v33, %v3845_v12  ;;  %v309_v41 = vmul.f32 %v282_v33, %v3827_v61  ;;  %v308_v0 = vmul.f32 %v282_v33, %v3815_v58  ;;  %v3999_v40 = vmax.f32 %v1728_v37, 1e-24  ;;  %v4008_v58 = vld [vmem:[%s6887_s2 + $0x60] sm:$0xff] }
  0x85   :  { %370 = vmatpush.msra.mxu0 %v306_v31  ;;  %v250_v60 = vadd.f32 %v249_v30, %v248_v24  ;;  %v1784_v12 = vmul.f32 %v3367_v62, %v1783_v43  ;;  %v303_v61 = vmul.f32 %v272_v27, %v3796_v45  ;;  %v307_v49 = vmul.f32 %v282_v33, %v3806_v55  ;;  %v4013_v45 = vld [vmem:[%s6887_s2 + $0x68] sm:$0xff] }
  0x86   :  { %431 = vmatpush.msra.mxu1 %v310_v39  ;;  %3370 = vrsqrt.f32 %v3999_v40  ;;  %v1699_v59 = vmul.f32 %v4008_v58, %v4008_v58  ;;  %v1700_v4 = vmul.f32 %v4013_v45, %v4013_v45  ;;  %vm1775_vm13 = vweird.f32 %v3999_v40 }
  0x87   :  { %371 = vmatpush.msra.mxu0 %v305_v34  ;;  %v252_v54 = vadd.f32 %v251_v42, %v250_v60  ;;  %v1788_v32 = vsel %vm1787_vm9, %v3367_v62, %v1784_v12  ;;  %v1761_v62 = vmul.f32 %v3369_v26, %v1760_v50 }
  0x88   :  { %432 = vmatpush.msra.mxu1 %v309_v41  ;;  %v1810_v55 = vmul.f32 %v1788_v32, %v3883_v28  ;;  %v1809_v52 = vmul.f32 %v1788_v32, %v3874_v18  ;;  %v1808_v28 = vmul.f32 %v1788_v32, %v3862_v19  ;;  %v1742_v18 = vsel %vm78_vm0, %v1699_v59, 0.0 }
  0x89   :  { %372 = vmatpush.msra.mxu0 %v304_v38  ;;  %v253_v56 = vrot.slane %v252_v54, 4  ;;  %v1762_v9 = vmul.f32 0.5, %v1761_v62  ;;  %v1743_v1 = vsel %vm78_vm0, %v1700_v4, 0.0  ;;  %v1807_v2 = vmul.f32 %v1788_v32, %v3857_v16 }
  0x8a   :  { %433 = vmatpush.msra.mxu1 %v308_v0  ;;  %1873 = vmatpush.msrb.mxu2 %v1810_v55  ;;  %v1702_v19 = vmul.f32 %v4031_v13, %v4031_v13  ;;  %v1744_v11 = vadd.f32 %v1743_v1, %v1742_v18 }
  0x8b   :  { %373 = vmatpush.msra.mxu0 %v303_v61  ;;  %v254_v5 = vadd.f32 %v253_v56, %v252_v54  ;;  %v1763_v10 = vsub.f32 1.5, %v1762_v9 }
  0x8c   :  { %434 = vmatpush.msra.mxu1 %v307_v49  ;;  %v3371_v8 = vpop.eup %3370  ;;  %1874 = vmatpush.msrb.mxu2 %v1809_v52  ;;  %v1746_v24 = vadd.f32 %v1745_v25, %v1744_v11  ;;  %v1747_v16 = vsel %vm78_vm0, %v1702_v19, 0.0 }
  0x8d   :  { %v255_v3 = vrot.slane %v254_v5, 2  ;;  %v1770_v20 = vmul.f32 %v3371_v8, %v3999_v40  ;;  %v1764_v21 = vmul.f32 %v3369_v26, %v1763_v10  ;;  %vm1776_vm14 = vweird.f32 %v3371_v8 }
  0x8e   :  { %1875 = vmatpush.msrb.mxu2 %v1808_v28  ;;  %v1748_v31 = vadd.f32 %v1747_v16, %v1746_v24  ;;  %vm1777_vm15 = vmor %vm1775_vm13, %vm1776_vm14 }
  0x8f   :  { %v1771_v22 = vmul.f32 %v3371_v8, %v1770_v20  ;;  %v256_v23 = vadd.f32 %v255_v3, %v254_v5  ;;  %v1768_v27 = vsel %vm1767_vm12, %v3369_v26, %v1764_v21 }
  0x90   :  { %1876 = vmatpush.msrb.mxu2 %v1807_v2  ;;  %v1802_v33 = vmul.f32 %v1768_v27, %v3933_v6  ;;  %v1801_v17 = vmul.f32 %v1768_v27, %v3916_v36  ;;  %v1749_v39 = vrot.slane %v1748_v31, 4  ;;  %v1800_v41 = vmul.f32 %v1768_v27, %v3897_v46 }
  0x91   :  { %v1772_v29 = vmul.f32 0.5, %v1771_v22  ;;  %v257_v30 = vrot.slane %v256_v23, 1  ;;  %v1799_v0 = vmul.f32 %v1768_v27, %v3892_v44 }
  0x92   :  { %1827 = vmatpush.msrb.mxu0 %v1802_v33  ;;  %v1750_v43 = vadd.f32 %v1749_v39, %v1748_v31 }
  0x93   :  { %v1773_v34 = vsub.f32 1.5, %v1772_v29  ;;  %v258_v37 = vadd.f32 %v257_v30, %v256_v23 }
  0x94   :  { %1828 = vmatpush.msrb.mxu0 %v1801_v17  ;;  %v1751_v60 = vrot.slane %v1750_v43, 2 }
  0x95   :  { %v1774_v42 = vmul.f32 %v3371_v8, %v1773_v34  ;;  %v262_v38 = vmax.f32 %v258_v37, 1e-24 }
  0x96   :  { %1829 = vmatpush.msrb.mxu0 %v1800_v41  ;;  %v1752_v12 = vadd.f32 %v1751_v60, %v1750_v43 }
  0x97   :  { %v1778_v40 = vsel %vm1777_vm15, %v3371_v8, %v1774_v42  ;;  %3372 = vrsqrt.f32 %v262_v38  ;;  %vm299_vm2 = vweird.f32 %v262_v38 }
  0x98   :  { %v1806_v6 = vmul.f32 %v1778_v40, %v3939_v7  ;;  %v1805_v36 = vmul.f32 %v1778_v40, %v3921_v53  ;;  %v1804_v46 = vmul.f32 %v1778_v40, %v3911_v51  ;;  %1830 = vmatpush.msrb.mxu0 %v1799_v0  ;;  %v1753_v26 = vrot.slane %v1752_v12, 1 }
  0x99   :  { %v1803_v44 = vmul.f32 %v1778_v40, %v3902_v47 }
  0x9a   :  { %1850 = vmatpush.msrb.mxu1 %v1806_v6  ;;  %v1754_v54 = vadd.f32 %v1753_v26, %v1752_v12 }
  0x9c   :  { %1851 = vmatpush.msrb.mxu1 %v1805_v36  ;;  %v1758_v7 = vmax.f32 %v1754_v54, 1e-24 }
  0x9d   :  { %v3373_v49 = vpop.eup %3372 }
  0x9e   :  { %1852 = vmatpush.msrb.mxu1 %v1804_v46  ;;  %v294_v32 = vmul.f32 %v3373_v49, %v262_v38  ;;  %3374 = vrsqrt.f32 %v1758_v7  ;;  %vm300_vm3 = vweird.f32 %v3373_v49  ;;  %vm1795_vm5 = vweird.f32 %v1758_v7 }
  0x9f   :  { %vm301_vm4 = vmor %vm299_vm2, %vm300_vm3 }
  0xa0   :  { %1853 = vmatpush.msrb.mxu1 %v1803_v44  ;;  %v295_v53 = vmul.f32 %v3373_v49, %v294_v32 }
  0xa2   :  { %v296_v55 = vmul.f32 0.5, %v295_v53 }
  0xa4   :  { %v297_v51 = vsub.f32 1.5, %v296_v55  ;;  %v3375_v56 = vpop.eup %3374 }
  0xa5   :  { %v1790_v62 = vmul.f32 %v3375_v56, %v1758_v7  ;;  %vm1796_vm6 = vweird.f32 %v3375_v56 }
  0xa6   :  { %v298_v52 = vmul.f32 %v3373_v49, %v297_v51  ;;  %vm1797_vm7 = vmor %vm1795_vm5, %vm1796_vm6 }
  0xa7   :  { %v1791_v18 = vmul.f32 %v3375_v56, %v1790_v62 }
  0xa8   :  { %v302_v47 = vsel %vm301_vm4, %v3373_v49, %v298_v52 }
  0xa9   :  { %v318_v28 = vmul.f32 %v302_v47, %v3980_v14  ;;  %v317_v5 = vmul.f32 %v302_v47, %v3969_v57  ;;  %v316_v9 = vmul.f32 %v302_v47, %v3964_v35  ;;  %v1792_v15 = vmul.f32 0.5, %v1791_v18 }
  0xaa   :  { %v315_v1 = vmul.f32 %v302_v47, %v3959_v48 }
  0xab   :  { %553 = vmatpush.msra.mxu3 %v318_v28  ;;  %v1793_v8 = vsub.f32 1.5, %v1792_v15 }
  0xad   :  { %554 = vmatpush.msra.mxu3 %v317_v5  ;;  %v1794_v57 = vmul.f32 %v3375_v56, %v1793_v8 }
  0xaf   :  { %555 = vmatpush.msra.mxu3 %v316_v9  ;;  %v1798_v3 = vsel %vm1797_vm7, %v3375_v56, %v1794_v57 }
  0xb0   :  { %v1814_v35 = vmul.f32 %v1798_v3, %v4031_v13  ;;  %v1813_v48 = vmul.f32 %v1798_v3, %v4022_v63  ;;  %v1812_v19 = vmul.f32 %v1798_v3, %v4013_v45  ;;  %v1811_v11 = vmul.f32 %v1798_v3, %v4008_v58 }
  0xb1   :  { %556 = vmatpush.msra.mxu3 %v315_v1 }
  0xb3   :  { %1896 = vmatpush.msrb.mxu3 %v1814_v35 }
  0xb5   :  { %1897 = vmatpush.msrb.mxu3 %v1813_v48 }
  0xb7   :  { %1898 = vmatpush.msrb.mxu3 %v1812_v19 }
  0xb9   :  { %1899 = vmatpush.msrb.mxu3 %v1811_v11 }
  0xc6   :  { %v458_v61 = vpop.trf.xlu2 }
  0xc7   :  { %3330 = vmatmul.msk.f32.vlgmr.msra.gmra.mxu2 %vm351_vm1, %v458_v61 }
  0xce   :  { %v459_v50 = vpop.trf.xlu2 }
  0xcf   :  { %3331 = vmatmul.msk.f32.gmra.mxu2 %vm351_vm1, %v459_v50 }
  0xd3   :  { %v397_v59 = vpop.trf.xlu1 }
  0xd4   :  { %3328 = vmatmul.msk.f32.vlgmr.msra.gmra.mxu1 %vm351_vm1, %v397_v59 }
  0xd5   :  { %v335_v4 = vpop.trf.xlu0 }
  0xd6   :  { %3326 = vmatmul.msk.f32.vlgmr.msra.gmra.mxu0 %vm351_vm1, %v335_v4 }
  0xd7   :  { %3338 = vmatmul.msk.f32.vlgmr.msrb.gmra.mxu2 %vm351_vm1, %v458_v61 }
  0xdb   :  { %v398_v2 = vpop.trf.xlu1 }
  0xdc   :  { %3329 = vmatmul.msk.f32.gmra.mxu1 %vm351_vm1, %v398_v2 }
  0xdd   :  { %v336_v14 = vpop.trf.xlu0 }
  0xde   :  { %3327 = vmatmul.msk.f32.gmra.mxu0 %vm351_vm1, %v336_v14 }
  0xdf   :  { %3339 = vmatmul.msk.f32.gmra.mxu2 %vm351_vm1, %v459_v50 }
  0xe4   :  { %3336 = vmatmul.msk.f32.vlgmr.msrb.gmra.mxu1 %vm351_vm1, %v397_v59 }
  0xe6   :  { %3334 = vmatmul.msk.f32.vlgmr.msrb.gmra.mxu0 %vm351_vm1, %v335_v4 }
  0xec   :  { %3337 = vmatmul.msk.f32.gmra.mxu1 %vm351_vm1, %v398_v2 }
  0xee   :  { %3335 = vmatmul.msk.f32.gmra.mxu0 %vm351_vm1, %v336_v14 }
  0xf5   :  { %v519_v10 = vpop.trf.xlu0 }
  0xf6   :  { %3332 = vmatmul.msk.f32.vlgmr.msra.gmra.mxu3 %vm351_vm1, %v519_v10 }
  0xfd   :  { %v520_v63 = vpop.trf.xlu0 }
  0xfe   :  { %3333 = vmatmul.msk.f32.gmra.mxu3 %vm351_vm1, %v520_v63 }
 0x106   :  { %3340 = vmatmul.msk.f32.vlgmr.msrb.gmra.mxu3 %vm351_vm1, %v519_v10 }
 0x10e   :  { %3341 = vmatmul.msk.f32.gmra.mxu3 %vm351_vm1, %v520_v63 }
 0x14a   :  { %v497_v58 = vpop.f32.mrf.mxu2 }
 0x14b   :  { %v4076_v45 = vmul.f32 10.0, %v497_v58 }
 0x14d   :  { %v584_v23 = vsel %vm78_vm0, %v4076_v45, -inf }
 0x151   :  { %v436_v13 = vpop.f32.mrf.mxu1 }
 0x152   :  { %v4078_v20 = vmul.f32 10.0, %v436_v13  ;;  %v500_v25 = vpop.f32.mrf.mxu2 }
 0x153   :  { %v375_v21 = vpop.f32.mrf.mxu0  ;;  %v4080_v22 = vmul.f32 10.0, %v500_v25 }
 0x154   :  { %v4084_v24 = vmul.f32 10.0, %v375_v21  ;;  %v578_v16 = vsel %vm78_vm0, %v4078_v20, -inf }
 0x155   :  { %579 = vmax.xlane.f32.xlu0 %v578_v16  ;;  %v4090_v27 = vsel %vm78_vm0, %v4080_v22, -inf }
 0x156   :  { %v572_v29 = vsel %vm78_vm0, %v4084_v24, -inf  ;;  %v778_v30 = vmax.f32 %v584_v23, %v4090_v27 }
 0x157   :  { %573 = vmax.xlane.f32.xlu1 %v572_v29 }
 0x158   :  { %v779_v31 = vrot.slane %v778_v30, 4 }
 0x159   :  { %v439_v33 = vpop.f32.mrf.mxu1 }
 0x15a   :  { %v4095_v17 = vmul.f32 10.0, %v439_v33  ;;  %v1878_v34 = vpop.f32.mrf.mxu2  ;;  %v780_v37 = vmax.f32 %v778_v30, %v779_v31 }
 0x15b   :  { %v378_v39 = vpop.f32.mrf.mxu0  ;;  %v4105_v60 = vmul.f32 10.0, %v1878_v34 }
 0x15c   :  { %v4097_v41 = vmul.f32 10.0, %v378_v39  ;;  %v581_v42 = vsel %vm78_vm0, %v4095_v17, -inf  ;;  %v781_v38 = vrot.slane %v780_v37, 2 }
 0x15d   :  { %v771_v43 = vmax.f32 %v578_v16, %v581_v42  ;;  %v4114_v55 = vsel %vm78_vm0, %v4105_v60, -inf }
 0x15e   :  { %v782_v0 = vmax.f32 %v780_v37, %v781_v38  ;;  %v4103_v40 = vsel %vm78_vm0, %v4097_v41, -inf }
 0x15f   :  { %585 = vmax.xlane.f32.xlu1 %v584_v23  ;;  %v772_v6 = vrot.slane %v771_v43, 4  ;;  %v764_v36 = vmax.f32 %v572_v29, %v4103_v40 }
 0x160   :  { %v783_v12 = vrot.slane %v782_v0, 1 }
 0x161   :  { %v1855_v61 = vpop.f32.mrf.mxu1  ;;  %v773_v46 = vmax.f32 %v771_v43, %v772_v6  ;;  %v765_v26 = vrot.slane %v764_v36, 4 }
 0x162   :  { %v4108_v44 = vmul.f32 10.0, %v1855_v61  ;;  %v1881_v49 = vpop.f32.mrf.mxu2  ;;  %v784_v54 = vmax.f32 %v782_v0, %v783_v12 }
 0x163   :  { %v1832_v32 = vpop.f32.mrf.mxu0  ;;  %v4110_v7 = vmul.f32 10.0, %v1881_v49  ;;  %v774_v53 = vrot.slane %v773_v46, 2  ;;  %v766_v50 = vmax.f32 %v764_v36, %v765_v26 }
 0x164   :  { %v1921_v51 = vsel %vm78_vm0, %v4108_v44, -inf  ;;  %v796_v52 = vsub.f32 %v4076_v45, %v784_v54  ;;  %v797_v56 = vsub.f32 %v4080_v22, %v784_v54  ;;  %v4123_v57 = vmul.f32 10.0, %v1832_v32 }
 0x165   :  { %1922 = vmax.xlane.f32.xlu0 %v1921_v51  ;;  %v775_v59 = vmax.f32 %v773_v46, %v774_v53  ;;  %v1930_v47 = vsel %vm78_vm0, %v4110_v7, -inf  ;;  %v767_v62 = vrot.slane %v766_v50, 2 }
 0x166   :  { %v808_v4 = vmul.f32 1.442695, %v796_v52  ;;  %v2121_v28 = vmax.f32 %v4114_v55, %v1930_v47  ;;  %v810_v5 = vmul.f32 1.442695, %v797_v56  ;;  %v4141_v30 = vsel %vm78_vm0, %v4123_v57, -inf }
 0x167   :  { %v776_v18 = vrot.slane %v775_v59, 1  ;;  %582 = vmax.xlane.f32.xlu1 %v581_v42  ;;  %v768_v9 = vmax.f32 %v766_v50, %v767_v62 }
 0x168   :  { %3376 = vpow2.f32 %v808_v4  ;;  %v2122_v15 = vrot.slane %v2121_v28, 4 }
 0x169   :  { %v777_v1 = vmax.f32 %v775_v59, %v776_v18  ;;  %v1858_v8 = vpop.f32.mrf.mxu1  ;;  %v769_v2 = vrot.slane %v768_v9, 1  ;;  %3378 = vpow2.f32 %v810_v5 }
 0x16a   :  { %v4125_v14 = vmul.f32 10.0, %v1858_v8  ;;  %v2123_v3 = vmax.f32 %v2121_v28, %v2122_v15 }
 0x16b   :  { %v794_v35 = vsub.f32 %v4078_v20, %v777_v1  ;;  %v795_v48 = vsub.f32 %v4095_v17, %v777_v1  ;;  %v1835_v19 = vpop.f32.mrf.mxu0  ;;  %v770_v11 = vmax.f32 %v768_v9, %v769_v2 }
 0x16c   :  { %v4129_v10 = vmul.f32 10.0, %v1835_v19  ;;  %v2124_v63 = vrot.slane %v2123_v3, 2  ;;  %v4133_v58 = vsel %vm78_vm0, %v4125_v14, -inf }
 0x16d   :  { %v806_v13 = vmul.f32 1.442695, %v795_v48  ;;  %1931 = vmax.xlane.f32.xlu0 %v1930_v47  ;;  %v792_v25 = vsub.f32 %v4084_v24, %v770_v11  ;;  %v793_v21 = vsub.f32 %v4097_v41, %v770_v11  ;;  %v804_v23 = vmul.f32 1.442695, %v794_v35 }
 0x16e   :  { %v4137_v16 = vpop.eup %3376  ;;  %v2125_v29 = vmax.f32 %v2123_v3, %v2124_v63  ;;  %v4145_v31 = vsel %vm78_vm0, %v4129_v10, -inf  ;;  %v2114_v33 = vmax.f32 %v1921_v51, %v4133_v58 }
 0x16f   :  { %v4148_v34 = vpop.eup %3378  ;;  %3380 = vpow2.f32 %v806_v13  ;;  %v834_v37 = vsel %vm78_vm0, %v4137_v16, 0.0  ;;  %588 = vmax.xlane.f32.xlu1 %v4090_v27  ;;  %v802_v39 = vmul.f32 1.442695, %v793_v21  ;;  %v2107_v42 = vmax.f32 %v4141_v30, %v4145_v31 }
 0x170   :  { %v2126_v38 = vrot.slane %v2125_v29, 1  ;;  %3382 = vpow2.f32 %v804_v23  ;;  %v2115_v43 = vrot.slane %v2114_v33, 4  ;;  %v835_v0 = vsel %vm78_vm0, %v4148_v34, 0.0 }
 0x171   :  { %3384 = vpow2.f32 %v802_v39  ;;  %v2108_v6 = vrot.slane %v2107_v42, 4  ;;  %v836_v36 = vadd.f32 %v835_v0, %v834_v37  ;;  %v800_v12 = vmul.f32 1.442695, %v792_v25 }
 0x172   :  { %v2127_v61 = vmax.f32 %v2125_v29, %v2126_v38  ;;  %v2116_v46 = vmax.f32 %v2114_v33, %v2115_v43 }
 0x173   :  { %v2109_v26 = vmax.f32 %v2107_v42, %v2108_v6  ;;  %v837_v49 = vrot.slane %v836_v36, 4  ;;  %3386 = vpow2.f32 %v800_v12 }
 0x174   :  { %v2139_v27 = vsub.f32 %v4105_v60, %v2127_v61  ;;  %v2140_v54 = vsub.f32 %v4110_v7, %v2127_v61  ;;  %v2117_v32 = vrot.slane %v2116_v46, 2 }
 0x175   :  { %v4159_v53 = vpop.eup %3380  ;;  %v2110_v50 = vrot.slane %v2109_v26, 2  ;;  %v838_v51 = vadd.f32 %v837_v49, %v836_v36 }
 0x176   :  { %v4161_v52 = vpop.eup %3382  ;;  %v826_v56 = vsel %vm78_vm0, %v4159_v53, 0.0  ;;  %v2151_v59 = vmul.f32 1.442695, %v2139_v27  ;;  %v2118_v47 = vmax.f32 %v2116_v46, %v2117_v32  ;;  %v2153_v62 = vmul.f32 1.442695, %v2140_v54 }
 0x177   :  { %v4165_v4 = vpop.eup %3384  ;;  %v2111_v28 = vmax.f32 %v2109_v26, %v2110_v50  ;;  %v825_v5 = vsel %vm78_vm0, %v4161_v52, 0.0  ;;  %v839_v18 = vrot.slane %v838_v51, 2 }
 0x178   :  { %v817_v9 = vsel %vm78_vm0, %v4165_v4, 0.0  ;;  %3388 = vpow2.f32 %v2151_v59  ;;  %v827_v15 = vadd.f32 %v826_v56, %v825_v5  ;;  %v2119_v1 = vrot.slane %v2118_v47, 1 }
 0x179   :  { %v4171_v8 = vpop.eup %3386  ;;  %v558_v2 = vpop.f32.mrf.mxu3  ;;  %v2112_v3 = vrot.slane %v2111_v28, 1  ;;  %v840_v35 = vadd.f32 %v839_v18, %v838_v51  ;;  %3390 = vpow2.f32 %v2153_v62 }
 0x17a   :  { %v4173_v48 = vmul.f32 10.0, %v558_v2  ;;  %v828_v19 = vrot.slane %v827_v15, 4  ;;  %v2120_v11 = vmax.f32 %v2118_v47, %v2119_v1  ;;  %v816_v63 = vsel %vm78_vm0, %v4171_v8, 0.0 }
 0x17b   :  { %v2113_v13 = vmax.f32 %v2111_v28, %v2112_v3  ;;  %v841_v25 = vrot.slane %v840_v35, 1  ;;  %v818_v21 = vadd.f32 %v817_v9, %v816_v63 }
 0x17c   :  { %v590_v23 = vsel %vm78_vm0, %v4173_v48, -inf  ;;  %v829_v29 = vadd.f32 %v828_v19, %v827_v15  ;;  %v2137_v33 = vsub.f32 %v4108_v44, %v2120_v11  ;;  %v2138_v37 = vsub.f32 %v4125_v14, %v2120_v11 }
 0x17d   :  { %591 = vmax.xlane.f32.xlu2 %v590_v23  ;;  %v4181_v39 = vadd.f32 %v841_v25, %v840_v35  ;;  %v819_v42 = vrot.slane %v818_v21, 4  ;;  %v2136_v36 = vsub.f32 %v4129_v10, %v2113_v13  ;;  %v2135_v32 = vsub.f32 %v4123_v57, %v2113_v13 }
 0x17e   :  { %v4183_v38 = vpop.eup %3388  ;;  %v830_v43 = vrot.slane %v829_v29, 2  ;;  %v2149_v0 = vmul.f32 1.442695, %v2138_v37  ;;  %v2147_v12 = vmul.f32 1.442695, %v2137_v33 }
 0x17f   :  { %v4185_v6 = vpop.eup %3390  ;;  %3392 = vrcp.f32 %v4181_v39  ;;  %v2177_v61 = vsel %vm78_vm0, %v4183_v38, 0.0  ;;  %v820_v49 = vadd.f32 %v819_v42, %v818_v21  ;;  %v2145_v51 = vmul.f32 1.442695, %v2136_v36 }
 0x180   :  { %v831_v46 = vadd.f32 %v830_v43, %v829_v29  ;;  %3394 = vpow2.f32 %v2149_v0  ;;  %v2178_v27 = vsel %vm78_vm0, %v4185_v6, 0.0  ;;  %v2143_v3 = vmul.f32 1.442695, %v2135_v32 }
 0x181   :  { %v561_v26 = vpop.f32.mrf.mxu3  ;;  %v821_v56 = vrot.slane %v820_v49, 2  ;;  %3396 = vpow2.f32 %v2147_v12  ;;  %v2179_v59 = vadd.f32 %v2178_v27, %v2177_v61  ;;  %v891_v25 = vand.u32 2147483648, %v4181_v39 }
 0x182   :  { %v4193_v54 = vmul.f32 10.0, %v561_v26  ;;  %v832_v50 = vrot.slane %v831_v46, 1  ;;  %vm885_vm8 = vweird.f32 %v4181_v39  ;;  %v889_v36 = vand.u32 2147483647, %v4181_v39 }
 0x183   :  { %v822_v18 = vadd.f32 %v821_v56, %v820_v49  ;;  %v2180_v9 = vrot.slane %v2179_v59, 4  ;;  %v892_v49 = vor.u32 1.1754944e-38, %v891_v25 }
 0x184   :  { %v593_v47 = vsel %vm78_vm0, %v4193_v54, -inf  ;;  %v4198_v62 = vadd.f32 %v832_v50, %v831_v46  ;;  %vm4238_vm12 = vcmp.eq.f32.partialorder %v889_v36, 8.507059e+37 }
 0x185   :  { %v4200_v28 = vpop.eup %3392  ;;  %576 = vmax.xlane.f32.xlu2 %v4103_v40  ;;  %594 = vmax.xlane.f32.xlu1 %v593_v47  ;;  %v785_v5 = vmax.f32 %v590_v23, %v593_v47  ;;  %v823_v19 = vrot.slane %v822_v18, 1  ;;  %v2181_v21 = vadd.f32 %v2180_v9, %v2179_v59 }
 0x186   :  { %v4203_v15 = vpop.eup %3394  ;;  %3398 = vrcp.f32 %v4198_v62  ;;  %v881_v2 = vmul.f32 %v4200_v28, %v4181_v39  ;;  %v875_v0 = vand.u32 2147483647, %v4198_v62  ;;  %vm871_vm9 = vweird.f32 %v4198_v62 }
 0x187   :  { %v786_v1 = vrot.slane %v785_v5, 4  ;;  %3400 = vpow2.f32 %v2145_v51  ;;  %v2169_v35 = vsel %vm78_vm0, %v4203_v15, 0.0  ;;  %v4210_v11 = vpop.eup %3396  ;;  %v4213_v23 = vadd.f32 %v823_v19, %v822_v18 }
 0x188   :  { %v882_v13 = vsub.f32 1.0, %v881_v2  ;;  %v2168_v29 = vsel %vm78_vm0, %v4210_v11, 0.0  ;;  %v2182_v42 = vrot.slane %v2181_v21, 2  ;;  %3402 = vpow2.f32 %v2143_v3 }
 0x189   :  { %v787_v40 = vmax.f32 %v785_v5, %v786_v1  ;;  %v1901_v63 = vpop.f32.mrf.mxu3  ;;  %v2170_v37 = vadd.f32 %v2169_v35, %v2168_v29  ;;  %3404 = vrcp.f32 %v4213_v23  ;;  %v877_v27 = vand.u32 2147483648, %v4198_v62 }
 0x18a   :  { %v883_v26 = vmul.f32 %v4200_v28, %v882_v13  ;;  %v2183_v50 = vadd.f32 %v2182_v42, %v2181_v21  ;;  %v4229_v56 = vmul.f32 10.0, %v1901_v63  ;;  %vm886_vm10 = vweird.f32 %v4200_v28 }
 0x18b   :  { %v788_v33 = vrot.slane %v787_v40, 2  ;;  %v2171_v32 = vrot.slane %v2170_v37, 4  ;;  %vm4234_vm11 = vcmp.eq.f32.partialorder %v875_v0, 8.507059e+37  ;;  %v878_v63 = vor.u32 1.1754944e-38, %v877_v27  ;;  %vm4256_vm14 = vmor %vm885_vm8, %vm886_vm10 }
 0x18c   :  { %v3399_v43 = vpop.eup %3398  ;;  %v2184_v18 = vrot.slane %v2183_v50, 1  ;;  %v884_v35 = vadd.f32 %v4200_v28, %v883_v26  ;;  %v1933_v29 = vsel %vm78_vm0, %v4229_v56, -inf  ;;  %v861_v42 = vand.u32 2147483647, %v4213_v23 }
 0x18d   :  { %v4221_v12 = vpop.eup %3400  ;;  %v789_v61 = vmax.f32 %v787_v40, %v788_v33  ;;  %1928 = vmax.xlane.f32.xlu2 %v4114_v55  ;;  %1916 = vmax.xlane.f32.xlu1 %v4141_v30  ;;  %v867_v46 = vmul.f32 %v3399_v43, %v4198_v62  ;;  %v2172_v5 = vadd.f32 %v2171_v32, %v2170_v37  ;;  %vm872_vm13 = vweird.f32 %v3399_v43 }
 0x18e   :  { %v2160_v55 = vsel %vm78_vm0, %v4221_v12, 0.0  ;;  %v4242_v9 = vpop.eup %3402  ;;  %v4247_v25 = vadd.f32 %v2184_v18, %v2183_v50  ;;  %vm873_vm15 = vmor %vm871_vm9, %vm872_vm13  ;;  %v888_v27 = vsel %vm4256_vm14, %v4200_v28, %v884_v35  ;;  %v863_v62 = vand.u32 2147483648, %v4213_v23 }
 0x18f   :  { %v790_v51 = vrot.slane %v789_v61, 1  ;;  %v868_v59 = vsub.f32 1.0, %v867_v46  ;;  %v3405_v19 = vpop.eup %3404  ;;  %v2173_v13 = vrot.slane %v2172_v5, 2  ;;  %v2159_v46 = vsel %vm78_vm0, %v4242_v9, 0.0 }
 0x190   :  { %v853_v36 = vmul.f32 %v3405_v19, %v4213_v23  ;;  %3406 = vrcp.f32 %v4247_v25  ;;  %v2161_v18 = vadd.f32 %v2160_v55, %v2159_v46  ;;  %vm858_vm1 = vweird.f32 %v3405_v19 }
 0x191   :  { %v791_v1 = vmax.f32 %v789_v61, %v790_v51  ;;  %v1904_v2 = vpop.f32.mrf.mxu3  ;;  %v869_v3 = vmul.f32 %v3399_v43, %v868_v59  ;;  %v2174_v61 = vadd.f32 %v2173_v13, %v2172_v5  ;;  %v893_v30 = vsel %vm4238_vm12, %v892_v49, %v888_v27 }
 0x192   :  { %v4245_v40 = vmul.f32 10.0, %v1904_v2  ;;  %v854_v50 = vsub.f32 1.0, %v853_v36  ;;  %vm857_vm2 = vweird.f32 %v4213_v23  ;;  %vm862_vm4 = vcmp.eq.f32.partialorder %v861_v42, 8.507059e+37 }
 0x193   :  { %v798_v21 = vsub.f32 %v4173_v48, %v791_v1  ;;  %v870_v33 = vadd.f32 %v3399_v43, %v869_v3  ;;  %v2175_v51 = vrot.slane %v2174_v61, 1  ;;  %vm859_vm3 = vmor %vm857_vm2, %vm858_vm1  ;;  %v864_v55 = vor.u32 1.1754944e-38, %v863_v62 }
 0x194   :  { %v1936_v0 = vsel %vm78_vm0, %v4245_v40, -inf  ;;  %v855_v2 = vmul.f32 %v3405_v19, %v854_v50  ;;  %v913_v13 = vmul.f32 %v4148_v34, %v893_v30  ;;  %vm2228_vm5 = vweird.f32 %v4247_v25 }
 0x195   :  { %1919 = vmax.xlane.f32.xlu2 %v4145_v31  ;;  %1934 = vmax.xlane.f32.xlu1 %v1933_v29  ;;  %v874_v39 = vsel %vm873_vm15, %v3399_v43, %v870_v33  ;;  %v2128_v26 = vmax.f32 %v1933_v29, %v1936_v0  ;;  %v812_v59 = vmul.f32 1.442695, %v798_v21  ;;  %v799_v43 = vsub.f32 %v4193_v54, %v791_v1 }
 0x196   :  { %v879_v32 = vsel %vm4234_vm11, %v878_v63, %v874_v39  ;;  %v4278_v3 = vadd.f32 %v2175_v51, %v2174_v61  ;;  %v856_v63 = vadd.f32 %v3405_v19, %v855_v2  ;;  %v4285_v1 = vpop.eup %3406  ;;  %v2162_v33 = vrot.slane %v2161_v18, 4 }
 0x197   :  { %v910_v5 = vmul.f32 %v4161_v52, %v879_v32  ;;  %v2129_v31 = vrot.slane %v2128_v26, 4  ;;  %v814_v29 = vmul.f32 1.442695, %v799_v43  ;;  %v2224_v23 = vmul.f32 %v4285_v1, %v4247_v25 }
 0x198   :  { %3408 = vrcp.f32 %v4278_v3  ;;  %v860_v21 = vsel %vm859_vm3, %v3405_v19, %v856_v63  ;;  %v2163_v42 = vadd.f32 %v2162_v33, %v2161_v18  ;;  %v912_v19 = vmul.f32 %v4137_v16, %v893_v30 }
 0x199   :  { %v1214_v28 = vsel %vm78_vm0, %v910_v5, 0.0  ;;  %v2130_v35 = vmax.f32 %v2128_v26, %v2129_v31  ;;  %3410 = vpow2.f32 %v812_v59  ;;  %v865_v47 = vsel %vm862_vm4, %v864_v55, %v860_v21 }
 0x19a   :  { %1215 = vadd.xlane.f32.xlu0 %v1214_v28  ;;  %v2225_v36 = vsub.f32 1.0, %v2224_v23  ;;  %3412 = vpow2.f32 %v814_v29  ;;  %v908_v46 = vmul.f32 %v4171_v8, %v865_v47  ;;  %v909_v34 = vmul.f32 %v4165_v4, %v865_v47 }
 0x19b   :  { %v2131_v52 = vrot.slane %v2130_v35, 2  ;;  %v911_v27 = vmul.f32 %v4159_v53, %v879_v32  ;;  %v2218_v62 = vand.u32 2147483647, %v4278_v3  ;;  %v2220_v50 = vand.u32 2147483648, %v4278_v3 }
 0x19c   :  { %v2164_v8 = vrot.slane %v2163_v42, 2  ;;  %v2226_v59 = vmul.f32 %v4285_v1, %v2225_v36  ;;  %v1208_v53 = vsel %vm78_vm0, %v908_v46, 0.0  ;;  %v1211_v32 = vsel %vm78_vm0, %v909_v34, 0.0 }
 0x19d   :  { %1937 = vmax.xlane.f32.xlu2 %v1936_v0  ;;  %v2132_v49 = vmax.f32 %v2130_v35, %v2131_v52  ;;  %1925 = vmax.xlane.f32.xlu1 %v4133_v58  ;;  %v1223_v58 = vsel %vm78_vm0, %v913_v13, 0.0  ;;  %vm2214_vm7 = vweird.f32 %v4278_v3  ;;  %vm2229_vm8 = vweird.f32 %v4285_v1 }
 0x19e   :  { %v3409_v61 = vpop.eup %3408  ;;  %v2165_v31 = vadd.f32 %v2164_v8, %v2163_v42  ;;  %v2227_v52 = vadd.f32 %v4285_v1, %v2226_v59  ;;  %v2221_v13 = vor.u32 1.1754944e-38, %v2220_v50  ;;  %v2232_v21 = vand.u32 2147483647, %v4247_v25  ;;  %vm4326_vm11 = vmor %vm2228_vm5, %vm2229_vm8 }
 0x19f   :  { %v2133_v37 = vrot.slane %v2132_v49, 1  ;;  %v4294_v39 = vpop.eup %3410  ;;  %v2210_v26 = vmul.f32 %v3409_v61, %v4278_v3  ;;  %vm2215_vm6 = vweird.f32 %v3409_v61  ;;  %v2234_v29 = vand.u32 2147483648, %v4247_v25 }
 0x1a0   :  { %v843_v5 = vsel %vm78_vm0, %v4294_v39, 0.0  ;;  %v4309_v18 = vpop.eup %3412  ;;  %v2166_v30 = vrot.slane %v2165_v31, 1  ;;  %vm2216_vm9 = vmor %vm2214_vm7, %vm2215_vm6  ;;  %vm2219_vm10 = vcmp.eq.f32.partialorder %v2218_v62, 8.507059e+37  ;;  %v2231_v36 = vsel %vm4326_vm11, %v4285_v1, %v2227_v52 }
 0x1a1   :  { %v2134_v0 = vmax.f32 %v2132_v49, %v2133_v37  ;;  %v2211_v51 = vsub.f32 1.0, %v2210_v26  ;;  %v844_v35 = vsel %vm78_vm0, %v4309_v18, 0.0  ;;  %v1220_v46 = vsel %vm78_vm0, %v912_v19, 0.0 }
 0x1a2   :  { %1224 = vadd.xlane.f32.xlu0 %v1223_v58  ;;  %v845_v55 = vadd.f32 %v844_v35, %v843_v5  ;;  %v4318_v49 = vadd.f32 %v2166_v30, %v2165_v31  ;;  %v2235_v34 = vor.u32 1.1754944e-38, %v2234_v29  ;;  %vm2233_vm12 = vcmp.eq.f32.partialorder %v2232_v21, 8.507059e+37 }
 0x1a3   :  { %v2141_v4 = vsub.f32 %v4229_v56, %v2134_v0  ;;  %v2142_v16 = vsub.f32 %v4245_v40, %v2134_v0  ;;  %v2212_v2 = vmul.f32 %v3409_v61, %v2211_v51 }
 0x1a4   :  { %v846_v3 = vrot.slane %v845_v55, 4  ;;  %v4345_v26 = vsel %vm2233_vm12, %v2235_v34, %v2231_v36  ;;  %vm2200_vm3 = vweird.f32 %v4318_v49 }
 0x1a5   :  { %v2157_v43 = vmul.f32 1.442695, %v2142_v16  ;;  %1209 = vadd.xlane.f32.xlu2 %v1208_v53  ;;  %1212 = vadd.xlane.f32.xlu1 %v1211_v32  ;;  %v2155_v28 = vmul.f32 1.442695, %v2141_v4  ;;  %v2213_v63 = vadd.f32 %v3409_v61, %v2212_v2  ;;  %v2256_v50 = vmul.f32 %v4185_v6, %v4345_v26 }
 0x1a6   :  { %v847_v42 = vadd.f32 %v846_v3, %v845_v55  ;;  %v2206_v3 = vand.u32 2147483648, %v4318_v49 }
 0x1a7   :  { %3414 = vpow2.f32 %v2157_v43  ;;  %v2217_v33 = vsel %vm2216_vm9, %v3409_v61, %v2213_v63  ;;  %v1217_v61 = vsel %vm78_vm0, %v911_v27, 0.0  ;;  %v2566_v5 = vsel %vm78_vm0, %v2256_v50, 0.0 }
 0x1a8   :  { %3416 = vpow2.f32 %v2155_v28  ;;  %v4320_v47 = vsel %vm2219_vm10, %v2221_v13, %v2217_v33  ;;  %v848_v58 = vrot.slane %v847_v42, 2 }
 0x1a9   :  { %v2253_v37 = vmul.f32 %v4210_v11, %v4320_v47  ;;  %3418 = vrcp.f32 %v4318_v49 }
 0x1aa   :  { %v849_v19 = vadd.f32 %v848_v58, %v847_v42  ;;  %v2207_v58 = vor.u32 1.1754944e-38, %v2206_v3 }
 0x1ab   :  { %v2557_v25 = vsel %vm78_vm0, %v2253_v37, 0.0  ;;  %v2204_v37 = vand.u32 2147483647, %v4318_v49 }
 0x1ac   :  { %2558 = vadd.xlane.f32.xlu0 %v2557_v25  ;;  %v850_v8 = vrot.slane %v849_v19, 1 }
 0x1ad   :  { %v4337_v0 = vpop.eup %3414  ;;  %1218 = vadd.xlane.f32.xlu2 %v1217_v61  ;;  %1221 = vadd.xlane.f32.xlu1 %v1220_v46  ;;  %vm2205_vm5 = vcmp.eq.f32.partialorder %v2204_v37, 8.507059e+37 }
 0x1ae   :  { %v4341_v11 = vpop.eup %3416  ;;  %v2187_v1 = vsel %vm78_vm0, %v4337_v0, 0.0  ;;  %v851_v51 = vadd.f32 %v850_v8, %v849_v19 }
 0x1af   :  { %v2186_v27 = vsel %vm78_vm0, %v4341_v11, 0.0  ;;  %v3419_v16 = vpop.eup %3418 }
 0x1b0   :  { %v2188_v62 = vadd.f32 %v2187_v1, %v2186_v27  ;;  %3420 = vrcp.f32 %v851_v51  ;;  %v2196_v53 = vmul.f32 %v3419_v16, %v4318_v49  ;;  %v905_v52 = vand.u32 2147483648, %v851_v51 }
 0x1b1   :  { %v903_v13 = vand.u32 2147483647, %v851_v51  ;;  %vm899_vm14 = vweird.f32 %v851_v51  ;;  %vm2201_vm15 = vweird.f32 %v3419_v16 }
 0x1b2   :  { %v2189_v4 = vrot.slane %v2188_v62, 4  ;;  %v2197_v43 = vsub.f32 1.0, %v2196_v53  ;;  %v906_v33 = vor.u32 1.1754944e-38, %v905_v52  ;;  %vm2202_vm4 = vmor %vm2200_vm3, %vm2201_vm15 }
 0x1b3   :  { %vm904_vm2 = vcmp.eq.f32.partialorder %v903_v13, 8.507059e+37 }
 0x1b4   :  { %v2190_v59 = vadd.f32 %v2189_v4, %v2188_v62  ;;  %2567 = vadd.xlane.f32.xlu0 %v2566_v5  ;;  %v2198_v6 = vmul.f32 %v3419_v16, %v2197_v43  ;;  %v2255_v5 = vmul.f32 %v4183_v38, %v4345_v26 }
 0x1b6   :  { %v2191_v32 = vrot.slane %v2190_v59, 2  ;;  %v3421_v28 = vpop.eup %3420  ;;  %v2199_v29 = vadd.f32 %v3419_v16, %v2198_v6  ;;  %v2563_v43 = vsel %vm78_vm0, %v2255_v5, 0.0 }
 0x1b7   :  { %v895_v35 = vmul.f32 %v3421_v28, %v851_v51  ;;  %vm900_vm13 = vweird.f32 %v3421_v28 }
 0x1b8   :  { %v2192_v31 = vadd.f32 %v2191_v32, %v2190_v59  ;;  %vm901_vm1 = vmor %vm899_vm14, %vm900_vm13  ;;  %v2203_v34 = vsel %vm2202_vm4, %v3419_v16, %v2199_v29  ;;  %v2254_v59 = vmul.f32 %v4203_v15, %v4320_v47 }
 0x1b9   :  { %v896_v63 = vsub.f32 1.0, %v895_v35  ;;  %v2208_v27 = vsel %vm2205_vm5, %v2207_v58, %v2203_v34 }
 0x1ba   :  { %v2193_v2 = vrot.slane %v2192_v31, 1  ;;  %v2251_v49 = vmul.f32 %v4242_v9, %v2208_v27  ;;  %v2252_v50 = vmul.f32 %v4221_v12, %v2208_v27 }
 0x1bb   :  { %v897_v55 = vmul.f32 %v3421_v28, %v896_v63 }
 0x1bc   :  { %v2194_v30 = vadd.f32 %v2193_v2, %v2192_v31  ;;  %v2560_v31 = vsel %vm78_vm0, %v2254_v59, 0.0 }
 0x1bd   :  { %v898_v21 = vadd.f32 %v3421_v28, %v897_v55 }
 0x1be   :  { %3422 = vrcp.f32 %v2194_v30  ;;  %v2248_v51 = vand.u32 2147483648, %v2194_v30  ;;  %vm2242_vm7 = vweird.f32 %v2194_v30  ;;  %v2246_v9 = vand.u32 2147483647, %v2194_v30 }
 0x1bf   :  { %v902_v23 = vsel %vm901_vm1, %v3421_v28, %v898_v21 }
 0x1c0   :  { %v907_v42 = vsel %vm904_vm2, %v906_v33, %v902_v23  ;;  %v2249_v32 = vor.u32 1.1754944e-38, %v2248_v51  ;;  %vm2247_vm9 = vcmp.eq.f32.partialorder %v2246_v9, 8.507059e+37 }
 0x1c1   :  { %v915_v61 = vmul.f32 %v4309_v18, %v907_v42  ;;  %v914_v46 = vmul.f32 %v4294_v39, %v907_v42  ;;  %v2551_v18 = vsel %vm78_vm0, %v2251_v49, 0.0  ;;  %v2554_v39 = vsel %vm78_vm0, %v2252_v50, 0.0 }
 0x1c3   :  { %v1229_v1 = vsel %vm78_vm0, %v915_v61, 0.0  ;;  %v1226_v19 = vsel %vm78_vm0, %v914_v46, 0.0 }
 0x1c4   :  { %v3423_v36 = vpop.eup %3422  ;;  %1230 = vadd.xlane.f32.xlu1 %v1229_v1  ;;  %1227 = vadd.xlane.f32.xlu2 %v1226_v19 }
 0x1c5   :  { %v2238_v25 = vmul.f32 %v3423_v36, %v2194_v30  ;;  %vm2243_vm6 = vweird.f32 %v3423_v36 }
 0x1c6   :  { %vm2244_vm8 = vmor %vm2242_vm7, %vm2243_vm6 }
 0x1c7   :  { %v2239_v62 = vsub.f32 1.0, %v2238_v25 }
 0x1c8   :  { %v580_v47 = vpop.xlane.xlu0 %579 }
 0x1c9   :  { %v2240_v8 = vmul.f32 %v3423_v36, %v2239_v62  ;;  %v598_v35 = vsub.f32 %v4078_v20, %v580_v47 }
 0x1ca   :  { %v574_v4 = vpop.xlane.xlu1 %573 }
 0x1cb   :  { %v2241_v16 = vadd.f32 %v3423_v36, %v2240_v8  ;;  %v596_v53 = vsub.f32 %v4084_v24, %v574_v4  ;;  %v608_v63 = vmul.f32 1.442695, %v598_v35 }
 0x1cc   :  { %2552 = vadd.xlane.f32.xlu1 %v2551_v18  ;;  %2555 = vadd.xlane.f32.xlu2 %v2554_v39 }
 0x1cd   :  { %v2245_v12 = vsel %vm2244_vm8, %v3423_v36, %v2241_v16  ;;  %v604_v15 = vmul.f32 1.442695, %v596_v53 }
 0x1ce   :  { %v2250_v2 = vsel %vm2247_vm9, %v2249_v32, %v2245_v12 }
 0x1cf   :  { %v2257_v38 = vmul.f32 %v4341_v11, %v2250_v2  ;;  %v2258_v26 = vmul.f32 %v4337_v0, %v2250_v2  ;;  %3424 = vpow2.f32 %v604_v15 }
 0x1d0   :  { %3426 = vpow2.f32 %v608_v63 }
 0x1d1   :  { %v2569_v24 = vsel %vm78_vm0, %v2257_v38, 0.0  ;;  %v2572_v30 = vsel %vm78_vm0, %v2258_v26, 0.0 }
 0x1d2   :  { %v586_v28 = vpop.xlane.xlu1 %585 }
 0x1d3   :  { %v600_v55 = vsub.f32 %v4076_v45, %v586_v28 }
 0x1d4   :  { %2561 = vadd.xlane.f32.xlu1 %v2560_v31  ;;  %2564 = vadd.xlane.f32.xlu2 %v2563_v43 }
 0x1d5   :  { %v4376_v52 = vpop.eup %3424  ;;  %v612_v0 = vmul.f32 1.442695, %v600_v55 }
 0x1d6   :  { %v620_v11 = vsel %vm78_vm0, %v4376_v52, 0.0  ;;  %v4381_v13 = vpop.eup %3426  ;;  %vm921_vm11 = vweird.f32 %v4376_v52 }
 0x1d7   :  { %3428 = vpow2.f32 %v612_v0  ;;  %v626_v21 = vsel %vm78_vm0, %v4381_v13, 0.0  ;;  %v955_v9 = vand.u32 2147483648, %v4381_v13  ;;  %vm949_vm10 = vweird.f32 %v4381_v13 }
 0x1d8   :  { %3430 = vrcp.f32 %v4381_v13  ;;  %v953_v47 = vand.u32 2147483647, %v4381_v13 }
 0x1d9   :  { %v956_v26 = vor.u32 1.1754944e-38, %v955_v9 }
 0x1da   :  { %v583_v6 = vpop.xlane.xlu1 %582  ;;  %vm954_vm15 = vcmp.eq.f32.partialorder %v953_v47, 8.507059e+37 }
 0x1db   :  { %v599_v46 = vsub.f32 %v4095_v17, %v583_v6 }
 0x1dc   :  { %2570 = vadd.xlane.f32.xlu1 %v2569_v24  ;;  %2573 = vadd.xlane.f32.xlu2 %v2572_v30  ;;  %v925_v24 = vand.u32 2147483647, %v4376_v52 }
 0x1dd   :  { %v4388_v45 = vpop.eup %3428  ;;  %v610_v17 = vmul.f32 1.442695, %v599_v46 }
 0x1de   :  { %v632_v36 = vsel %vm78_vm0, %v4388_v45, 0.0  ;;  %v4396_v25 = vpop.eup %3430  ;;  %vm4480_vm2 = vcmp.eq.f32.partialorder %v925_v24, 8.507059e+37  ;;  %vm977_vm3 = vweird.f32 %v4388_v45 }
 0x1df   :  { %vm950_vm12 = vweird.f32 %v4396_v25 }
 0x1e0   :  { %vm4460_vm14 = vmor %vm949_vm10, %vm950_vm12 }
 0x1e2   :  { %v589_v20 = vpop.xlane.xlu1 %588 }
 0x1e3   :  { %v601_v33 = vsub.f32 %v4080_v22, %v589_v20  ;;  %v1923_v22 = vpop.xlane.xlu0 %1922 }
 0x1e4   :  { %621 = vadd.xlane.f32.xlu2 %v620_v11  ;;  %v1941_v27 = vsub.f32 %v4108_v44, %v1923_v22 }
 0x1e5   :  { %v614_v37 = vmul.f32 1.442695, %v601_v33 }
 0x1e6   :  { %v1951_v50 = vmul.f32 1.442695, %v1941_v27 }
 0x1eb   :  { %v1932_v2 = vpop.xlane.xlu0 %1931 }
 0x1ec   :  { %627 = vadd.xlane.f32.xlu2 %v626_v21  ;;  %v1944_v63 = vsub.f32 %v4110_v7, %v1932_v2  ;;  %v927_v7 = vand.u32 2147483648, %v4376_v52 }
 0x1f0   :  { %v592_v29 = vpop.xlane.xlu2 %591 }
 0x1f1   :  { %v602_v3 = vsub.f32 %v4173_v48, %v592_v29 }
 0x1f3   :  { %v616_v23 = vmul.f32 1.442695, %v602_v3 }
 0x1f4   :  { %633 = vadd.xlane.f32.xlu2 %v632_v36 }
 0x1f5   :  { %3432 = vpow2.f32 %v616_v23  ;;  %v1957_v23 = vmul.f32 1.442695, %v1944_v63 }
 0x1f6   :  { %3434 = vrcp.f32 %v4376_v52 }
 0x1f7   :  { %3436 = vpow2.f32 %v614_v37 }
 0x1f8   :  { %v577_v42 = vpop.xlane.xlu2 %576  ;;  %v595_v61 = vpop.xlane.xlu1 %594  ;;  %3438 = vrcp.f32 %v4388_v45 }
 0x1f9   :  { %v597_v48 = vsub.f32 %v4097_v41, %v577_v42  ;;  %v603_v34 = vsub.f32 %v4193_v54, %v595_v61  ;;  %v945_v41 = vmul.f32 %v4396_v25, %v4381_v13  ;;  %v983_v61 = vand.u32 2147483648, %v4388_v45 }
 0x1fb   :  { %v4398_v58 = vpop.eup %3432  ;;  %v606_v1 = vmul.f32 1.442695, %v597_v48  ;;  %v618_v19 = vmul.f32 1.442695, %v603_v34  ;;  %v946_v4 = vsub.f32 1.0, %v945_v41 }
 0x1fc   :  { %v638_v62 = vsel %vm78_vm0, %v4398_v58, 0.0  ;;  %v4404_v49 = vpop.eup %3434 }
 0x1fd   :  { %3440 = vpow2.f32 %v606_v1  ;;  %639 = vadd.xlane.f32.xlu0 %v638_v62  ;;  %v4408_v54 = vpop.eup %3436  ;;  %v917_v18 = vmul.f32 %v4404_v49, %v4376_v52  ;;  %v947_v32 = vmul.f32 %v4396_v25, %v946_v4  ;;  %vm922_vm13 = vweird.f32 %v4404_v49 }
 0x1fe   :  { %3442 = vpow2.f32 %v618_v19  ;;  %v4413_v39 = vpop.eup %3438  ;;  %vm4476_vm1 = vmor %vm921_vm11, %vm922_vm13  ;;  %v928_v1 = vor.u32 1.1754944e-38, %v927_v7  ;;  %vm991_vm8 = vweird.f32 %v4408_v54  ;;  %vm1005_vm11 = vweird.f32 %v4398_v58 }
 0x1ff   :  { %3444 = vpow2.f32 %v610_v17  ;;  %v918_v12 = vsub.f32 1.0, %v917_v18  ;;  %v973_v31 = vmul.f32 %v4413_v39, %v4388_v45  ;;  %v948_v6 = vadd.f32 %v4396_v25, %v947_v32 }
 0x200   :  { %v1917_v8 = vpop.xlane.xlu1 %1916  ;;  %3446 = vrcp.f32 %v4408_v54  ;;  %v1929_v53 = vpop.xlane.xlu2 %1928  ;;  %vm978_vm4 = vweird.f32 %v4413_v39  ;;  %v984_v18 = vor.u32 1.1754944e-38, %v983_v61 }
 0x201   :  { %v1939_v44 = vsub.f32 %v4123_v57, %v1917_v8  ;;  %3448 = vpow2.f32 %v1951_v50  ;;  %v919_v35 = vmul.f32 %v4404_v49, %v918_v12  ;;  %v974_v55 = vsub.f32 1.0, %v973_v31  ;;  %vm4521_vm5 = vmor %vm977_vm3, %vm978_vm4 }
 0x202   :  { %v1943_v11 = vsub.f32 %v4105_v60, %v1929_v53  ;;  %v952_v37 = vsel %vm4460_vm14, %v4396_v25, %v948_v6  ;;  %v981_v8 = vand.u32 2147483647, %v4388_v45 }
 0x203   :  { %v4416_v16 = vpop.eup %3440  ;;  %v1947_v51 = vmul.f32 1.442695, %v1939_v44  ;;  %v920_v3 = vadd.f32 %v4404_v49, %v919_v35  ;;  %v975_v36 = vmul.f32 %v4413_v39, %v974_v55  ;;  %v4487_v62 = vsel %vm954_vm15, %v956_v26, %v952_v37 }
 0x204   :  { %v4418_v59 = vpop.eup %3442  ;;  %v623_v5 = vsel %vm78_vm0, %v4416_v16, 0.0  ;;  %v1955_v42 = vmul.f32 1.442695, %v1943_v11  ;;  %vm982_vm7 = vcmp.eq.f32.partialorder %v981_v8, 8.507059e+37  ;;  %v995_v55 = vand.u32 2147483647, %v4408_v54 }
 0x205   :  { %624 = vadd.xlane.f32.xlu1 %v623_v5  ;;  %v641_v57 = vsel %vm78_vm0, %v4418_v59, 0.0  ;;  %3450 = vpow2.f32 %v1947_v51  ;;  %v4428_v43 = vpop.eup %3444  ;;  %v924_v17 = vsel %vm4476_vm1, %v4404_v49, %v920_v3  ;;  %v976_v50 = vadd.f32 %v4413_v39, %v975_v36 }
 0x206   :  { %642 = vadd.xlane.f32.xlu2 %v641_v57  ;;  %v4430_v28 = vpop.eup %3446  ;;  %3452 = vrcp.f32 %v4428_v43  ;;  %v629_v21 = vsel %vm78_vm0, %v4428_v43, 0.0  ;;  %v635_v49 = vsel %vm78_vm0, %v4408_v54, 0.0  ;;  %v1034_v5 = vsel %vm78_vm0, %v4487_v62, 0.0 }
 0x207   :  { %v4438_v30 = vpop.eup %3448  ;;  %3454 = vrcp.f32 %v4398_v58  ;;  %v4509_v57 = vsel %vm4480_vm2, %v928_v1, %v924_v17  ;;  %v969_v31 = vand.u32 2147483648, %v4428_v43  ;;  %vm992_vm6 = vweird.f32 %v4430_v28 }
 0x208   :  { %v1935_v15 = vpop.xlane.xlu1 %1934  ;;  %v1969_v29 = vsel %vm78_vm0, %v4438_v30, 0.0  ;;  %3456 = vrcp.f32 %v4416_v16  ;;  %v1920_v22 = vpop.xlane.xlu2 %1919  ;;  %vm4556_vm9 = vmor %vm991_vm8, %vm992_vm6  ;;  %vm996_vm10 = vcmp.eq.f32.partialorder %v995_v55, 8.507059e+37  ;;  %vm935_vm14 = vweird.f32 %v4416_v16 }
 0x209   :  { %v1945_v38 = vsub.f32 %v4229_v56, %v1935_v15  ;;  %v987_v56 = vmul.f32 %v4430_v28, %v4408_v54  ;;  %v1940_v12 = vsub.f32 %v4129_v10, %v1920_v22  ;;  %v980_v10 = vsel %vm4521_vm5, %v4413_v39, %v976_v50 }
 0x20a   :  { %v997_v39 = vand.u32 2147483648, %v4408_v54  ;;  %v4546_v6 = vsel %vm982_vm7, %v984_v18, %v980_v10  ;;  %v4568_v36 = vor.u32 1.1754944e-38, %v969_v31  ;;  %v1009_v18 = vand.u32 2147483647, %v4398_v58 }
 0x20b   :  { %v1959_v0 = vmul.f32 1.442695, %v1945_v38  ;;  %v4447_v20 = vpop.eup %3450  ;;  %v988_v46 = vsub.f32 1.0, %v987_v56  ;;  %v1949_v63 = vmul.f32 1.442695, %v1940_v12  ;;  %v1028_v56 = vsel %vm78_vm0, %v4509_v57, 0.0 }
 0x20c   :  { %v1963_v60 = vsel %vm78_vm0, %v4447_v20, 0.0  ;;  %v4484_v19 = vpop.eup %3452  ;;  %v1040_v61 = vsel %vm78_vm0, %v4546_v6, 0.0  ;;  %vm963_vm2 = vweird.f32 %v4428_v43  ;;  %vm2264_vm5 = vweird.f32 %v4447_v20 }
 0x20d   :  { %630 = vadd.xlane.f32.xlu1 %v629_v21  ;;  %3458 = vpow2.f32 %v1959_v0  ;;  %1964 = vadd.xlane.f32.xlu0 %v1963_v60  ;;  %v4493_v41 = vpop.eup %3454  ;;  %v989_v4 = vmul.f32 %v4430_v28, %v988_v46  ;;  %v959_v35 = vmul.f32 %v4484_v19, %v4428_v43  ;;  %v998_v46 = vor.u32 1.1754944e-38, %v997_v39 }
 0x20e   :  { %1970 = vadd.xlane.f32.xlu2 %v1969_v29  ;;  %3460 = vrcp.f32 %v4447_v20  ;;  %v4498_v44 = vpop.eup %3456  ;;  %v1001_v15 = vmul.f32 %v4493_v41, %v4398_v58  ;;  %v967_v29 = vand.u32 2147483647, %v4428_v43  ;;  %vm1006_vm12 = vweird.f32 %v4493_v41 }
 0x20f   :  { %3462 = vpow2.f32 %v1957_v23  ;;  %v931_v2 = vmul.f32 %v4498_v44, %v4416_v16  ;;  %v990_v47 = vadd.f32 %v4430_v28, %v989_v4  ;;  %v960_v22 = vsub.f32 1.0, %v959_v35  ;;  %vm4621_vm3 = vmor %vm1005_vm11, %vm1006_vm12 }
 0x210   :  { %v1926_v48 = vpop.xlane.xlu1 %1925  ;;  %3464 = vpow2.f32 %v1955_v42  ;;  %v1938_v0 = vpop.xlane.xlu2 %1937  ;;  %v1002_v60 = vsub.f32 1.0, %v1001_v15  ;;  %vm964_vm13 = vweird.f32 %v4484_v19  ;;  %vm936_vm15 = vweird.f32 %v4498_v44 }
 0x211   :  { %v1942_v27 = vsub.f32 %v4125_v14, %v1926_v48  ;;  %3466 = vrcp.f32 %v4438_v30  ;;  %v932_v7 = vsub.f32 1.0, %v931_v2  ;;  %v994_v23 = vsel %vm4556_vm9, %v4430_v28, %v990_v47  ;;  %vm4632_vm4 = vmor %vm935_vm14, %vm936_vm15 }
 0x212   :  { %3468 = vrcp.f32 %v4418_v59  ;;  %v1946_v34 = vsub.f32 %v4245_v40, %v1938_v0  ;;  %v1011_v28 = vand.u32 2147483648, %v4398_v58  ;;  %v4579_v25 = vsel %vm996_vm10, %v998_v46, %v994_v23  ;;  %vm4697_vm15 = vmor %vm963_vm2, %vm964_vm13 }
 0x213   :  { %v1953_v14 = vmul.f32 1.442695, %v1942_v27  ;;  %v4501_v51 = vpop.eup %3458  ;;  %v933_v1 = vmul.f32 %v4498_v44, %v932_v7  ;;  %v1003_v27 = vmul.f32 %v4493_v41, %v1002_v60  ;;  %v961_v4 = vmul.f32 %v4484_v19, %v960_v22 }
 0x214   :  { %v4512_v9 = vpop.eup %3460  ;;  %v1981_v53 = vsel %vm78_vm0, %v4501_v51, 0.0  ;;  %v1012_v12 = vor.u32 1.1754944e-38, %v1011_v28  ;;  %v939_v35 = vand.u32 2147483647, %v4416_v16  ;;  %v2270_v0 = vand.u32 2147483648, %v4447_v20 }
 0x215   :  { %636 = vadd.xlane.f32.xlu1 %v635_v49  ;;  %3470 = vpow2.f32 %v1953_v14  ;;  %1982 = vadd.xlane.f32.xlu0 %v1981_v53  ;;  %v2260_v38 = vmul.f32 %v4512_v9, %v4447_v20  ;;  %v4539_v26 = vpop.eup %3462  ;;  %v1318_v14 = vlaneseq  ;;  %v1961_v49 = vmul.f32 1.442695, %v1946_v34 }
 0x216   :  { %1035 = vadd.xlane.f32.xlu2 %v1034_v5  ;;  %3472 = vrcp.f32 %v4501_v51  ;;  %v4544_v24 = vpop.eup %3464  ;;  %v1978_v3 = vsel %vm78_vm0, %v4539_v26, 0.0  ;;  %v1043_v5 = vsel %vm78_vm0, %v4579_v25, 0.0  ;;  %v934_v32 = vadd.f32 %v4498_v44, %v933_v1 }
 0x217   :  { %v4550_v11 = vpop.eup %3466  ;;  %v2261_v37 = vsub.f32 1.0, %v2260_v38  ;;  %3474 = vrcp.f32 %v4544_v24  ;;  %v1004_v31 = vadd.f32 %v4493_v41, %v1003_v27  ;;  %vm2265_vm1 = vweird.f32 %v4512_v9 }
 0x218   :  { %v4561_v33 = vpop.eup %3468  ;;  %3476 = vpow2.f32 %v1949_v63  ;;  %v4591_v8 = vmul.f32 %v4550_v11, %v4438_v30  ;;  %v1975_v39 = vsel %vm78_vm0, %v4544_v24, 0.0  ;;  %v941_v63 = vand.u32 2147483648, %v4416_v16  ;;  %vm4646_vm6 = vmor %vm2264_vm5, %vm2265_vm1  ;;  %v4670_v27 = vpop.xlane.xlu2 %1209 }
 0x219   :  { %v2262_v17 = vmul.f32 %v4512_v9, %v2261_v37  ;;  %v1015_v50 = vmul.f32 %v4561_v33, %v4418_v59  ;;  %v2268_v7 = vand.u32 2147483647, %v4447_v20  ;;  %v938_v60 = vsel %vm4632_vm4, %v4498_v44, %v934_v32  ;;  %6959 = vst [vmem:[#allocation2_spill] sm:$0xff] %v4670_v27  ;;  %v4686_v32 = vpop.xlane.xlu0 %1215 }
 0x21a   :  { %v942_v22 = vor.u32 1.1754944e-38, %v941_v63  ;;  %vm1010_vm7 = vcmp.eq.f32.partialorder %v1009_v18, 8.507059e+37  ;;  %v2271_v34 = vor.u32 1.1754944e-38, %v2270_v0  ;;  %v962_v28 = vadd.f32 %v4484_v19, %v961_v4  ;;  %6962 = vst [vmem:[#allocation5_spill] sm:$0xff] %v4686_v32 }
 0x21b   :  { %v4570_v42 = vpop.eup %3470  ;;  %v2263_v2 = vadd.f32 %v4512_v9, %v2262_v17  ;;  %v1016_v15 = vsub.f32 1.0, %v1015_v50  ;;  %vm4663_vm8 = vcmp.eq.f32.partialorder %v967_v29, 8.507059e+37  ;;  %vm940_vm9 = vcmp.eq.f32.partialorder %v939_v35, 8.507059e+37  ;;  %v4672_v17 = vpop.xlane.xlu1 %1212 }
 0x21c   :  { %v4575_v48 = vpop.eup %3472  ;;  %3478 = vrcp.f32 %v4570_v42  ;;  %vm2269_vm10 = vcmp.eq.f32.partialorder %v2268_v7, 8.507059e+37  ;;  %vm1019_vm11 = vweird.f32 %v4418_v59  ;;  %6960 = vst [vmem:[#allocation3_spill] sm:$0xff] %v4672_v17  ;;  %v4674_v50 = vsel %vm940_vm9, %v942_v22, %v938_v60 }
 0x21d   :  { %1029 = vadd.xlane.f32.xlu1 %v1028_v56  ;;  %1041 = vadd.xlane.f32.xlu0 %v1040_v61  ;;  %v2344_v40 = vmul.f32 %v4575_v48, %v4501_v51  ;;  %v4600_v53 = vpop.eup %3474  ;;  %3480 = vpow2.f32 %v1961_v49  ;;  %v1972_v56 = vsel %vm78_vm0, %v4570_v42, 0.0  ;;  %v2267_v61 = vsel %vm4646_vm6, %v4512_v9, %v2263_v2 }
 0x21e   :  { %1979 = vadd.xlane.f32.xlu2 %v1978_v3  ;;  %v4606_v10 = vpop.eup %3476  ;;  %v1008_v3 = vsel %vm4621_vm3, %v4493_v41, %v1004_v31  ;;  %v2316_v37 = vmul.f32 %v4600_v53, %v4544_v24  ;;  %v1017_v44 = vmul.f32 %v4561_v33, %v1016_v15  ;;  %vm1020_vm12 = vweird.f32 %v4561_v33 }
 0x21f   :  { %v2345_v47 = vsub.f32 1.0, %v2344_v40  ;;  %3482 = vrcp.f32 %v4606_v10  ;;  %v4667_v9 = vsel %vm1010_vm7, %v1012_v12, %v1008_v3  ;;  %v4676_v40 = vsel %vm2269_vm10, %v2271_v34, %v2267_v61  ;;  %vm4709_vm1 = vmor %vm1019_vm11, %vm1020_vm12 }
 0x220   :  { %v2317_v29 = vsub.f32 1.0, %v2316_v37  ;;  %v1018_v4 = vadd.f32 %v4561_v33, %v1017_v44  ;;  %vm2349_vm14 = vweird.f32 %v4575_v48  ;;  %v1046_v31 = vsel %vm78_vm0, %v4667_v9, 0.0  ;;  %v4759_v1 = vpop.xlane.xlu2 %1218 }
 0x221   :  { %v2346_v46 = vmul.f32 %v4575_v48, %v2345_v47  ;;  %v1023_v2 = vand.u32 2147483647, %v4418_v59  ;;  %v1025_v15 = vand.u32 2147483648, %v4418_v59  ;;  %v2354_v47 = vand.u32 2147483648, %v4501_v51  ;;  %6971 = vst [vmem:[#allocation8_spill] sm:$0xff] %v4759_v1 }
 0x222   :  { %v4611_v38 = vpop.eup %3478  ;;  %v1031_v35 = vsel %vm78_vm0, %v4674_v50, 0.0  ;;  %v2371_v63 = vsel %vm78_vm0, %v4676_v40, 0.0  ;;  %vm2348_vm13 = vweird.f32 %v4501_v51  ;;  %v2352_v0 = vand.u32 2147483647, %v4501_v51 }
 0x223   :  { %v2302_v41 = vmul.f32 %v4611_v38, %v4570_v42  ;;  %v4679_v18 = vpop.eup %3480  ;;  %v2347_v49 = vadd.f32 %v4575_v48, %v2346_v46  ;;  %vm4720_vm2 = vmor %vm2348_vm13, %vm2349_vm14  ;;  %v2318_v7 = vmul.f32 %v4600_v53, %v2317_v29  ;;  %v966_v60 = vsel %vm4697_vm15, %v4484_v19, %v962_v28 }
 0x224   :  { %6961 = vst [vmem:[#allocation4_spill] sm:$0xff] %v4679_v18  ;;  %3484 = vrcp.f32 %v4679_v18  ;;  %v1026_v61 = vor.u32 1.1754944e-38, %v1025_v15  ;;  %v2355_v44 = vor.u32 1.1754944e-38, %v2354_v47  ;;  %v2289_v46 = vsub.f32 1.0, %v4591_v8 }
 0x225   :  { %1976 = vadd.xlane.f32.xlu1 %v1975_v39  ;;  %1973 = vadd.xlane.f32.xlu0 %v1972_v56  ;;  %v4684_v12 = vpop.eup %3482  ;;  %v4716_v56 = vand.u32 127, %v1318_v14  ;;  %v1022_v14 = vsel %vm4709_vm1, %v4561_v33, %v1018_v4  ;;  %v2351_v3 = vsel %vm4720_vm2, %v4575_v48, %v2347_v49  ;;  %3486 = vrcp.f32 %v4539_v26 }
 0x226   :  { %1044 = vadd.xlane.f32.xlu2 %v1043_v5  ;;  %v2303_v5 = vsub.f32 1.0, %v2302_v41  ;;  %v2274_v37 = vmul.f32 %v4684_v12, %v4606_v10  ;;  %vm1024_vm3 = vcmp.eq.f32.partialorder %v1023_v2, 8.507059e+37  ;;  %vm2353_vm4 = vcmp.eq.f32.partialorder %v2352_v0, 8.507059e+37 }
 0x227   :  { %6967 = vst [vmem:[#allocation6_spill] sm:$0xff] %v4716_v56  ;;  %v4741_v19 = vadd.s32 4294967288, %v4716_v56  ;;  %v4746_v33 = vsel %vm4663_vm8, %v4568_v36, %v966_v60  ;;  %v4748_v48 = vsel %vm1024_vm3, %v1026_v61, %v1022_v14  ;;  %v4750_v41 = vsel %vm2353_vm4, %v2355_v44, %v2351_v3  ;;  %v4761_v36 = vpop.xlane.xlu1 %1221 }
 0x228   :  { %v2304_v23 = vmul.f32 %v4611_v38, %v2303_v5  ;;  %v2319_v22 = vadd.f32 %v4600_v53, %v2318_v7  ;;  %vm2321_vm5 = vweird.f32 %v4600_v53  ;;  %vm2320_vm6 = vweird.f32 %v4544_v24  ;;  %6972 = vst [vmem:[#allocation9_spill] sm:$0xff] %v4761_v36 }
 0x229   :  { %6970 = vst [vmem:[#allocation7_spill] sm:$0xff] %v4741_v19  ;;  %vm2307_vm7 = vweird.f32 %v4611_v38  ;;  %v2275_v34 = vsub.f32 1.0, %v2274_v37  ;;  %v1966_v29 = vsel %vm78_vm0, %v4606_v10, 0.0  ;;  %v2324_v4 = vand.u32 2147483647, %v4544_v24  ;;  %vm4774_vm8 = vmor %vm2320_vm6, %vm2321_vm5 }
 0x22a   :  { %v2305_v8 = vadd.f32 %v4611_v38, %v2304_v23  ;;  %v4757_v28 = vpop.eup %3484  ;;  %v2326_v49 = vand.u32 2147483648, %v4544_v24  ;;  %v2312_v5 = vand.u32 2147483648, %v4570_v42  ;;  %v2389_v2 = vsel %vm78_vm0, %v4750_v41, 0.0 }
 0x22b   :  { %vm2306_vm9 = vweird.f32 %v4570_v42  ;;  %v2310_v47 = vand.u32 2147483647, %v4570_v42  ;;  %v4780_v39 = vpop.eup %3486  ;;  %vm6906_vm10 = vcmask 130112   ;;  %v1037_v55 = vsel %vm78_vm0, %v4746_v33, 0.0 }
 0x22c   :  { %vm4791_vm11 = vmor %vm2306_vm9, %vm2307_vm7  ;;  %v2290_v21 = vmul.f32 %v4550_v11, %v2289_v46  ;;  %v1326_v7 = vperm.slane %v4759_v1, %v4741_v19  ;;  %v2358_v14 = vmul.f32 %v4757_v28, %v4679_v18  ;;  %v1320_v3 = vperm.slane %v4670_v27, %v4716_v56 }
 0x22d   :  { %1047 = vadd.xlane.f32.xlu1 %v1046_v31  ;;  %1032 = vadd.xlane.f32.xlu0 %v1031_v35  ;;  %v1049_v31 = vsel %vm78_vm0, %v4748_v48, 0.0  ;;  %v4782_v35 = vpop.xlane.xlu0 %1224  ;;  %v2309_v60 = vsel %vm4791_vm11, %v4611_v38, %v2305_v8  ;;  %v1322_v23 = vperm.slane %v4672_v17, %v4741_v19  ;;  %v2327_v37 = vor.u32 1.1754944e-38, %v2326_v49 }
 0x22e   :  { %2372 = vadd.xlane.f32.xlu2 %v2371_v63  ;;  %6975 = vst [vmem:[#allocation10_spill] sm:$0xff] %v4782_v35  ;;  %v2323_v63 = vsel %vm4774_vm8, %v4600_v53, %v2319_v22  ;;  %v2276_v53 = vmul.f32 %v4684_v12, %v2275_v34  ;;  %v2313_v61 = vor.u32 1.1754944e-38, %v2312_v5  ;;  %v1325_v44 = vperm.slane %v4686_v32, %v4716_v56 }
 0x22f   :  { %v1329_v46 = vperm.slane %v4782_v35, %v4741_v19  ;;  %vm2325_vm12 = vcmp.eq.f32.partialorder %v2324_v4, 8.507059e+37  ;;  %vm2311_vm14 = vcmp.eq.f32.partialorder %v2310_v47, 8.507059e+37  ;;  %v1328_v38 = vperm.slane %v4761_v36, %v4716_v56 }
 0x230   :  { %v4814_v22 = vsel %vm2325_vm12, %v2327_v37, %v2323_v63  ;;  %v4816_v8 = vsel %vm2311_vm14, %v2313_v61, %v2309_v60  ;;  %vm1272_vm15 = vcmask 1041409   ;;  %v1327_v34 = vsel %vm6906_vm10, %v1326_v7, %v1325_v44 }
 0x231   :  { %6978 = vst [vmem:[#allocation11_spill] sm:$0xff] %v4814_v22  ;;  %vm2279_vm1 = vweird.f32 %v4684_v12  ;;  %v2359_v49 = vsub.f32 1.0, %v2358_v14  ;;  %v1324_v5 = vsel %vm6906_vm10, %v1322_v23, %v1320_v3  ;;  %vm2278_vm13 = vweird.f32 %v4606_v10 }
 0x232   :  { %v2284_v15 = vand.u32 2147483648, %v4606_v10  ;;  %v2383_v0 = vsel %vm78_vm0, %v4814_v22, 0.0  ;;  %v2380_v7 = vsel %vm78_vm0, %v4816_v8, 0.0  ;;  %vm2280_vm2 = vmor %vm2278_vm13, %vm2279_vm1  ;;  %vm1274_vm3 = vcmask 1042434  }
 0x233   :  { %v1330_v60 = vsel %vm6906_vm10, %v1329_v46, %v1328_v38  ;;  %v2330_v14 = vmul.f32 %v4780_v39, %v4539_v26  ;;  %vm1276_vm4 = vcmask 1043459   ;;  %v2360_v23 = vmul.f32 %v4757_v28, %v2359_v49 }
 0x234   :  { %v2285_v37 = vor.u32 1.1754944e-38, %v2284_v15  ;;  %v2291_v44 = vadd.f32 %v4550_v11, %v2290_v21  ;;  %vm2293_vm6 = vweird.f32 %v4550_v11  ;;  %vm1279_vm7 = vcmask 125952  }
 0x235   :  { %1967 = vadd.xlane.f32.xlu1 %v1966_v29  ;;  %1050 = vadd.xlane.f32.xlu0 %v1049_v31  ;;  %v2277_v29 = vadd.f32 %v4684_v12, %v2276_v53  ;;  %v1334_v53 = vsel %vm1272_vm15, %v1327_v34, %v1324_v5  ;;  %v2331_v34 = vsub.f32 1.0, %v2330_v14  ;;  %vm2363_vm8 = vweird.f32 %v4757_v28 }
 0x236   :  { %2390 = vadd.xlane.f32.xlu2 %v2389_v2  ;;  %v2282_v2 = vand.u32 2147483647, %v4606_v10  ;;  %v1335_v61 = vsel %vm1274_vm3, %v1330_v60, %v1334_v53  ;;  %v1984_v21 = vsel %vm78_vm0, %v4679_v18, 0.0  ;;  %vm2292_vm9 = vweird.f32 %v4438_v30 }
 0x237   :  { %v4822_v31 = vpop.xlane.xlu1 %1230  ;;  %v4824_v4 = vpop.xlane.xlu2 %1227  ;;  %v2281_v3 = vsel %vm2280_vm2, %v4684_v12, %v2277_v29  ;;  %v2361_v12 = vadd.f32 %v4757_v28, %v2360_v23  ;;  %v2298_v29 = vand.u32 2147483648, %v4438_v30  ;;  %v2296_v15 = vand.u32 2147483647, %v4438_v30  ;;  %vm2294_vm12 = vmor %vm2292_vm9, %vm2293_vm6 }
 0x238   :  { %6979 = vst [vmem:[#allocation12_spill] sm:$0xff] %v4822_v31  ;;  %v1332_v47 = vperm.slane %v4822_v31, %v4741_v19  ;;  %v1331_v63 = vperm.slane %v4824_v4, %v4716_v56  ;;  %vm2283_vm5 = vcmp.eq.f32.partialorder %v2282_v2, 8.507059e+37  ;;  %v2368_v2 = vand.u32 2147483648, %v4679_v18 }
 0x239   :  { %6980 = vst [vmem:[#allocation13_spill] sm:$0xff] %v4824_v4  ;;  %v4849_v46 = vsel %vm2283_vm5, %v2285_v37, %v2281_v3  ;;  %vm2362_vm11 = vweird.f32 %v4679_v18  ;;  %v2295_v60 = vsel %vm2294_vm12, %v4550_v11, %v2291_v44  ;;  %v2332_v53 = vmul.f32 %v4780_v39, %v2331_v34 }
 0x23a   :  { %6981 = vst [vmem:[#allocation14_spill] sm:$0xff] %v4849_v46  ;;  %vm2364_vm14 = vmor %vm2362_vm11, %vm2363_vm8  ;;  %v2299_v3 = vor.u32 1.1754944e-38, %v2298_v29  ;;  %vm2297_vm1 = vcmp.eq.f32.partialorder %v2296_v15, 8.507059e+37  ;;  %vm2335_vm2 = vweird.f32 %v4780_v39  ;;  %vm2334_vm5 = vweird.f32 %v4539_v26 }
 0x23b   :  { %v2365_v14 = vsel %vm2364_vm14, %v4757_v28, %v2361_v12  ;;  %v2338_v44 = vand.u32 2147483647, %v4539_v26  ;;  %vm2336_vm6 = vmor %vm2334_vm5, %vm2335_vm2 }
 0x23c   :  { %v4878_v23 = vsel %vm2297_vm1, %v2299_v3, %v2295_v60 }
 0x23d   :  { %1038 = vadd.xlane.f32.xlu1 %v1037_v55  ;;  %2384 = vadd.xlane.f32.xlu0 %v2383_v0  ;;  %v1333_v55 = vsel %vm6906_vm10, %v1332_v47, %v1331_v63  ;;  %v2374_v47 = vsel %vm78_vm0, %v4849_v46, 0.0  ;;  %v2366_v0 = vand.u32 2147483647, %v4679_v18  ;;  %6985 = vst [vmem:[#allocation18_spill] sm:$0xff] %v4878_v23  ;;  %v2377_v28 = vsel %vm78_vm0, %v4878_v23, 0.0 }
 0x23e   :  { %2381 = vadd.xlane.f32.xlu2 %v2380_v7  ;;  %v1336_v38 = vsel %vm1276_vm4, %v1333_v55, %v1335_v61  ;;  %v4871_v7 = vpop.xlane.xlu0 %2558  ;;  %v2369_v55 = vor.u32 1.1754944e-38, %v2368_v2  ;;  %v2333_v61 = vadd.f32 %v4780_v39, %v2332_v53  ;;  %vm2339_vm8 = vcmp.eq.f32.partialorder %v2338_v44, 8.507059e+37 }
 0x23f   :  { %v4855_v49 = vpop.xlane.xlu1 %2552  ;;  %v4857_v5 = vpop.xlane.xlu2 %2555  ;;  %v1338_v63 = vsel %vm1279_vm7, %v1336_v38, 0.0  ;;  %6984 = vst [vmem:[#allocation17_spill] sm:$0xff] %v4871_v7  ;;  %vm2367_vm13 = vcmp.eq.f32.partialorder %v2366_v0, 8.507059e+37  ;;  %v2340_v38 = vand.u32 2147483648, %v4539_v26  ;;  %v2660_v15 = vperm.slane %v4871_v7, %v4716_v56 }
 0x240   :  { %6982 = vst [vmem:[#allocation15_spill] sm:$0xff] %v4855_v49  ;;  %v4880_v37 = vsel %vm2367_vm13, %v2369_v55, %v2365_v14  ;;  %v2337_v29 = vsel %vm2336_vm6, %v4780_v39, %v2333_v61  ;;  %v2658_v0 = vperm.slane %v4857_v5, %v4741_v19 }
 0x241   :  { %6983 = vst [vmem:[#allocation16_spill] sm:$0xff] %v4857_v5  ;;  %v2392_v34 = vsel %vm78_vm0, %v4880_v37, 0.0  ;;  %v2341_v2 = vor.u32 1.1754944e-38, %v2340_v38 }
 0x242   :  { %6986 = vst [vmem:[#allocation19_spill] sm:$0xff] %v4880_v37 }
 0x243   :  { %v4908_v53 = vsel %vm2339_vm8, %v2341_v2, %v2337_v29 }
 0x244   :  { %6990 = vst [vmem:[#allocation23_spill] sm:$0xff] %v4908_v53  ;;  %v2386_v38 = vsel %vm78_vm0, %v4908_v53, 0.0 }
 0x245   :  { %1985 = vadd.xlane.f32.xlu1 %v1984_v21  ;;  %2375 = vadd.xlane.f32.xlu0 %v2374_v47 }
 0x246   :  { %1339 = vadd.xlane.f32.xlu2 %v1338_v63  ;;  %v4900_v47 = vpop.xlane.xlu0 %2567  ;;  %v2657_v63 = vperm.slane %v4855_v49, %v4716_v56 }
 0x247   :  { %v4885_v21 = vpop.xlane.xlu1 %2561  ;;  %v4887_v11 = vpop.xlane.xlu2 %2564  ;;  %6989 = vst [vmem:[#allocation22_spill] sm:$0xff] %v4900_v47  ;;  %v2664_v14 = vperm.slane %v4900_v47, %v4741_v19 }
 0x248   :  { %6987 = vst [vmem:[#allocation20_spill] sm:$0xff] %v4885_v21  ;;  %v2661_v12 = vperm.slane %v4885_v21, %v4741_v19  ;;  %v2663_v60 = vperm.slane %v4887_v11, %v4716_v56  ;;  %v2659_v3 = vsel %vm6906_vm10, %v2658_v0, %v2657_v63 }
 0x249   :  { %6988 = vst [vmem:[#allocation21_spill] sm:$0xff] %v4887_v11 }
 0x24a   :  { %v2662_v39 = vsel %vm6906_vm10, %v2661_v12, %v2660_v15 }
 0x24b   :  { %v2669_v12 = vsel %vm1272_vm15, %v2662_v39, %v2659_v3 }
 0x24d   :  { %2378 = vadd.xlane.f32.xlu1 %v2377_v28  ;;  %2393 = vadd.xlane.f32.xlu0 %v2392_v34  ;;  %v2665_v34 = vsel %vm6906_vm10, %v2664_v14, %v2663_v60 }
 0x24e   :  { %v2670_v2 = vsel %vm1274_vm3, %v2665_v34, %v2669_v12 }
 0x24f   :  { %v4914_v55 = vpop.xlane.xlu1 %2570  ;;  %v4916_v61 = vpop.xlane.xlu2 %2573 }
 0x250   :  { %6991 = vst [vmem:[#allocation24_spill] sm:$0xff] %v4914_v55  ;;  %v2666_v28 = vperm.slane %v4914_v55, %v4716_v56  ;;  %v2667_v44 = vperm.slane %v4916_v61, %v4741_v19 }
 0x251   :  { %6992 = vst [vmem:[#allocation25_spill] sm:$0xff] %v4916_v61 }
 0x252   :  { %v2668_v29 = vsel %vm6906_vm10, %v2667_v44, %v2666_v28 }
 0x253   :  { %v2671_v15 = vsel %vm1276_vm4, %v2668_v29, %v2670_v2 }
 0x254   :  { %v2673_v0 = vsel %vm1279_vm7, %v2671_v15, 0.0 }
 0x255   :  { %2387 = vadd.xlane.f32.xlu1 %v2386_v38 }
 0x257   :  { %v622_v63 = vpop.xlane.xlu2 %621 }
 0x258   :  { %3488 = vrcp.f32 %v622_v63  ;;  %vm649_vm9 = vweird.f32 %v622_v63  ;;  %v655_v47 = vand.u32 2147483648, %v622_v63 }
 0x25d   :  { %2674 = vadd.xlane.f32.xlu1 %v2673_v0 }
 0x25e   :  { %v3489_v55 = vpop.eup %3488 }
 0x25f   :  { %v628_v56 = vpop.xlane.xlu2 %627  ;;  %v645_v38 = vmul.f32 %v3489_v55, %v622_v63  ;;  %vm650_vm11 = vweird.f32 %v3489_v55 }
 0x260   :  { %3490 = vrcp.f32 %v628_v56  ;;  %vm4944_vm14 = vmor %vm649_vm9, %vm650_vm11  ;;  %vm677_vm1 = vweird.f32 %v628_v56 }
 0x261   :  { %v646_v39 = vsub.f32 1.0, %v645_v38 }
 0x263   :  { %v647_v44 = vmul.f32 %v3489_v55, %v646_v39 }
 0x265   :  { %v648_v15 = vadd.f32 %v3489_v55, %v647_v44 }
 0x266   :  { %v3491_v19 = vpop.eup %3490 }
 0x267   :  { %v634_v7 = vpop.xlane.xlu2 %633  ;;  %v673_v60 = vmul.f32 %v3491_v19, %v628_v56  ;;  %vm678_vm12 = vweird.f32 %v3491_v19 }
 0x268   :  { %3492 = vrcp.f32 %v634_v7  ;;  %vm4950_vm13 = vmor %vm677_vm1, %vm678_vm12  ;;  %v711_v1 = vand.u32 2147483648, %v634_v7  ;;  %vm705_vm6 = vweird.f32 %v634_v7 }
 0x269   :  { %v674_v3 = vsub.f32 1.0, %v673_v60 }
 0x26a   :  { %v712_v11 = vor.u32 1.1754944e-38, %v711_v1 }
 0x26b   :  { %v675_v12 = vmul.f32 %v3491_v19, %v674_v3  ;;  %v653_v3 = vand.u32 2147483647, %v622_v63 }
 0x26d   :  { %v676_v60 = vadd.f32 %v3491_v19, %v675_v12  ;;  %v652_v12 = vsel %vm4944_vm14, %v3489_v55, %v648_v15  ;;  %vm654_vm5 = vcmp.eq.f32.partialorder %v653_v3, 8.507059e+37 }
 0x26e   :  { %v3493_v28 = vpop.eup %3492 }
 0x26f   :  { %v701_v34 = vmul.f32 %v3493_v28, %v634_v7  ;;  %vm706_vm2 = vweird.f32 %v3493_v28  ;;  %v680_v63 = vsel %vm4950_vm13, %v3491_v19, %v676_v60 }
 0x270   :  { %v4930_v14 = vpop.xlane.xlu0 %639  ;;  %vm4959_vm9 = vmor %vm705_vm6, %vm706_vm2 }
 0x271   :  { %3494 = vrcp.f32 %v4930_v14  ;;  %v702_v29 = vsub.f32 1.0, %v701_v34  ;;  %v683_v34 = vand.u32 2147483648, %v628_v56  ;;  %v737_v1 = vand.u32 2147483647, %v4930_v14 }
 0x272   :  { %vm733_vm14 = vweird.f32 %v4930_v14 }
 0x273   :  { %v703_v0 = vmul.f32 %v3493_v28, %v702_v29  ;;  %v681_v29 = vand.u32 2147483647, %v628_v56  ;;  %v684_v49 = vor.u32 1.1754944e-38, %v683_v34  ;;  %v709_v56 = vand.u32 2147483647, %v634_v7 }
 0x274   :  { %vm738_vm13 = vcmp.eq.f32.partialorder %v737_v1, 8.507059e+37 }
 0x275   :  { %v704_v21 = vadd.f32 %v3493_v28, %v703_v0  ;;  %vm682_vm8 = vcmp.eq.f32.partialorder %v681_v29, 8.507059e+37  ;;  %vm710_vm12 = vcmp.eq.f32.partialorder %v709_v56, 8.507059e+37 }
 0x277   :  { %v4933_v2 = vpop.eup %3494  ;;  %v708_v19 = vsel %vm4959_vm9, %v3493_v28, %v704_v21  ;;  %v739_v21 = vand.u32 2147483648, %v4930_v14 }
 0x278   :  { %v729_v61 = vmul.f32 %v4933_v2, %v4930_v14  ;;  %v4937_v38 = vpop.xlane.xlu1 %624  ;;  %vm734_vm11 = vweird.f32 %v4933_v2  ;;  %v713_v44 = vsel %vm710_vm12, %v712_v11, %v708_v19 }
 0x279   :  { %3496 = vrcp.f32 %v4937_v38  ;;  %v4940_v39 = vpop.xlane.xlu2 %642  ;;  %vm4988_vm1 = vmor %vm733_vm14, %vm734_vm11  ;;  %v760_v14 = vmul.f32 %v4388_v45, %v713_v44  ;;  %v740_v56 = vor.u32 1.1754944e-38, %v739_v21  ;;  %vm663_vm2 = vweird.f32 %v4937_v38 }
 0x27a   :  { %v730_v35 = vsub.f32 1.0, %v729_v61  ;;  %3498 = vrcp.f32 %v4940_v39  ;;  %v656_v61 = vor.u32 1.1754944e-38, %v655_v47  ;;  %v685_v47 = vsel %vm682_vm8, %v684_v49, %v680_v63 }
 0x27b   :  { %v751_v19 = vand.u32 2147483647, %v4940_v39 }
 0x27c   :  { %v731_v5 = vmul.f32 %v4933_v2, %v730_v35  ;;  %v657_v55 = vsel %vm654_vm5, %v656_v61, %v652_v12  ;;  %v753_v12 = vand.u32 2147483648, %v4940_v39  ;;  %vm747_vm5 = vweird.f32 %v4940_v39 }
 0x27d   :  { %v756_v49 = vmul.f32 %v4376_v52, %v657_v55  ;;  %v669_v52 = vand.u32 2147483648, %v4937_v38  ;;  %vm5038_vm11 = vcmp.eq.f32.partialorder %v751_v19, 8.507059e+37 }
 0x27e   :  { %v732_v7 = vadd.f32 %v4933_v2, %v731_v5  ;;  %v758_v5 = vmul.f32 %v4381_v13, %v685_v47  ;;  %v667_v47 = vand.u32 2147483647, %v4937_v38  ;;  %v754_v21 = vor.u32 1.1754944e-38, %v753_v12 }
 0x27f   :  { %v4957_v17 = vpop.eup %3496  ;;  %v5000_v55 = vsel %vm78_vm0, %v756_v49, 0.0 }
 0x280   :  { %v4963_v0 = vpop.eup %3498  ;;  %v4968_v35 = vpop.xlane.xlu1 %630  ;;  %v659_v60 = vmul.f32 %v4957_v17, %v4937_v38  ;;  %v736_v61 = vsel %vm4988_vm1, %v4933_v2, %v732_v7  ;;  %v5008_v2 = vsel %vm78_vm0, %v758_v5, 0.0  ;;  %v670_v7 = vor.u32 1.1754944e-38, %v669_v52 }
 0x281   :  { %v743_v3 = vmul.f32 %v4963_v0, %v4940_v39  ;;  %3500 = vrcp.f32 %v4968_v35  ;;  %v4976_v34 = vpop.xlane.xlu2 %1970  ;;  %v4981_v28 = vpop.xlane.xlu0 %1964  ;;  %v741_v11 = vsel %vm738_vm13, %v740_v56, %v736_v61  ;;  %v5021_v5 = vsel %vm78_vm0, %v760_v14, 0.0 }
 0x282   :  { %3502 = vrcp.f32 %v4976_v34  ;;  %v660_v13 = vsub.f32 1.0, %v659_v60  ;;  %vm664_vm6 = vweird.f32 %v4957_v17  ;;  %vm5033_vm8 = vcmp.eq.f32.partialorder %v667_v47, 8.507059e+37 }
 0x283   :  { %v744_v63 = vsub.f32 1.0, %v743_v3  ;;  %3504 = vrcp.f32 %v4981_v28  ;;  %vm748_vm9 = vweird.f32 %v4963_v0  ;;  %vm691_vm12 = vweird.f32 %v4968_v35  ;;  %vm5058_vm1 = vmor %vm663_vm2, %vm664_vm6 }
 0x284   :  { %v661_v49 = vmul.f32 %v4957_v17, %v660_v13  ;;  %v5031_v13 = vmul.f32 %v4398_v58, %v741_v11  ;;  %v695_v14 = vand.u32 2147483647, %v4968_v35  ;;  %vm2020_vm13 = vweird.f32 %v4976_v34  ;;  %vm5071_vm10 = vmor %vm747_vm5, %vm748_vm9 }
 0x285   :  { %v745_v1 = vmul.f32 %v4963_v0, %v744_v63  ;;  %v2024_v38 = vand.u32 2147483647, %v4976_v34  ;;  %v2026_v27 = vand.u32 2147483648, %v4976_v34  ;;  %vm1992_vm5 = vweird.f32 %v4981_v28 }
 0x286   :  { %v662_v31 = vadd.f32 %v4957_v17, %v661_v49  ;;  %vm5085_vm6 = vcmp.eq.f32.partialorder %v695_v14, 8.507059e+37  ;;  %v1998_v18 = vand.u32 2147483648, %v4981_v28 }
 0x287   :  { %v5002_v15 = vpop.eup %3500  ;;  %v746_v19 = vadd.f32 %v4963_v0, %v745_v1  ;;  %v2027_v36 = vor.u32 1.1754944e-38, %v2026_v27 }
 0x288   :  { %v687_v45 = vmul.f32 %v5002_v15, %v4968_v35  ;;  %v5013_v60 = vpop.xlane.xlu1 %636  ;;  %v5015_v3 = vpop.eup %3502  ;;  %vm692_vm14 = vweird.f32 %v5002_v15 }
 0x289   :  { %3506 = vrcp.f32 %v5013_v60  ;;  %v2016_v29 = vmul.f32 %v5015_v3, %v4976_v34  ;;  %v5026_v52 = vpop.xlane.xlu2 %1035  ;;  %v5028_v61 = vpop.eup %3504  ;;  %vm5081_vm2 = vmor %vm691_vm12, %vm692_vm14  ;;  %v750_v53 = vsel %vm5071_vm10, %v4963_v0, %v746_v19  ;;  %vm2021_vm9 = vweird.f32 %v5015_v3 }
 0x28a   :  { %v688_v44 = vsub.f32 1.0, %v687_v45  ;;  %v697_v45 = vand.u32 2147483648, %v4968_v35  ;;  %v1988_v47 = vmul.f32 %v5028_v61, %v4981_v28  ;;  %v5048_v11 = vpop.xlane.xlu0 %1982  ;;  %3508 = vrcp.f32 %v5026_v52  ;;  %vm5129_vm14 = vmor %vm2020_vm13, %vm2021_vm9 }
 0x28b   :  { %v2017_v58 = vsub.f32 1.0, %v2016_v29  ;;  %3510 = vrcp.f32 %v5048_v11  ;;  %v666_v35 = vsel %vm5058_vm1, %v4957_v17, %v662_v31  ;;  %vm5109_vm12 = vcmp.eq.f32.partialorder %v2024_v38, 8.507059e+37 }
 0x28c   :  { %v689_v56 = vmul.f32 %v5002_v15, %v688_v44  ;;  %v1989_v49 = vsub.f32 1.0, %v1988_v47  ;;  %v698_v47 = vor.u32 1.1754944e-38, %v697_v45  ;;  %v755_v0 = vsel %vm5038_vm11, %v754_v21, %v750_v53 }
 0x28d   :  { %v2018_v4 = vmul.f32 %v5015_v3, %v2017_v58  ;;  %v1999_v21 = vor.u32 1.1754944e-38, %v1998_v18  ;;  %v725_v34 = vand.u32 2147483648, %v5013_v60  ;;  %vm719_vm13 = vweird.f32 %v5013_v60 }
 0x28e   :  { %v690_v29 = vadd.f32 %v5002_v15, %v689_v56  ;;  %v1996_v56 = vand.u32 2147483647, %v4981_v28  ;;  %v1990_v45 = vmul.f32 %v5028_v61, %v1989_v49  ;;  %v1091_v17 = vand.u32 2147483648, %v5026_v52 }
 0x28f   :  { %v5065_v1 = vpop.eup %3506  ;;  %v2019_v23 = vadd.f32 %v5015_v3, %v2018_v4  ;;  %v671_v4 = vsel %vm5033_vm8, %v670_v7, %v666_v35  ;;  %vm1993_vm8 = vweird.f32 %v5028_v61  ;;  %v723_v7 = vand.u32 2147483647, %v5013_v60 }
 0x290   :  { %v715_v32 = vmul.f32 %v5065_v1, %v5013_v60  ;;  %v5092_v37 = vpop.xlane.xlu1 %1029  ;;  %v694_v14 = vsel %vm5081_vm2, %v5002_v15, %v690_v29  ;;  %v5107_v46 = vpop.eup %3508  ;;  %vm5113_vm10 = vcmp.eq.f32.partialorder %v1996_v56, 8.507059e+37  ;;  %v1991_v44 = vadd.f32 %v5028_v61, %v1990_v45  ;;  %vm5155_vm1 = vmor %vm1992_vm5, %vm1993_vm8 }
 0x291   :  { %3512 = vrcp.f32 %v5092_v37  ;;  %v5125_v19 = vpop.eup %3510  ;;  %v1081_v53 = vmul.f32 %v5107_v46, %v5026_v52  ;;  %vm720_vm11 = vweird.f32 %v5065_v1  ;;  %v5148_v38 = vmul.f32 %v4416_v16, %v671_v4 }
 0x292   :  { %v716_v22 = vsub.f32 1.0, %v715_v32  ;;  %v699_v32 = vsel %vm5085_vm6, %v698_v47, %v694_v14  ;;  %v2072_v12 = vmul.f32 %v5125_v19, %v5048_v11  ;;  %v5151_v56 = vmul.f32 %v4418_v59, %v755_v0  ;;  %vm5174_vm6 = vmor %vm719_vm13, %vm720_vm11  ;;  %v5182_v14 = vpop.xlane.xlu0 %1041 }
 0x293   :  { %v759_v63 = vmul.f32 %v4428_v43, %v699_v32  ;;  %v1082_v49 = vsub.f32 1.0, %v1081_v53  ;;  %v1995_v59 = vsel %vm5155_vm1, %v5028_v61, %v1991_v44  ;;  %vm5169_vm2 = vcmp.eq.f32.partialorder %v723_v7, 8.507059e+37 }
 0x294   :  { %v717_v15 = vmul.f32 %v5065_v1, %v716_v22  ;;  %v2023_v22 = vsel %vm5129_vm14, %v5015_v3, %v2019_v23  ;;  %v2073_v43 = vsub.f32 1.0, %v2072_v12  ;;  %v5160_v23 = vpop.xlane.xlu2 %1979  ;;  %v726_v39 = vor.u32 1.1754944e-38, %v725_v34 }
 0x295   :  { %v2028_v16 = vsel %vm5109_vm12, %v2027_v36, %v2023_v22  ;;  %v1083_v58 = vmul.f32 %v5107_v46, %v1082_v49  ;;  %vm1085_vm5 = vweird.f32 %v5026_v52  ;;  %v1089_v47 = vand.u32 2147483647, %v5026_v52 }
 0x296   :  { %v718_v29 = vadd.f32 %v5065_v1, %v717_v15  ;;  %v1182_v61 = vsel %vm78_vm0, %v759_v63, 0.0  ;;  %3514 = vrcp.f32 %v5160_v23  ;;  %v2101_v36 = vmul.f32 %v4438_v30, %v2028_v16 }
 0x297   :  { %v5162_v3 = vpop.eup %3512  ;;  %v2000_v4 = vsel %vm5113_vm10, %v1999_v21, %v1995_v59  ;;  %v2074_v0 = vmul.f32 %v5125_v19, %v2073_v43  ;;  %v1084_v27 = vadd.f32 %v5107_v46, %v1083_v58  ;;  %vm1086_vm9 = vweird.f32 %v5107_v46 }
 0x298   :  { %v1053_v35 = vmul.f32 %v5162_v3, %v5092_v37  ;;  %v722_v45 = vsel %vm5174_vm6, %v5065_v1, %v718_v29  ;;  %v5194_v15 = vpop.xlane.xlu1 %1976  ;;  %vm2076_vm12 = vweird.f32 %v5048_v11  ;;  %3516 = vrcp.f32 %v5182_v14  ;;  %vm5218_vm10 = vmor %vm1085_vm5, %vm1086_vm9 }
 0x299   :  { %v727_v1 = vsel %vm5169_vm2, %v726_v39, %v722_v45  ;;  %vm5202_vm14 = vcmp.eq.f32.partialorder %v1089_v47, 8.507059e+37  ;;  %v2080_v31 = vand.u32 2147483647, %v5048_v11  ;;  %v5209_v7 = vadd.f32 %v1182_v61, %v5008_v2 }
 0x29a   :  { %v1054_v32 = vsub.f32 1.0, %v1053_v35  ;;  %v2099_v53 = vmul.f32 %v4447_v20, %v2000_v4  ;;  %v1092_v22 = vor.u32 1.1754944e-38, %v1091_v17  ;;  %v2082_v21 = vand.u32 2147483648, %v5048_v11  ;;  %v5263_v61 = vpop.xlane.xlu0 %1973 }
 0x29b   :  { %v5214_v34 = vsel %vm78_vm0, %v2101_v36, 0.0  ;;  %v2075_v63 = vadd.f32 %v5125_v19, %v2074_v0  ;;  %vm2077_vm8 = vweird.f32 %v5125_v19  ;;  %v1061_v2 = vand.u32 2147483647, %v5092_v37 }
 0x29c   :  { %v1055_v44 = vmul.f32 %v5162_v3, %v1054_v32  ;;  %v5225_v29 = vpop.eup %3514  ;;  %v761_v20 = vmul.f32 %v4408_v54, %v727_v1  ;;  %v1088_v49 = vsel %vm5218_vm10, %v5107_v46, %v1084_v27  ;;  %v1063_v52 = vand.u32 2147483648, %v5092_v37  ;;  %v5241_v54 = vpop.xlane.xlu2 %1044  ;;  %vm5250_vm13 = vmor %vm2076_vm12, %vm2077_vm8 }
 0x29d   :  { %3518 = vrcp.f32 %v5194_v15  ;;  %vm5233_vm11 = vcmp.eq.f32.partialorder %v2080_v31, 8.507059e+37  ;;  %vm1058_vm1 = vweird.f32 %v5162_v3  ;;  %v2058_v16 = vmul.f32 %v5225_v29, %v5160_v23 }
 0x29e   :  { %v1056_v43 = vadd.f32 %v5162_v3, %v1055_v44  ;;  %v5243_v59 = vpop.eup %3516  ;;  %v5246_v46 = vsel %vm78_vm0, %v2099_v53, 0.0  ;;  %v2083_v58 = vor.u32 1.1754944e-38, %v2082_v21  ;;  %vm1057_vm2 = vweird.f32 %v5092_v37 }
 0x29f   :  { %v2066_v60 = vand.u32 2147483647, %v5160_v23  ;;  %v1093_v39 = vsel %vm5202_vm14, %v1092_v22, %v1088_v49  ;;  %v2079_v47 = vsel %vm5250_vm13, %v5125_v19, %v2075_v63  ;;  %v2059_v35 = vsub.f32 1.0, %v2058_v16  ;;  %vm5270_vm6 = vmor %vm1057_vm2, %vm1058_vm1 }
 0x2a0   :  { %v1109_v11 = vmul.f32 %v5243_v59, %v5182_v14  ;;  %v5266_v45 = vsel %vm78_vm0, %v761_v20, 0.0  ;;  %vm5274_vm5 = vcmp.eq.f32.partialorder %v1061_v2, 8.507059e+37  ;;  %v1064_v19 = vor.u32 1.1754944e-38, %v1063_v52  ;;  %v5284_v32 = vpop.xlane.xlu1 %1047 }
 0x2a1   :  { %3520 = vrcp.f32 %v5241_v54  ;;  %v1060_v36 = vsel %vm5270_vm6, %v5162_v3, %v1056_v43  ;;  %v2060_v4 = vmul.f32 %v5225_v29, %v2059_v35  ;;  %vm2062_vm9 = vweird.f32 %v5160_v23 }
 0x2a2   :  { %v1110_v0 = vsub.f32 1.0, %v1109_v11  ;;  %v1166_v1 = vmul.f32 %v1093_v39, %v4487_v62  ;;  %v2084_v30 = vsel %vm5233_vm11, %v2083_v58, %v2079_v47  ;;  %v2068_v31 = vand.u32 2147483648, %v5160_v23 }
 0x2a3   :  { %v5286_v27 = vpop.eup %3518  ;;  %3522 = vrcp.f32 %v5263_v61  ;;  %vm5293_vm12 = vcmp.eq.f32.partialorder %v2066_v60, 8.507059e+37  ;;  %vm1113_vm14 = vweird.f32 %v5182_v14  ;;  %v1117_v44 = vand.u32 2147483647, %v5182_v14 }
 0x2a4   :  { %v1119_v53 = vand.u32 2147483648, %v5182_v14  ;;  %v2044_v62 = vmul.f32 %v5286_v27, %v5194_v15  ;;  %v1065_v22 = vsel %vm5274_vm5, %v1064_v19, %v1060_v36  ;;  %v2052_v21 = vand.u32 2147483647, %v5194_v15  ;;  %v5327_v47 = vpop.xlane.xlu2 %2372 }
 0x2a5   :  { %v2054_v12 = vand.u32 2147483648, %v5194_v15  ;;  %3524 = vrcp.f32 %v5284_v32  ;;  %v2061_v63 = vadd.f32 %v5225_v29, %v2060_v4  ;;  %vm2063_vm10 = vweird.f32 %v5225_v29 }
 0x2a6   :  { %v1111_v2 = vmul.f32 %v5243_v59, %v1110_v0  ;;  %v2045_v20 = vsub.f32 1.0, %v2044_v62  ;;  %v5313_v52 = vsel %vm78_vm0, %v1166_v1, 0.0  ;;  %v5316_v18 = vmul.f32 %v4501_v51, %v2084_v30  ;;  %vm5335_vm1 = vmor %vm2062_vm9, %vm2063_vm10 }
 0x2a7   :  { %v5310_v49 = vpop.eup %3520  ;;  %v2069_v43 = vor.u32 1.1754944e-38, %v2068_v31  ;;  %vm2048_vm8 = vweird.f32 %v5194_v15  ;;  %v1164_v16 = vmul.f32 %v1065_v22, %v4509_v57  ;;  %vm5320_vm11 = vcmp.eq.f32.partialorder %v1117_v44, 8.507059e+37  ;;  %v5364_v44 = vpop.xlane.xlu0 %1032 }
 0x2a8   :  { %v1120_v58 = vor.u32 1.1754944e-38, %v1119_v53  ;;  %v2046_v60 = vmul.f32 %v5286_v27, %v2045_v20  ;;  %v1123_v39 = vmul.f32 %v5310_v49, %v5241_v54  ;;  %vm1114_vm13 = vweird.f32 %v5243_v59  ;;  %v5404_v51 = vpop.xlane.xlu1 %1967 }
 0x2a9   :  { %v5329_v35 = vpop.eup %3522  ;;  %vm5340_vm2 = vcmp.eq.f32.partialorder %v2052_v21, 8.507059e+37  ;;  %v2055_v11 = vor.u32 1.1754944e-38, %v2054_v12  ;;  %v1131_v37 = vand.u32 2147483647, %v5241_v54  ;;  %v2065_v17 = vsel %vm5335_vm1, %v5225_v29, %v2061_v63  ;;  %vm5372_vm9 = vmor %vm1113_vm14, %vm1114_vm13 }
 0x2aa   :  { %v1112_v19 = vadd.f32 %v5243_v59, %v1111_v2  ;;  %v1124_v23 = vsub.f32 1.0, %v1123_v39  ;;  %vm1127_vm6 = vweird.f32 %v5241_v54  ;;  %v2047_v4 = vadd.f32 %v5286_v27, %v2046_v60 }
 0x2ab   :  { %v5350_v36 = vpop.eup %3524  ;;  %vm2049_vm5 = vweird.f32 %v5286_v27  ;;  %v2030_v0 = vmul.f32 %v5329_v35, %v5263_v61  ;;  %3526 = vrcp.f32 %v5327_v47  ;;  %v5358_v1 = vsel %vm78_vm0, %v1164_v16, 0.0 }
 0x2ac   :  { %v1125_v29 = vmul.f32 %v5310_v49, %v1124_v23  ;;  %v1133_v30 = vand.u32 2147483648, %v5241_v54  ;;  %v1137_v31 = vmul.f32 %v5350_v36, %v5284_v32  ;;  %v2070_v53 = vsel %vm5293_vm12, %v2069_v43, %v2065_v17  ;;  %vm5389_vm12 = vmor %vm2048_vm8, %vm2049_vm5 }
 0x2ad   :  { %vm5376_vm10 = vcmp.eq.f32.partialorder %v1131_v37, 8.507059e+37  ;;  %v2031_v21 = vsub.f32 1.0, %v2030_v0  ;;  %v2038_v12 = vand.u32 2147483647, %v5263_v61  ;;  %v2040_v63 = vand.u32 2147483648, %v5263_v61 }
 0x2ae   :  { %v1116_v3 = vsel %vm5372_vm9, %v5243_v59, %v1112_v19  ;;  %vm1128_vm14 = vweird.f32 %v5310_v49  ;;  %v1138_v2 = vsub.f32 1.0, %v1137_v31  ;;  %v1145_v20 = vand.u32 2147483647, %v5284_v32  ;;  %v5448_v31 = vpop.xlane.xlu2 %2390 }
 0x2af   :  { %v2051_v43 = vsel %vm5389_vm12, %v5286_v27, %v2047_v4  ;;  %v1126_v16 = vadd.f32 %v5310_v49, %v1125_v29  ;;  %v2032_v59 = vmul.f32 %v5329_v35, %v2031_v21  ;;  %3528 = vrcp.f32 %v5364_v44  ;;  %vm5419_vm13 = vmor %vm1127_vm6, %vm1128_vm14 }
 0x2b0   :  { %v2104_v15 = vmul.f32 %v4539_v26, %v2070_v53  ;;  %v1134_v60 = vor.u32 1.1754944e-38, %v1133_v30  ;;  %vm2034_vm8 = vweird.f32 %v5263_v61  ;;  %v1147_v39 = vand.u32 2147483648, %v5284_v32 }
 0x2b1   :  { %v5406_v37 = vpop.eup %3526  ;;  %v1121_v27 = vsel %vm5320_vm11, %v1120_v58, %v1116_v3  ;;  %v2033_v17 = vadd.f32 %v5329_v35, %v2032_v59  ;;  %vm2035_vm1 = vweird.f32 %v5329_v35  ;;  %v1139_v19 = vmul.f32 %v5350_v36, %v1138_v2  ;;  %v5465_v3 = vpop.xlane.xlu0 %1050 }
 0x2b2   :  { %v2056_v26 = vsel %vm5340_vm2, %v2055_v11, %v2051_v43  ;;  %vm5423_vm5 = vcmp.eq.f32.partialorder %v2038_v12, 8.507059e+37  ;;  %vm1141_vm11 = vweird.f32 %v5284_v32  ;;  %v2396_v58 = vmul.f32 %v5406_v37, %v5327_v47  ;;  %vm5444_vm6 = vmor %vm2034_vm8, %vm2035_vm1 }
 0x2b3   :  { %v1130_v57 = vsel %vm5419_vm13, %v5310_v49, %v1126_v16  ;;  %v2041_v11 = vor.u32 1.1754944e-38, %v2040_v63  ;;  %vm5433_vm2 = vcmp.eq.f32.partialorder %v1145_v20, 8.507059e+37  ;;  %3530 = vrcp.f32 %v5404_v51 }
 0x2b4   :  { %v5439_v4 = vsel %vm78_vm0, %v2104_v15, 0.0  ;;  %v1168_v0 = vmul.f32 %v1121_v27, %v4546_v6  ;;  %v1148_v30 = vor.u32 1.1754944e-38, %v1147_v39  ;;  %v2397_v49 = vsub.f32 1.0, %v2396_v58 }
 0x2b5   :  { %v5450_v53 = vpop.eup %3528  ;;  %v2103_v62 = vmul.f32 %v4544_v24, %v2056_v26  ;;  %v2037_v21 = vsel %vm5444_vm6, %v5329_v35, %v2033_v17  ;;  %v1140_v6 = vadd.f32 %v5350_v36, %v1139_v19  ;;  %vm1142_vm9 = vweird.f32 %v5350_v36 }
 0x2b6   :  { %vm2400_vm12 = vweird.f32 %v5327_v47  ;;  %v1135_v61 = vsel %vm5376_vm10, %v1134_v60, %v1130_v57  ;;  %v2404_v12 = vand.u32 2147483647, %v5327_v47  ;;  %v2406_v63 = vand.u32 2147483648, %v5327_v47  ;;  %vm5478_vm10 = vmor %vm1141_vm11, %vm1142_vm9 }
 0x2b7   :  { %v1067_v24 = vmul.f32 %v5450_v53, %v5364_v44  ;;  %v2398_v35 = vmul.f32 %v5406_v37, %v2397_v49  ;;  %v1075_v14 = vand.u32 2147483647, %v5364_v44  ;;  %v1077_v2 = vand.u32 2147483648, %v5364_v44 }
 0x2b8   :  { %3532 = vrcp.f32 %v5448_v31  ;;  %v5472_v22 = vsel %vm78_vm0, %v1168_v0, 0.0  ;;  %v2042_v20 = vsel %vm5423_vm5, %v2041_v11, %v2037_v21  ;;  %vm1071_vm14 = vweird.f32 %v5364_v44 }
 0x2b9   :  { %v1068_v16 = vsub.f32 1.0, %v1067_v24  ;;  %v5483_v59 = vpop.eup %3530  ;;  %v5486_v15 = vsel %vm78_vm0, %v2103_v62, 0.0  ;;  %v1169_v60 = vmul.f32 %v1135_v61, %v4579_v25  ;;  %v1144_v39 = vsel %vm5478_vm10, %v5350_v36, %v1140_v6 }
 0x2ba   :  { %3534 = vrcp.f32 %v5465_v3  ;;  %vm2401_vm8 = vweird.f32 %v5406_v37  ;;  %vm5494_vm1 = vcmp.eq.f32.partialorder %v2404_v12, 8.507059e+37  ;;  %v2407_v27 = vor.u32 1.1754944e-38, %v2406_v63 }
 0x2bb   :  { %v1069_v17 = vmul.f32 %v5450_v53, %v1068_v16  ;;  %v2002_v19 = vmul.f32 %v5483_v59, %v5404_v51  ;;  %v2102_v25 = vmul.f32 %v4570_v42, %v2042_v20  ;;  %v2399_v26 = vadd.f32 %v5406_v37, %v2398_v35 }
 0x2bc   :  { %vm5503_vm13 = vcmp.eq.f32.partialorder %v1075_v14, 8.507059e+37  ;;  %v1078_v23 = vor.u32 1.1754944e-38, %v1077_v2  ;;  %v2010_v28 = vand.u32 2147483647, %v5404_v51  ;;  %v1149_v58 = vsel %vm5433_vm2, %v1148_v30, %v1144_v39  ;;  %vm5525_vm2 = vmor %vm2400_vm12, %vm2401_vm8 }
 0x2bd   :  { %v1070_v57 = vadd.f32 %v5450_v53, %v1069_v17  ;;  %vm1072_vm5 = vweird.f32 %v5450_v53  ;;  %v2003_v11 = vsub.f32 1.0, %v2002_v19  ;;  %v5515_v42 = vsel %vm78_vm0, %v1169_v60, 0.0  ;;  %v5572_v17 = vpop.xlane.xlu1 %1038 }
 0x2be   :  { %v5512_v0 = vpop.eup %3532  ;;  %vm2006_vm11 = vweird.f32 %v5404_v51  ;;  %v1184_v29 = vrot.slane %v5209_v7, 4  ;;  %v1192_v49 = vadd.f32 %v5266_v45, %v5021_v5  ;;  %v2012_v62 = vand.u32 2147483648, %v5404_v51  ;;  %vm5548_vm6 = vmor %vm1071_vm14, %vm1072_vm5 }
 0x2bf   :  { %v2004_v30 = vmul.f32 %v5483_v59, %v2003_v11  ;;  %v2480_v21 = vmul.f32 %v5512_v0, %v5448_v31  ;;  %v1173_v6 = vsel %vm78_vm0, %v5148_v38, 0.0  ;;  %v2525_v5 = vsel %vm78_vm0, %v2102_v25, 0.0 }
 0x2c0   :  { %v5535_v61 = vpop.eup %3534  ;;  %v5539_v45 = vmul.f32 %v1149_v58, %v4667_v9  ;;  %v2403_v47 = vsel %vm5525_vm2, %v5406_v37, %v2399_v26  ;;  %vm5552_vm9 = vcmp.eq.f32.partialorder %v2010_v28, 8.507059e+37  ;;  %v1074_v9 = vsel %vm5548_vm6, %v5450_v53, %v1070_v57  ;;  %v5594_v57 = vpop.xlane.xlu0 %2384 }
 0x2c1   :  { %vm2007_vm12 = vweird.f32 %v5483_v59  ;;  %v2481_v63 = vsub.f32 1.0, %v2480_v21  ;;  %v1151_v37 = vmul.f32 %v5535_v61, %v5465_v3  ;;  %v2005_v44 = vadd.f32 %v5483_v59, %v2004_v30  ;;  %v5603_v30 = vpop.xlane.xlu2 %2381 }
 0x2c2   :  { %v1174_v24 = vadd.f32 %v1173_v6, %v5000_v55  ;;  %v1185_v35 = vadd.f32 %v1184_v29, %v5209_v7  ;;  %v1193_v14 = vrot.slane %v1192_v49, 4  ;;  %v5566_v2 = vadd.f32 %v2525_v5, %v5214_v34  ;;  %vm5580_vm14 = vmor %vm2006_vm11, %vm2007_vm12 }
 0x2c3   :  { %v2013_v20 = vor.u32 1.1754944e-38, %v2012_v62  ;;  %vm2484_vm10 = vweird.f32 %v5448_v31  ;;  %v1152_v53 = vsub.f32 1.0, %v1151_v37  ;;  %v2408_v43 = vsel %vm5494_vm1, %v2407_v27, %v2403_v47 }
 0x2c4   :  { %v2488_v16 = vand.u32 2147483647, %v5448_v31  ;;  %v1175_v60 = vrot.slane %v1174_v24, 4  ;;  %v1186_v39 = vrot.slane %v1185_v35, 2  ;;  %v1079_v55 = vsel %vm5503_vm13, %v1078_v23, %v1074_v9 }
 0x2c5   :  { %v2482_v34 = vmul.f32 %v5512_v0, %v2481_v63  ;;  %v2490_v32 = vand.u32 2147483648, %v5448_v31  ;;  %v1194_v27 = vadd.f32 %v1193_v14, %v1192_v49  ;;  %v2009_v19 = vsel %vm5580_vm14, %v5483_v59, %v2005_v44 }
 0x2c6   :  { %v1153_v25 = vmul.f32 %v5535_v61, %v1152_v53  ;;  %v1176_v26 = vadd.f32 %v1175_v60, %v1174_v24  ;;  %v1200_v36 = vsel %vm78_vm0, %v5151_v56, 0.0  ;;  %v2507_v51 = vmul.f32 %v2408_v43, %v4676_v40 }
 0x2c7   :  { %v1159_v23 = vand.u32 2147483647, %v5465_v3  ;;  %v1187_v28 = vadd.f32 %v1186_v39, %v1185_v35  ;;  %v1195_v58 = vrot.slane %v1194_v27, 2  ;;  %v1165_v11 = vmul.f32 %v1079_v55, %v4674_v50  ;;  %v5638_v35 = vpop.xlane.xlu1 %1985 }
 0x2c8   :  { %vm2485_vm8 = vweird.f32 %v5512_v0  ;;  %v1177_v29 = vrot.slane %v1176_v26, 2  ;;  %v1199_v59 = vsel %vm78_vm0, %v5031_v13, 0.0  ;;  %v2014_v49 = vsel %vm5552_vm9, %v2013_v20, %v2009_v19 }
 0x2c9   :  { %v2483_v56 = vadd.f32 %v5512_v0, %v2482_v34  ;;  %v1196_v40 = vadd.f32 %v1195_v58, %v1194_v27  ;;  %v1201_v54 = vadd.f32 %v1200_v36, %v1199_v59  ;;  %v1154_v62 = vadd.f32 %v5535_v61, %v1153_v25  ;;  %vm5618_vm5 = vmor %vm2484_vm10, %vm2485_vm8 }
 0x2ca   :  { %vm1156_vm1 = vweird.f32 %v5535_v61  ;;  %v1178_v50 = vadd.f32 %v1177_v29, %v1176_v26  ;;  %3536 = vrcp.f32 %v5572_v17  ;;  %vm5608_vm13 = vcmp.eq.f32.partialorder %v2488_v16, 8.507059e+37 }
 0x2cb   :  { %v1161_v13 = vand.u32 2147483648, %v5465_v3  ;;  %v1188_v6 = vrot.slane %v1187_v28, 1  ;;  %v1202_v5 = vrot.slane %v1201_v54, 4  ;;  %v2100_v47 = vmul.f32 %v4606_v10, %v2014_v49 }
 0x2cc   :  { %vm1155_vm11 = vweird.f32 %v5465_v3  ;;  %v1197_v38 = vrot.slane %v1196_v40, 1  ;;  %3538 = vrcp.f32 %v5603_v30  ;;  %v1233_v9 = vsel %vm78_vm0, %v1165_v11, 0.0 }
 0x2cd   :  { %v2487_v63 = vsel %vm5618_vm5, %v5512_v0, %v2483_v56  ;;  %vm5628_vm2 = vmor %vm1155_vm11, %vm1156_vm1  ;;  %v1179_v31 = vrot.slane %v1178_v50, 1  ;;  %v1203_v37 = vadd.f32 %v1202_v5, %v1201_v54  ;;  %v5633_v44 = vsel %vm78_vm0, %v2507_v51, 0.0 }
 0x2ce   :  { %v2491_v24 = vor.u32 1.1754944e-38, %v2490_v32  ;;  %v1158_v3 = vsel %vm5628_vm2, %v5535_v61, %v1154_v62  ;;  %vm1160_vm6 = vcmp.eq.f32.partialorder %v1159_v23, 8.507059e+37  ;;  %v1162_v14 = vor.u32 1.1754944e-38, %v1161_v13  ;;  %v5660_v32 = vpop.xlane.xlu0 %2375  ;;  %v1340_v62 = vpop.xlane.xlu2 %1339 }
 0x2cf   :  { %v5640_v20 = vadd.f32 %v1188_v6, %v1187_v28  ;;  %v1204_v0 = vrot.slane %v1203_v37, 2  ;;  %3540 = vrcp.f32 %v5594_v57  ;;  %v5644_v43 = vadd.f32 %v1233_v9, %v5358_v1 }
 0x2d0   :  { %v3537_v53 = vpop.eup %3536  ;;  %v5647_v16 = vsel %vm78_vm0, %v2100_v47, 0.0  ;;  %v5651_v60 = vsel %vm5608_vm13, %v2491_v24, %v2487_v63  ;;  %v5653_v61 = vadd.f32 %v1197_v38, %v1196_v40  ;;  %v5655_v39 = vsel %vm1160_vm6, %v1162_v14, %v1158_v3  ;;  %v5705_v63 = vpop.xlane.xlu1 %2378 }
 0x2d1   :  { %v5657_v55 = vadd.f32 %v1179_v31, %v1178_v50  ;;  %v1205_v7 = vadd.f32 %v1204_v0, %v1203_v37  ;;  %v1095_v34 = vmul.f32 %v3537_v53, %v5572_v17  ;;  %vm1099_vm9 = vweird.f32 %v5572_v17 }
 0x2d2   :  { %v5662_v1 = vpop.eup %3538  ;;  %v1103_v27 = vand.u32 2147483647, %v5572_v17  ;;  %v1105_v19 = vand.u32 2147483648, %v5572_v17  ;;  %3542 = vrcp.f32 %v5638_v35  ;;  %vm2442_vm12 = vweird.f32 %v5603_v30 }
 0x2d3   :  { %v1206_v25 = vrot.slane %v1205_v7, 1  ;;  %v1273_v26 = vsel %vm1272_vm15, %v5640_v20, %v5657_v55  ;;  %v1096_v36 = vsub.f32 1.0, %v1095_v34  ;;  %v2438_v51 = vmul.f32 %v5662_v1, %v5603_v30 }
 0x2d4   :  { %v1275_v23 = vsel %vm1274_vm3, %v5653_v61, %v1273_v26  ;;  %v2446_v28 = vand.u32 2147483647, %v5603_v30  ;;  %3544 = vrcp.f32 %v5660_v32  ;;  %vm1100_vm10 = vweird.f32 %v3537_v53 }
 0x2d5   :  { %v5678_v58 = vpop.eup %3540  ;;  %v5680_v11 = vadd.f32 %v1206_v25, %v1205_v7  ;;  %v1097_v29 = vmul.f32 %v3537_v53, %v1096_v36  ;;  %v2439_v59 = vsub.f32 1.0, %v2438_v51  ;;  %vm5682_vm14 = vcmp.eq.f32.partialorder %v1103_v27, 8.507059e+37  ;;  %vm5696_vm8 = vmor %vm1099_vm9, %vm1100_vm10 }
 0x2d6   :  { %v1106_v56 = vor.u32 1.1754944e-38, %v1105_v19  ;;  %v2448_v40 = vand.u32 2147483648, %v5603_v30  ;;  %v2452_v54 = vmul.f32 %v5678_v58, %v5594_v57  ;;  %v2460_v6 = vand.u32 2147483647, %v5594_v57 }
 0x2d7   :  { %v1277_v50 = vsel %vm1276_vm4, %v5680_v11, %v1275_v23  ;;  %v1098_v21 = vadd.f32 %v3537_v53, %v1097_v29  ;;  %v2440_v13 = vmul.f32 %v5662_v1, %v2439_v59  ;;  %vm2443_vm1 = vweird.f32 %v5662_v1 }
 0x2d8   :  { %v3543_v5 = vpop.eup %3542  ;;  %v1280_v47 = vsel %vm1279_vm7, %v1277_v50, 0.0  ;;  %vm5701_vm13 = vcmp.eq.f32.partialorder %v2446_v28, 8.507059e+37  ;;  %v2453_v9 = vsub.f32 1.0, %v2452_v54  ;;  %v5711_v37 = vadd.f32 1e-08, %v1340_v62  ;;  %vm5722_vm11 = vmor %vm2442_vm12, %vm2443_vm1  ;;  %v5762_v50 = vpop.xlane.xlu0 %2393 }
 0x2d9   :  { %1281 = vadd.xlane.f32.xlu0 %v1280_v47  ;;  %v1102_v10 = vsel %vm5696_vm8, %v3537_v53, %v1098_v21  ;;  %v2441_v31 = vadd.f32 %v5662_v1, %v2440_v13  ;;  %v2086_v17 = vmul.f32 %v3543_v5, %v5638_v35  ;;  %v2449_v3 = vor.u32 1.1754944e-38, %v2448_v40  ;;  %v5766_v47 = vpop.xlane.xlu1 %2387  ;;  %v7094_v53 = vld [vmem:[#allocation11_spill] sm:$0xff] }
 0x2da   :  { %v3545_v24 = vpop.eup %3544  ;;  %v2454_v14 = vmul.f32 %v5678_v58, %v2453_v9  ;;  %vm2456_vm5 = vweird.f32 %v5594_v57  ;;  %v2462_v0 = vand.u32 2147483648, %v5594_v57  ;;  %v1107_v7 = vsel %vm5682_vm14, %v1106_v56, %v1102_v10 }
 0x2db   :  { %vm5726_vm2 = vcmp.eq.f32.partialorder %v2460_v6, 8.507059e+37  ;;  %v2087_v27 = vsub.f32 1.0, %v2086_v17  ;;  %v2410_v19 = vmul.f32 %v3545_v24, %v5660_v32  ;;  %v2445_v25 = vsel %vm5722_vm11, %v5662_v1, %v2441_v31 }
 0x2dc   :  { %v2455_v26 = vadd.f32 %v5678_v58, %v2454_v14  ;;  %vm2457_vm6 = vweird.f32 %v5678_v58  ;;  %v2094_v30 = vand.u32 2147483647, %v5638_v35  ;;  %vm2091_vm9 = vweird.f32 %v3543_v5 }
 0x2dd   :  { %v2088_v36 = vmul.f32 %v3543_v5, %v2087_v27  ;;  %3546 = vrcp.f32 %v5711_v37  ;;  %v2411_v51 = vsub.f32 1.0, %v2410_v19  ;;  %v1167_v23 = vmul.f32 %v1107_v7, %v4746_v33  ;;  %vm5746_vm10 = vmor %vm2456_vm5, %vm2457_vm6 }
 0x2de   :  { %vm2090_vm12 = vweird.f32 %v5638_v35  ;;  %v2096_v28 = vand.u32 2147483648, %v5638_v35  ;;  %v2418_v29 = vand.u32 2147483647, %v5660_v32  ;;  %v2450_v1 = vsel %vm5701_vm13, %v2449_v3, %v2445_v25 }
 0x2df   :  { %v2089_v49 = vadd.f32 %v3543_v5, %v2088_v36  ;;  %v2412_v56 = vmul.f32 %v3545_v24, %v2411_v51  ;;  %vm2415_vm14 = vweird.f32 %v3545_v24  ;;  %v2459_v33 = vsel %vm5746_vm10, %v5678_v58, %v2455_v26  ;;  %vm5753_vm8 = vmor %vm2090_vm12, %vm2091_vm9 }
 0x2e0   :  { %v2463_v40 = vor.u32 1.1754944e-38, %v2462_v0  ;;  %v2420_v54 = vand.u32 2147483648, %v5660_v32  ;;  %3548 = vrcp.f32 %v5705_v63  ;;  %vm2095_vm1 = vcmp.eq.f32.partialorder %v2094_v30, 8.507059e+37 }
 0x2e1   :  { %v2093_v57 = vsel %vm5753_vm8, %v3543_v5, %v2089_v49  ;;  %v2413_v62 = vadd.f32 %v3545_v24, %v2412_v56  ;;  %vm2414_vm13 = vweird.f32 %v5660_v32  ;;  %v1242_v58 = vsel %vm78_vm0, %v1167_v23, 0.0 }
 0x2e2   :  { %v2510_v21 = vmul.f32 %v2450_v1, %v4816_v8  ;;  %v2097_v13 = vor.u32 1.1754944e-38, %v2096_v28  ;;  %vm2416_vm5 = vmor %vm2414_vm13, %vm2415_vm14  ;;  %v2421_v6 = vor.u32 1.1754944e-38, %v2420_v54  ;;  %v2464_v5 = vsel %vm5726_vm2, %v2463_v40, %v2459_v33 }
 0x2e3   :  { %v5768_v12 = vpop.eup %3546  ;;  %v2417_v38 = vsel %vm2416_vm5, %v3545_v24, %v2413_v62  ;;  %vm2419_vm11 = vcmp.eq.f32.partialorder %v2418_v29, 8.507059e+37  ;;  %v2432_v32 = vand.u32 2147483647, %v5705_v63  ;;  %v2434_v31 = vand.u32 2147483648, %v5705_v63 }
 0x2e4   :  { %v2098_v9 = vsel %vm2095_vm1, %v2097_v13, %v2093_v57  ;;  %v2422_v10 = vsel %vm2419_vm11, %v2421_v6, %v2417_v38  ;;  %3550 = vrcp.f32 %v5762_v50  ;;  %v5777_v8 = vadd.f32 %v5647_v16, %v5246_v46  ;;  %v7093_v46 = vld [vmem:[#allocation14_spill] sm:$0xff] }
 0x2e5   :  { %v5781_v17 = vmul.f32 %v5651_v60, %v4750_v41  ;;  %v1243_v3 = vadd.f32 %v1242_v58, %v5313_v52  ;;  %3552 = vrcp.f32 %v5766_v47  ;;  %v1171_v14 = vmul.f32 %v5655_v39, %v4748_v48  ;;  %v7095_v60 = vld [vmem:[#allocation4_spill] sm:$0xff] }
 0x2e6   :  { %v3549_v24 = vpop.eup %3548  ;;  %v5788_v0 = vsel %vm78_vm0, %v2510_v21, 0.0  ;;  %v5792_v7 = vmul.f32 %v5768_v12, %v5711_v37  ;;  %v2508_v16 = vmul.f32 %v2422_v10, %v7093_v46  ;;  %v5796_v41 = vmul.f32 %v2464_v5, %v7094_v53 }
 0x2e7   :  { %v5799_v52 = vmul.f32 %v7095_v60, %v2098_v9  ;;  %v2424_v34 = vmul.f32 %v3549_v24, %v5705_v63  ;;  %vm2428_vm2 = vweird.f32 %v5705_v63  ;;  %vm5803_vm6 = vcmp.eq.f32.partialorder %v2432_v32, 8.507059e+37 }
 0x2e8   :  { %v2435_v39 = vor.u32 1.1754944e-38, %v2434_v31  ;;  %v2502_v27 = vand.u32 2147483647, %v5762_v50  ;;  %v2504_v19 = vand.u32 2147483648, %v5762_v50  ;;  %vm2498_vm9 = vweird.f32 %v5762_v50  ;;  %v7100_v31 = vld [vmem:[#allocation18_spill] sm:$0xff] }
 0x2e9   :  { %v2425_v25 = vsub.f32 1.0, %v2424_v34  ;;  %v1235_v26 = vrot.slane %v5644_v43, 4  ;;  %v1244_v30 = vrot.slane %v1243_v3, 4  ;;  %v1252_v36 = vadd.f32 %v5515_v42, %v5472_v22 }
 0x2ea   :  { %v3551_v51 = vpop.eup %3550  ;;  %v2576_v23 = vsel %vm78_vm0, %v2508_v16, 0.0  ;;  %vm2470_vm12 = vweird.f32 %v5766_v47  ;;  %v2474_v28 = vand.u32 2147483647, %v5766_v47  ;;  %v2476_v29 = vand.u32 2147483648, %v5766_v47 }
 0x2eb   :  { %v3553_v1 = vpop.eup %3552  ;;  %v2426_v59 = vmul.f32 %v3549_v24, %v2425_v25  ;;  %vm2429_vm10 = vweird.f32 %v3549_v24  ;;  %v2494_v49 = vmul.f32 %v3551_v51, %v5762_v50  ;;  %v1236_v56 = vadd.f32 %v1235_v26, %v5644_v43 }
 0x2ec   :  { %vm2499_vm14 = vweird.f32 %v3551_v51  ;;  %vm5819_vm8 = vcmp.eq.f32.partialorder %v2502_v27, 8.507059e+37  ;;  %v2466_v22 = vmul.f32 %v3553_v1, %v5766_v47  ;;  %v1245_v42 = vadd.f32 %v1244_v30, %v1243_v3  ;;  %vm2430_vm1 = vmor %vm2428_vm2, %vm2429_vm10 }
 0x2ed   :  { %v1259_v40 = vsel %vm78_vm0, %v5539_v45, 0.0  ;;  %v2427_v35 = vadd.f32 %v3549_v24, %v2426_v59  ;;  %v2495_v54 = vsub.f32 1.0, %v2494_v49  ;;  %v1237_v57 = vrot.slane %v1236_v56, 2  ;;  %vm2500_vm5 = vmor %vm2498_vm9, %vm2499_vm14 }
 0x2ee   :  { %v1253_v62 = vrot.slane %v1252_v36, 4  ;;  %v2467_v58 = vsub.f32 1.0, %v2466_v22  ;;  %vm2471_vm13 = vweird.f32 %v3553_v1  ;;  %v1246_v43 = vrot.slane %v1245_v42, 2 }
 0x2ef   :  { %v1260_v21 = vsel %vm78_vm0, %v1171_v14, 0.0  ;;  %v2431_v13 = vsel %vm2430_vm1, %v3549_v24, %v2427_v35  ;;  %v2496_v6 = vmul.f32 %v3551_v51, %v2495_v54  ;;  %v1238_v5 = vadd.f32 %v1237_v57, %v1236_v56  ;;  %vm2472_vm11 = vmor %vm2470_vm12, %vm2471_vm13 }
 0x2f0   :  { %v1254_v38 = vadd.f32 %v1253_v62, %v1252_v36  ;;  %v2436_v32 = vsel %vm5803_vm6, %v2435_v39, %v2431_v13  ;;  %v2468_v45 = vmul.f32 %v3553_v1, %v2467_v58  ;;  %v1247_v9 = vadd.f32 %v1246_v43, %v1245_v42 }
 0x2f1   :  { %v1261_v10 = vadd.f32 %v1260_v21, %v1259_v40  ;;  %v2509_v3 = vmul.f32 %v2436_v32, %v7100_v31  ;;  %v2497_v46 = vadd.f32 %v3551_v51, %v2496_v6  ;;  %v2505_v63 = vor.u32 1.1754944e-38, %v2504_v19 }
 0x2f2   :  { %v2518_v16 = vrot.slane %v5777_v8, 4  ;;  %v2469_v24 = vadd.f32 %v3553_v1, %v2468_v45  ;;  %v1239_v14 = vrot.slane %v1238_v5, 1  ;;  %v1248_v53 = vrot.slane %v1247_v9, 1 }
 0x2f3   :  { %v1255_v60 = vrot.slane %v1254_v38, 2  ;;  %v2584_v34 = vsel %vm78_vm0, %v2509_v3, 0.0  ;;  %v2501_v48 = vsel %vm2500_vm5, %v3551_v51, %v2497_v46  ;;  %v2477_v39 = vor.u32 1.1754944e-38, %v2476_v29  ;;  %v7101_v51 = vld [vmem:[#allocation23_spill] sm:$0xff] }
 0x2f4   :  { %v1262_v27 = vrot.slane %v1261_v10, 4  ;;  %v2577_v19 = vadd.f32 %v2576_v23, %v5633_v44  ;;  %v2586_v25 = vadd.f32 %v5788_v0, %v2584_v34  ;;  %v2473_v26 = vsel %vm2472_vm11, %v3553_v1, %v2469_v24 }
 0x2f5   :  { %vm2475_vm2 = vcmp.eq.f32.partialorder %v2474_v28, 8.507059e+37  ;;  %v2506_v50 = vsel %vm5819_vm8, %v2505_v63, %v2501_v48  ;;  %v5844_v36 = vadd.f32 %v1239_v14, %v1238_v5  ;;  %v5846_v59 = vadd.f32 %v1248_v53, %v1247_v9  ;;  %v7102_v9 = vld [vmem:[#allocation19_spill] sm:$0xff] }
 0x2f6   :  { %v2478_v30 = vsel %vm2475_vm2, %v2477_v39, %v2473_v26  ;;  %v1256_v47 = vadd.f32 %v1255_v60, %v1254_v38  ;;  %v1263_v56 = vadd.f32 %v1262_v27, %v1261_v10  ;;  %v2519_v29 = vadd.f32 %v2518_v16, %v5777_v8 }
 0x2f7   :  { %v2512_v49 = vmul.f32 %v2478_v30, %v7101_v51  ;;  %v1377_v44 = vsel %vm1272_vm15, %v5846_v59, %v5844_v36  ;;  %v2527_v0 = vrot.slane %v5566_v2, 4  ;;  %v2535_v23 = vadd.f32 %v5439_v4, %v5486_v15 }
 0x2f8   :  { %v2542_v28 = vsel %vm78_vm0, %v5316_v18, 0.0  ;;  %v1257_v33 = vrot.slane %v1256_v47, 1  ;;  %v1264_v22 = vrot.slane %v1263_v56, 2  ;;  %v2520_v42 = vrot.slane %v2519_v29, 2 }
 0x2f9   :  { %v2594_v1 = vsel %vm78_vm0, %v2512_v49, 0.0  ;;  %v2528_v40 = vadd.f32 %v2527_v0, %v5566_v2  ;;  %v2536_v8 = vrot.slane %v2535_v23, 4  ;;  %v2543_v35 = vsel %vm78_vm0, %v5799_v52, 0.0 }
 0x2fa   :  { %v2578_v54 = vrot.slane %v2577_v19, 4  ;;  %v5862_v57 = vadd.f32 %v1257_v33, %v1256_v47  ;;  %v1265_v62 = vadd.f32 %v1264_v22, %v1263_v56  ;;  %v2521_v58 = vadd.f32 %v2520_v42, %v2519_v29 }
 0x2fb   :  { %v2544_v4 = vadd.f32 %v2543_v35, %v2542_v28  ;;  %v2529_v15 = vrot.slane %v2528_v40, 2  ;;  %v2537_v43 = vadd.f32 %v2536_v8, %v2535_v23  ;;  %v2587_v21 = vrot.slane %v2586_v25, 4 }
 0x2fc   :  { %v2579_v18 = vadd.f32 %v2578_v54, %v2577_v19  ;;  %v2593_v13 = vsel %vm78_vm0, %v5796_v41, 0.0  ;;  %v1266_v6 = vrot.slane %v1265_v62, 1  ;;  %v2522_v5 = vrot.slane %v2521_v58, 1 }
 0x2fd   :  { %v2545_v2 = vrot.slane %v2544_v4, 4  ;;  %v1378_v38 = vsel %vm1274_vm3, %v5862_v57, %v1377_v44  ;;  %v2530_v52 = vadd.f32 %v2529_v15, %v2528_v40  ;;  %v2538_v32 = vrot.slane %v2537_v43, 2 }
 0x2fe   :  { %v2588_v45 = vadd.f32 %v2587_v21, %v2586_v25  ;;  %v2514_v10 = vmul.f32 %v2506_v50, %v7102_v9  ;;  %v5869_v31 = vadd.f32 %v1266_v6, %v1265_v62  ;;  %v2595_v46 = vadd.f32 %v2594_v1, %v2593_v13  ;;  %v2675_v25 = vpop.xlane.xlu1 %2674 }
 0x2ff   :  { %v2546_v3 = vadd.f32 %v2545_v2, %v2544_v4  ;;  %v2531_v63 = vrot.slane %v2530_v52, 1  ;;  %v2539_v16 = vadd.f32 %v2538_v32, %v2537_v43  ;;  %v2580_v24 = vrot.slane %v2579_v18, 2 }
 0x300   :  { %v2589_v14 = vrot.slane %v2588_v45, 2  ;;  %v1379_v41 = vsel %vm1276_vm4, %v5869_v31, %v1378_v38  ;;  %v5873_v53 = vadd.f32 %v2522_v5, %v2521_v58  ;;  %v2596_v34 = vrot.slane %v2595_v46, 4 }
 0x301   :  { %v2547_v60 = vrot.slane %v2546_v3, 2  ;;  %v1381_v48 = vsel %vm1279_vm7, %v1379_v41, 0.0  ;;  %v5876_v39 = vadd.f32 %v2531_v63, %v2530_v52  ;;  %v2540_v27 = vrot.slane %v2539_v16, 1  ;;  %v7105_v41 = vld [vmem:[#allocation5_spill] sm:$0xff] }
 0x302   :  { %v2602_v19 = vsel %vm78_vm0, %v5781_v17, 0.0  ;;  %1382 = vadd.xlane.f32.xlu1 %v1381_v48  ;;  %v2590_v50 = vadd.f32 %v2589_v14, %v2588_v45  ;;  %v2597_v30 = vadd.f32 %v2596_v34, %v2595_v46  ;;  %v2603_v51 = vsel %vm78_vm0, %v2514_v10, 0.0  ;;  %v7106_v48 = vld [vmem:[#allocation2_spill] sm:$0xff] }
 0x303   :  { %v2548_v26 = vadd.f32 %v2547_v60, %v2546_v3  ;;  %v1344_v49 = vsub.f32 1.0, %v5792_v7  ;;  %v2581_v47 = vadd.f32 %v2580_v24, %v2579_v18  ;;  %v2604_v56 = vadd.f32 %v2603_v51, %v2602_v19 }
 0x304   :  { %v2615_v44 = vsel %vm1272_vm15, %v5876_v39, %v5873_v53  ;;  %v2598_v0 = vrot.slane %v2597_v30, 2  ;;  %v5885_v23 = vadd.f32 1e-08, %v2675_v25  ;;  %v5887_v17 = vadd.f32 %v2540_v27, %v2539_v16 }
 0x305   :  { %v2549_v29 = vrot.slane %v2548_v26, 1  ;;  %v2591_v28 = vrot.slane %v2590_v50, 1  ;;  %v2605_v1 = vrot.slane %v2604_v56, 4  ;;  %v3612_v33 = vmov 0  }
 0x306   :  { %3351 = vset.pattern.permute.xlu1 %v3612_v33  ;;  %3349 = vset.pattern.permute.xlu0 %v3612_v33  ;;  %v2599_v7 = vadd.f32 %v2598_v0, %v2597_v30  ;;  %v1345_v42 = vmul.f32 %v5768_v12, %v1344_v49  ;;  %v2616_v40 = vsel %vm1274_vm3, %v5887_v17, %v2615_v44  ;;  %v2582_v8 = vrot.slane %v2581_v47, 1  ;;  %v7107_v30 = vld [vmem:[#allocation9_spill] sm:$0xff] }
 0x307   :  { %v5889_v22 = vadd.f32 %v2549_v29, %v2548_v26  ;;  %3350 = vset.pattern.permute.xlu2 %v3612_v33  ;;  %v2606_v35 = vadd.f32 %v2605_v1, %v2604_v56  ;;  %3554 = vrcp.f32 %v5885_v23  ;;  %v5898_v4 = vadd.f32 %v2591_v28, %v2590_v50  ;;  %v7108_v56 = vld [vmem:[#allocation13_spill] sm:$0xff]  ;;  %v7109_v28 = vld [vmem:[#allocation12_spill] sm:$0xff]  ;;  %v7110_v33 = vld [vmem:[#allocation3_spill] sm:$0xff] }
 0x308   :  { %v2600_v62 = vrot.slane %v2599_v7, 1  ;;  %vm1348_vm6 = vweird.f32 %v5768_v12  ;;  %v5903_v18 = vadd.f32 %v2582_v8, %v2581_v47  ;;  %v1346_v13 = vadd.f32 %v5768_v12, %v1345_v42  ;;  %v7111_v42 = vld [vmem:[#allocation15_spill] sm:$0xff]  ;;  %v7112_v8 = vld [vmem:[#allocation16_spill] sm:$0xff] }
 0x309   :  { %v2617_v54 = vsel %vm1276_vm4, %v5889_v22, %v2616_v40  ;;  %v2607_v15 = vrot.slane %v2606_v35, 2  ;;  %v1353_v6 = vand.u32 2147483648, %v5711_v37  ;;  %vm1347_vm9 = vweird.f32 %v5711_v37 }
 0x30a   :  { %v2619_v58 = vsel %vm1279_vm7, %v2617_v54, 0.0  ;;  %v5900_v43 = vadd.f32 %v2600_v62, %v2599_v7  ;;  %v2712_v2 = vsel %vm1272_vm15, %v5898_v4, %v5903_v18  ;;  %v1351_v38 = vand.u32 2147483647, %v5711_v37  ;;  %vm1349_vm12 = vmor %vm1347_vm9, %vm1348_vm6  ;;  %v7113_v54 = vld [vmem:[#allocation8_spill] sm:$0xff] }
 0x30b   :  { %2620 = vadd.xlane.f32.xlu0 %v2619_v58  ;;  %v2608_v21 = vadd.f32 %v2607_v15, %v2606_v35  ;;  %v1350_v9 = vsel %vm1349_vm12, %v5768_v12, %v1346_v13  ;;  %v1354_v10 = vor.u32 1.1754944e-38, %v1353_v6  ;;  %v2688_v25 = vand.u32 2147483648, %v5885_v23  ;;  %v7114_v58 = vld [vmem:[#allocation20_spill] sm:$0xff]  ;;  %v7115_v13 = vld [vmem:[#allocation21_spill] sm:$0xff] }
 0x30c   :  { %7103 = vst [vmem:[#allocation14_spill] sm:$0xff] %v5900_v43  ;;  %v2713_v52 = vsel %vm1274_vm3, %v5900_v43, %v2712_v2  ;;  %vm1352_vm10 = vcmp.eq.f32.partialorder %v1351_v38, 8.507059e+37  ;;  %vm2682_vm8 = vweird.f32 %v5885_v23  ;;  %v2686_v50 = vand.u32 2147483647, %v5885_v23  ;;  %v7117_v38 = vld [vmem:[#allocation22_spill] sm:$0xff] }
 0x30d   :  { %v2609_v5 = vrot.slane %v2608_v21, 1  ;;  %v3555_v32 = vpop.eup %3554  ;;  %v1355_v16 = vsel %vm1352_vm10, %v1354_v10, %v1350_v9  ;;  %v2689_v47 = vor.u32 1.1754944e-38, %v2688_v25  ;;  %v7118_v9 = vld [vmem:[#allocation25_spill] sm:$0xff] }
 0x30e   :  { %v2678_v46 = vmul.f32 %v3555_v32, %v5885_v23  ;;  %v1358_v37 = vperm.slane %v1355_v16, 1  ;;  %v1357_v14 = vperm.slane %v1355_v16, 0  ;;  %v1359_v27 = vperm.slane %v1355_v16, 2 }
 0x30f   :  { %v5914_v45 = vadd.f32 %v2609_v5, %v2608_v21  ;;  %vm2683_vm14 = vweird.f32 %v3555_v32  ;;  %v1360_v26 = vperm.slane %v1355_v16, 3  ;;  %vm2687_vm1 = vcmp.eq.f32.partialorder %v2686_v50, 8.507059e+37  ;;  %v7116_v5 = vld [vmem:[#allocation10_spill] sm:$0xff] }
 0x310   :  { %v2679_v24 = vsub.f32 1.0, %v2678_v46  ;;  %v1367_v60 = vmul.f32 %v1358_v37, %v7105_v41  ;;  %v1365_v12 = vmul.f32 %v1357_v14, %v7106_v48  ;;  %v1369_v51 = vmul.f32 %v1359_v27, %v7107_v30 }
 0x311   :  { %7104 = vst [vmem:[#allocation11_spill] sm:$0xff] %v5914_v45  ;;  %v2714_v3 = vsel %vm1276_vm4, %v5914_v45, %v2713_v52  ;;  %v1371_v29 = vmul.f32 %v1360_v26, %v7108_v56  ;;  %v1372_v1 = vmul.f32 %v1360_v26, %v7109_v28  ;;  %v1366_v7 = vmul.f32 %v1357_v14, %v7110_v33  ;;  %v6401_v45 = vld [vmem:[%s6885_s0 + $0x38] sm:$0xff] }
 0x312   :  { %v2716_v63 = vsel %vm1279_vm7, %v2714_v3, 0.0  ;;  %v2680_v34 = vmul.f32 %v3555_v32, %v2679_v24  ;;  %vm2684_vm7 = vmor %vm2682_vm8, %vm2683_vm14  ;;  %v1368_v62 = vmul.f32 %v1358_v37, %v7113_v54  ;;  %v1370_v2 = vmul.f32 %v1359_v27, %v7116_v5  ;;  %v7119_v3 = vld [vmem:[#allocation17_spill] sm:$0xff]  ;;  %7146 = vst [vmem:[#allocation21_spill] sm:$0xff] %v6401_v45 }
 0x313   :  { %2717 = vadd.xlane.f32.xlu2 %v2716_v63  ;;  %v7120_v63 = vld [vmem:[#allocation24_spill] sm:$0xff]  ;;  %v5979_v54 = vld [vmem:[%s6886_s1 + $0x38] sm:$0xff] }
 0x314   :  { %v2681_v19 = vadd.f32 %v3555_v32, %v2680_v34 }
 0x316   :  { %v2685_v49 = vsel %vm2684_vm7, %v3555_v32, %v2681_v19 }
 0x317   :  { %v2690_v44 = vsel %vm2687_vm1, %v2689_v47, %v2685_v49  ;;  %v5945_v47 = vld [vmem:[%s6886_s1 + $0x8] sm:$0xff] }
 0x318   :  { %v2692_v0 = vperm.slane %v2690_v44, 0  ;;  %v2693_v40 = vperm.slane %v2690_v44, 1  ;;  %v2694_v21 = vperm.slane %v2690_v44, 2  ;;  %v2695_v32 = vperm.slane %v2690_v44, 3 }
 0x31a   :  { %v2700_v23 = vmul.f32 %v2692_v0, %v7111_v42  ;;  %v2701_v35 = vmul.f32 %v2692_v0, %v7112_v8  ;;  %v2703_v15 = vmul.f32 %v2693_v40, %v7114_v58  ;;  %v2704_v6 = vmul.f32 %v2694_v21, %v7115_v13  ;;  %v5952_v0 = vld [vmem:[%s6886_s1 + $0x10] sm:$0xff] }
 0x31b   :  { %1426 = vperm.xlu1 %3351, %v1367_v60   ;;  %v2705_v52 = vmul.f32 %v2694_v21, %v7117_v38  ;;  %v2707_v10 = vmul.f32 %v2695_v32, %v7118_v9  ;;  %v2702_v46 = vmul.f32 %v2693_v40, %v7119_v3  ;;  %v2706_v16 = vmul.f32 %v2695_v32, %v7120_v63  ;;  %v5972_v40 = vld [vmem:[%s6886_s1 + $0x28] sm:$0xff]  ;;  %v6003_v9 = vld [vmem:[%s6886_s1 + $0x50] sm:$0xff] }
 0x31f   :  { %1420 = vperm.xlu0 %3349, %v1365_v12  }
 0x323   :  { %1432 = vperm.xlu1 %3351, %v1369_v51  }
 0x327   :  { %1438 = vperm.xlu0 %3349, %v1371_v29  }
 0x32b   :  { %1441 = vperm.xlu1 %3351, %v1372_v1   ;;  %1423 = vperm.xlu2 %3350, %v1366_v7   ;;  %v5966_v7 = vld [vmem:[%s6886_s1] sm:$0xff] }
 0x32f   :  { %2755 = vperm.xlu0 %3349, %v2700_v23  }
 0x333   :  { %2758 = vperm.xlu1 %3351, %v2701_v35   ;;  %1429 = vperm.xlu2 %3350, %v1368_v62  }
 0x337   :  { %2764 = vperm.xlu0 %3349, %v2703_v15  }
 0x33b   :  { %2767 = vperm.xlu1 %3351, %v2704_v6   ;;  %1435 = vperm.xlu2 %3350, %v1370_v2  }
 0x33f   :  { %2770 = vperm.xlu0 %3349, %v2705_v52   ;;  %v5997_v52 = vld [vmem:[%s6886_s1 + $0x40] sm:$0xff] }
 0x343   :  { %2776 = vperm.xlu1 %3351, %v2707_v10   ;;  %2761 = vperm.xlu2 %3350, %v2702_v46  }
 0x34b   :  { %2773 = vperm.xlu2 %3350, %v2706_v16  }
 0x34c   :  { %v1282_v37 = vpop.xlane.xlu0 %1281 }
 0x34d   :  { %v1283_v24 = vadd.f32 1e-08, %v1282_v37 }
 0x34f   :  { %3556 = vrcp.f32 %v1283_v24  ;;  %v1295_v34 = vand.u32 2147483648, %v1283_v24  ;;  %v1293_v12 = vand.u32 2147483647, %v1283_v24  ;;  %vm1289_vm5 = vweird.f32 %v1283_v24 }
 0x351   :  { %v1296_v19 = vor.u32 1.1754944e-38, %v1295_v34  ;;  %vm1294_vm2 = vcmp.eq.f32.partialorder %v1293_v12, 8.507059e+37  ;;  %v6016_v34 = vld [vmem:[%s6886_s1 + $0x30] sm:$0xff] }
 0x355   :  { %v3557_v14 = vpop.eup %3556 }
 0x356   :  { %v1285_v41 = vmul.f32 %v3557_v14, %v1283_v24  ;;  %vm1290_vm13 = vweird.f32 %v3557_v14 }
 0x357   :  { %vm1291_vm11 = vmor %vm1289_vm5, %vm1290_vm13  ;;  %vm7126_vm13 = vcmask 130112  }
 0x358   :  { %v1286_v60 = vsub.f32 1.0, %v1285_v41  ;;  %vm7128_vm5 = vmmov %vm7126_vm13 }
 0x35a   :  { %v1287_v48 = vmul.f32 %v3557_v14, %v1286_v60 }
 0x35c   :  { %v1288_v27 = vadd.f32 %v3557_v14, %v1287_v48  ;;  %v6022_v48 = vld [vmem:[%s6886_s1 + $0x58] sm:$0xff] }
 0x35e   :  { %v1292_v25 = vsel %vm1291_vm11, %v3557_v14, %v1288_v27  ;;  %vm7132_vm11 = vmmov %vm7128_vm5 }
 0x35f   :  { %v1297_v26 = vsel %vm1294_vm2, %v1296_v19, %v1292_v25  ;;  %v6028_v19 = vld [vmem:[%s6886_s1 + $0x68] sm:$0xff]  ;;  %vm7136_vm2 = vmmov %vm7128_vm5 }
 0x360   :  { %v1306_v50 = vmul.f32 %v1297_v26, %v5657_v55  ;;  %v1299_v30 = vrot.slane %v1297_v26, 1  ;;  %v1300_v23 = vrot.slane %v1297_v26, 2  ;;  %v1301_v38 = vrot.slane %v1297_v26, 3 }
 0x362   :  { %v1551_v51 = vperm.slane %v1306_v50, 0  ;;  %v1307_v49 = vmul.f32 %v1299_v30, %v5640_v20  ;;  %v5958_v20 = vld [vmem:[%s6886_s1 + $0x20] sm:$0xff]  ;;  %v1308_v35 = vmul.f32 %v1300_v23, %v5653_v61  ;;  %v5990_v61 = vld [vmem:[%s6886_s1 + $0x18] sm:$0xff]  ;;  %v1309_v46 = vmul.f32 %v1301_v38, %v5680_v11 }
 0x364   :  { %v1556_v56 = vmul.f32 %v5945_v47, %v1551_v51  ;;  %v1552_v44 = vperm.slane %v1307_v49, 0  ;;  %v1557_v55 = vmul.f32 %v5952_v0, %v1551_v51  ;;  %v1555_v42 = vmul.f32 %v5966_v7, %v1551_v51 }
 0x365   :  { %v1553_v21 = vperm.slane %v1308_v35, 0  ;;  %v1558_v2 = vmul.f32 %v5990_v61, %v1551_v51  ;;  %v6011_v60 = vperm.slane %v1309_v46, 0  ;;  %v6068_v46 = vld [vmem:[%s6886_s1 + $0x60] sm:$0xff] }
 0x366   :  { %v1574_v29 = vsel %vm78_vm0, %v1556_v56, 0.0  ;;  %v1559_v28 = vmul.f32 %v5958_v20, %v1552_v44  ;;  %v1577_v1 = vsel %vm78_vm0, %v1557_v55, 0.0  ;;  %v1560_v8 = vmul.f32 %v5972_v40, %v1552_v44 }
 0x367   :  { %v1562_v62 = vmul.f32 %v5979_v54, %v1552_v44  ;;  %v1571_v58 = vsel %vm78_vm0, %v1555_v42, 0.0  ;;  %v1563_v32 = vmul.f32 %v5997_v52, %v1553_v21  ;;  %v1565_v10 = vmul.f32 %v6003_v9, %v1553_v21 }
 0x368   :  { %v1583_v33 = vsel %vm78_vm0, %v1559_v28, 0.0  ;;  %v1586_v15 = vsel %vm78_vm0, %v1560_v8, 0.0  ;;  %v1580_v3 = vsel %vm78_vm0, %v1558_v2, 0.0  ;;  %v1561_v11 = vmul.f32 %v6016_v34, %v1552_v44  ;;  %v6040_v44 = vld [vmem:[%s6886_s1 + $0x48] sm:$0xff]  ;;  %v6046_v28 = vld [vmem:[%s6886_s1 + $0x70] sm:$0xff] }
 0x369   :  { %1575 = vadd.xlane.f32.xlu0 %v1574_v29  ;;  %v1592_v5 = vsel %vm78_vm0, %v1562_v62, 0.0  ;;  %v1595_v63 = vsel %vm78_vm0, %v1563_v32, 0.0  ;;  %v1601_v41 = vsel %vm78_vm0, %v1565_v10, 0.0  ;;  %v1566_v12 = vmul.f32 %v6022_v48, %v1553_v21 }
 0x36a   :  { %v1568_v25 = vmul.f32 %v6028_v19, %v6011_v60  ;;  %v1589_v26 = vsel %vm78_vm0, %v1561_v11, 0.0  ;;  %v1564_v55 = vmul.f32 %v6040_v44, %v1553_v21 }
 0x36b   :  { %v1604_v50 = vsel %vm78_vm0, %v1566_v12, 0.0 }
 0x36c   :  { %v1610_v29 = vsel %vm78_vm0, %v1568_v25, 0.0  ;;  %v6088_v25 = vld [vmem:[%s6887_s2 + $0x10] sm:$0xff] }
 0x36d   :  { %1578 = vadd.xlane.f32.xlu1 %v1577_v1  ;;  %v1569_v1 = vmul.f32 %v6046_v28, %v6011_v60 }
 0x371   :  { %1584 = vadd.xlane.f32.xlu0 %v1583_v33 }
 0x374   :  { %1572 = vadd.xlane.f32.xlu2 %v1571_v58 }
 0x375   :  { %v1383_v13 = vpop.xlane.xlu1 %1382  ;;  %1587 = vadd.xlane.f32.xlu1 %v1586_v15  ;;  %v1598_v15 = vsel %vm78_vm0, %v1564_v55, 0.0 }
 0x376   :  { %v5984_v6 = vadd.f32 1e-08, %v1383_v13  ;;  %v1613_v13 = vsel %vm78_vm0, %v1569_v1, 0.0 }
 0x378   :  { %3558 = vrcp.f32 %v5984_v6  ;;  %vm1390_vm9 = vweird.f32 %v5984_v6  ;;  %v1394_v23 = vand.u32 2147483647, %v5984_v6  ;;  %v1396_v8 = vand.u32 2147483648, %v5984_v6 }
 0x379   :  { %1593 = vadd.xlane.f32.xlu0 %v1592_v5 }
 0x37a   :  { %vm1395_vm7 = vcmp.eq.f32.partialorder %v1394_v23, 8.507059e+37 }
 0x37c   :  { %1581 = vadd.xlane.f32.xlu2 %v1580_v3 }
 0x37d   :  { %1596 = vadd.xlane.f32.xlu1 %v1595_v63  ;;  %v1567_v63 = vmul.f32 %v6068_v46, %v6011_v60 }
 0x37e   :  { %v2621_v16 = vpop.xlane.xlu0 %2620  ;;  %v3559_v37 = vpop.eup %3558 }
 0x37f   :  { %v2622_v24 = vadd.f32 1e-08, %v2621_v16  ;;  %v1386_v14 = vmul.f32 %v3559_v37, %v5984_v6  ;;  %vm1391_vm6 = vweird.f32 %v3559_v37  ;;  %v1397_v6 = vor.u32 1.1754944e-38, %v1396_v8 }
 0x380   :  { %vm6054_vm10 = vmor %vm1390_vm9, %vm1391_vm6  ;;  %v1607_v11 = vsel %vm78_vm0, %v1567_v63, 0.0 }
 0x381   :  { %3560 = vrcp.f32 %v2622_v24  ;;  %1602 = vadd.xlane.f32.xlu0 %v1601_v41  ;;  %v1387_v27 = vsub.f32 1.0, %v1386_v14  ;;  %v2634_v35 = vand.u32 2147483648, %v2622_v24  ;;  %v2632_v58 = vand.u32 2147483647, %v2622_v24  ;;  %vm7139_vm6 = vmmov %vm7136_vm2 }
 0x382   :  { %vm2628_vm14 = vweird.f32 %v2622_v24  ;;  %vm7141_vm9 = vmmov %vm7136_vm2 }
 0x383   :  { %v1388_v30 = vmul.f32 %v3559_v37, %v1387_v27  ;;  %v2635_v32 = vor.u32 1.1754944e-38, %v2634_v35  ;;  %vm2633_vm1 = vcmp.eq.f32.partialorder %v2632_v58, 8.507059e+37 }
 0x384   :  { %1590 = vadd.xlane.f32.xlu2 %v1589_v26 }
 0x385   :  { %1605 = vadd.xlane.f32.xlu1 %v1604_v50  ;;  %v1389_v33 = vadd.f32 %v3559_v37, %v1388_v30 }
 0x386   :  { %v6034_v49 = vpop.xlane.xlu2 %2717 }
 0x387   :  { %v3561_v51 = vpop.eup %3560  ;;  %v1393_v5 = vsel %vm6054_vm10, %v3559_v37, %v1389_v33 }
 0x388   :  { %v2624_v56 = vmul.f32 %v3561_v51, %v2622_v24  ;;  %vm2629_vm12 = vweird.f32 %v3561_v51  ;;  %v6076_v24 = vsel %vm1395_vm7, %v1397_v6, %v1393_v5  ;;  %v6133_v5 = vld [vmem:[%s6887_s2 + $0x20] sm:$0xff] }
 0x389   :  { %1611 = vadd.xlane.f32.xlu0 %v1610_v29  ;;  %vm2630_vm8 = vmor %vm2628_vm14, %vm2629_vm12  ;;  %v1407_v12 = vmul.f32 %v6076_v24, %v5844_v36  ;;  %v6102_v36 = vld [vmem:[%s6886_s1 + $0x78] sm:$0xff]  ;;  %7123 = vst [vmem:[#allocation4_spill] sm:$0xff] %v6133_v5 }
 0x38a   :  { %v2625_v42 = vsub.f32 1.0, %v2624_v56  ;;  %vm7143_vm12 = vmmov %vm7136_vm2 }
 0x38b   :  { %v1619_v55 = vperm.slane %v1407_v12, 0 }
 0x38c   :  { %v2626_v62 = vmul.f32 %v3561_v51, %v2625_v42  ;;  %1599 = vadd.xlane.f32.xlu2 %v1598_v15 }
 0x38d   :  { %v6061_v38 = vpop.permute.xlu1 %1426  ;;  %1614 = vadd.xlane.f32.xlu1 %v1613_v13  ;;  %v1623_v42 = vmul.f32 %v5966_v7, %v1619_v55  ;;  %v1624_v23 = vmul.f32 %v5945_v47, %v1619_v55  ;;  %v6124_v7 = vld [vmem:[%s6887_s2] sm:$0xff]  ;;  %v1626_v13 = vmul.f32 %v5990_v61, %v1619_v55  ;;  %v6145_v61 = vld [vmem:[%s6887_s2 + $0x18] sm:$0xff] }
 0x38e   :  { %v2627_v2 = vadd.f32 %v3561_v51, %v2626_v62  ;;  %v6063_v10 = vpop.permute.xlu2 %1423 }
 0x38f   :  { %v1639_v58 = vsel %vm78_vm0, %v1623_v42, 0.0  ;;  %v1642_v15 = vsel %vm78_vm0, %v1624_v23, 0.0 }
 0x390   :  { %v2631_v3 = vsel %vm2630_vm8, %v3561_v51, %v2627_v2  ;;  %v1570_v51 = vmul.f32 %v6102_v36, %v6011_v60 }
 0x391   :  { %v6072_v16 = vpop.permute.xlu0 %1420  ;;  %v6074_v37 = vsel %vm2633_vm1, %v2635_v32, %v2631_v3  ;;  %v1648_v3 = vsel %vm78_vm0, %v1626_v13, 0.0  ;;  %v1625_v13 = vmul.f32 %v5952_v0, %v1619_v55  ;;  %v6180_v0 = vld [vmem:[%s6887_s2 + $0x40] sm:$0xff]  ;;  %vm7147_vm1 = vmmov %vm7136_vm2 }
 0x392   :  { %v2645_v14 = vmul.f32 %v6074_v37, %v5873_v53  ;;  %v6094_v53 = vld [vmem:[%s6887_s2 + $0x8] sm:$0xff]  ;;  %v2638_v1 = vrot.slane %v6074_v37, 1  ;;  %v1616_v8 = vsel %vm78_vm0, %v1570_v51, 0.0  ;;  %7129 = vst [vmem:[#allocation23_spill] sm:$0xff] %v6180_v0 }
 0x394   :  { %v2882_v41 = vperm.slane %v2645_v14, 0  ;;  %1608 = vadd.xlane.f32.xlu2 %v1607_v11  ;;  %v2646_v35 = vmul.f32 %v2638_v1, %v5876_v39  ;;  %v7124_v11 = vld [vmem:[#allocation6_spill] sm:$0xff]  ;;  %v6153_v1 = vld [vmem:[%s6887_s2 + $0x28] sm:$0xff] }
 0x395   :  { %v6083_v27 = vpop.permute.xlu1 %1432 }
 0x396   :  { %v2888_v26 = vmul.f32 %v6088_v25, %v2882_v41  ;;  %v2887_v50 = vmul.f32 %v6094_v53, %v2882_v41  ;;  %v6097_v30 = vpop.permute.xlu2 %1429  ;;  %v2883_v21 = vperm.slane %v2646_v35, 0  ;;  %v2886_v47 = vmul.f32 %v6124_v7, %v2882_v41 }
 0x398   :  { %v2908_v56 = vsel %vm78_vm0, %v2888_v26, 0.0  ;;  %v2905_v29 = vsel %vm78_vm0, %v2887_v50, 0.0  ;;  %v2890_v2 = vmul.f32 %v6133_v5, %v2883_v21  ;;  %v2902_v6 = vsel %vm78_vm0, %v2886_v47, 0.0 }
 0x399   :  { %2909 = vadd.xlane.f32.xlu0 %v2908_v56  ;;  %2906 = vadd.xlane.f32.xlu1 %v2905_v29  ;;  %v6109_v33 = vpop.permute.xlu0 %1438  ;;  %v2889_v26 = vmul.f32 %v6145_v61, %v2882_v41  ;;  %v2639_v50 = vrot.slane %v6074_v37, 2  ;;  %v7125_v56 = vld [vmem:[#allocation7_spill] sm:$0xff]  ;;  %v2891_v42 = vmul.f32 %v6153_v1, %v2883_v21  ;;  %v6162_v41 = vld [vmem:[%s6887_s2 + $0x38] sm:$0xff] }
 0x39a   :  { %v2914_v14 = vsel %vm78_vm0, %v2890_v2, 0.0  ;;  %7127 = vst [vmem:[#allocation18_spill] sm:$0xff] %v6162_v41 }
 0x39b   :  { %v2911_v35 = vsel %vm78_vm0, %v2889_v26, 0.0  ;;  %v2917_v47 = vsel %vm78_vm0, %v2891_v42, 0.0 }
 0x39c   :  { %1617 = vadd.xlane.f32.xlu2 %v1616_v8  ;;  %v2893_v8 = vmul.f32 %v6162_v41, %v2883_v21 }
 0x39d   :  { %v6115_v60 = vpop.permute.xlu1 %1441 }
 0x39e   :  { %v6117_v62 = vpop.permute.xlu2 %1435 }
 0x3a1   :  { %1640 = vadd.xlane.f32.xlu0 %v1639_v58  ;;  %1643 = vadd.xlane.f32.xlu1 %v1642_v15  ;;  %v6127_v39 = vpop.permute.xlu0 %2755  ;;  %v2647_v58 = vmul.f32 %v2639_v50, %v5887_v17  ;;  %v1645_v17 = vsel %vm78_vm0, %v1625_v13, 0.0  ;;  %v6197_v13 = vld [vmem:[%s6887_s2 + $0x30] sm:$0xff] }
 0x3a2   :  { %7131 = vst [vmem:[#allocation5_spill] sm:$0xff] %v6197_v13 }
 0x3a4   :  { %2903 = vadd.xlane.f32.xlu2 %v2902_v6  ;;  %v2923_v6 = vsel %vm78_vm0, %v2893_v8, 0.0 }
 0x3a5   :  { %v6137_v32 = vpop.permute.xlu1 %2758 }
 0x3a6   :  { %v2762_v63 = vpop.permute.xlu2 %2761 }
 0x3a7   :  { %v2781_v12 = vperm.slane %v2762_v63, %v7124_v11  ;;  %v2640_v63 = vrot.slane %v6074_v37, 3  ;;  %v6186_v37 = vld [vmem:[%s6887_s2 + $0x50] sm:$0xff] }
 0x3a8   :  { %7130 = vst [vmem:[#allocation19_spill] sm:$0xff] %v6186_v37 }
 0x3a9   :  { %1649 = vadd.xlane.f32.xlu0 %v1648_v3  ;;  %2915 = vadd.xlane.f32.xlu1 %v2914_v14  ;;  %v2765_v51 = vpop.permute.xlu0 %2764  ;;  %v2884_v3 = vperm.slane %v2647_v58, 0 }
 0x3aa   :  { %v2782_v29 = vperm.slane %v2765_v51, %v7125_v56 }
 0x3ab   :  { %v2894_v55 = vmul.f32 %v6180_v0, %v2884_v3  ;;  %v2896_v51 = vmul.f32 %v6186_v37, %v2884_v3 }
 0x3ac   :  { %v6157_v23 = vsel %vm7126_vm13, %v2782_v29, %v2781_v12  ;;  %2912 = vadd.xlane.f32.xlu2 %v2911_v35  ;;  %v2648_v29 = vmul.f32 %v2640_v63, %v5889_v22  ;;  %vm7148_vm13 = vmmov %vm7147_vm1 }
 0x3ad   :  { %v2768_v15 = vpop.permute.xlu1 %2767  ;;  %v2926_v58 = vsel %vm78_vm0, %v2894_v55, 0.0 }
 0x3ae   :  { %v2784_v2 = vperm.slane %v2768_v15, %v7124_v11  ;;  %v2774_v26 = vpop.permute.xlu2 %2773  ;;  %v2932_v15 = vsel %vm78_vm0, %v2896_v51, 0.0 }
 0x3af   :  { %v2787_v42 = vperm.slane %v2774_v26, %v7124_v11  ;;  %v1444_v26 = vperm.slane %v6063_v10, %v7125_v56  ;;  %v6232_v10 = vld [vmem:[%s6887_s2 + $0x70] sm:$0xff] }
 0x3b0   :  { %7137 = vst [vmem:[#allocation12_spill] sm:$0xff] %v6232_v10 }
 0x3b1   :  { %2918 = vadd.xlane.f32.xlu0 %v2917_v47  ;;  %2924 = vadd.xlane.f32.xlu1 %v2923_v6  ;;  %v2771_v14 = vpop.permute.xlu0 %2770  ;;  %v2885_v47 = vperm.slane %v2648_v29, 0  ;;  %v6206_v6 = vld [vmem:[%s6887_s2 + $0x58] sm:$0xff]  ;;  %v6225_v29 = vld [vmem:[%s6887_s2 + $0x48] sm:$0xff] }
 0x3b2   :  { %v2785_v12 = vperm.slane %v2771_v14, %v7125_v56  ;;  %7133 = vst [vmem:[#allocation2_spill] sm:$0xff] %v6206_v6  ;;  %v2897_v63 = vmul.f32 %v6206_v6, %v2884_v3  ;;  %v6212_v14 = vld [vmem:[%s6887_s2 + $0x68] sm:$0xff]  ;;  %v6343_v6 = vadd.f32 1e-08, %v6034_v49 }
 0x3b3   :  { %7134 = vst [vmem:[#allocation9_spill] sm:$0xff] %v6212_v14 }
 0x3b4   :  { %v6175_v50 = vsel %vm7128_vm5, %v2785_v12, %v2784_v2  ;;  %1646 = vadd.xlane.f32.xlu2 %v1645_v17  ;;  %v2892_v2 = vmul.f32 %v6197_v13, %v2883_v21  ;;  %v2899_v12 = vmul.f32 %v6212_v14, %v2885_v47  ;;  %v1443_v17 = vperm.slane %v6072_v16, %v7124_v11  ;;  %v6375_v14 = vld [vmem:[%s6885_s0 + $0x20] sm:$0xff] }
 0x3b5   :  { %v2777_v8 = vpop.permute.xlu1 %2776  ;;  %v2935_v55 = vsel %vm78_vm0, %v2897_v63, 0.0  ;;  %7135 = vst [vmem:[#allocation13_spill] sm:$0xff] %v6225_v29  ;;  %v2900_v16 = vmul.f32 %v6232_v10, %v2885_v47  ;;  %3562 = vrcp.f32 %v6343_v6  ;;  %vm2725_vm14 = vweird.f32 %v6343_v6 }
 0x3b6   :  { %v2788_v35 = vperm.slane %v2777_v8, %v7125_v56  ;;  %v2920_v21 = vsel %vm78_vm0, %v2892_v2, 0.0  ;;  %v2941_v51 = vsel %vm78_vm0, %v2899_v12, 0.0  ;;  %v1445_v8 = vsel %vm7136_vm2, %v1444_v26, %v1443_v17 }
 0x3b7   :  { %v1446_v2 = vperm.slane %v6061_v38, %v7124_v11  ;;  %v2944_v63 = vsel %vm78_vm0, %v2900_v16, 0.0  ;;  %v6260_v38 = vld [vmem:[%s6885_s0 + $0x30] sm:$0xff]  ;;  %v1450_v16 = vperm.slane %v6117_v62, %v7125_v56  ;;  %vm3039_vm5 = vcmask 195712  }
 0x3b8   :  { %v6201_v22 = vsel %vm7132_vm11, %v2788_v35, %v2787_v42  ;;  %v2895_v42 = vmul.f32 %v6225_v29, %v2884_v3  ;;  %v6238_v35 = vld [vmem:[%s6885_s0 + $0x10] sm:$0xff]  ;;  %vm7149_vm11 = vmmov %vm7147_vm1  ;;  %vm3043_vm2 = vcmask 261312  }
 0x3b9   :  { %2927 = vadd.xlane.f32.xlu0 %v2926_v58  ;;  %2933 = vadd.xlane.f32.xlu1 %v2932_v15  ;;  %v1489_v58 = vmul.f32 %v6238_v35, %v1445_v8  ;;  %v1447_v15 = vperm.slane %v6097_v30, %v7125_v56 }
 0x3ba   :  { %v2929_v3 = vsel %vm78_vm0, %v2895_v42, 0.0 }
 0x3bb   :  { %v1509_v12 = vsel %vm78_vm0, %v1489_v58, 0.0  ;;  %v6255_v17 = vsel %vm7139_vm6, %v1447_v15, %v1446_v2  ;;  %v1449_v58 = vperm.slane %v6083_v27, %v7124_v11  ;;  %v6280_v2 = vld [vmem:[%s6887_s2 + $0x78] sm:$0xff]  ;;  %v6289_v27 = vld [vmem:[%s6885_s0 + $0x48] sm:$0xff]  ;;  %vm7150_vm6 = vmmov %vm7147_vm1 }
 0x3bc   :  { %2921 = vadd.xlane.f32.xlu2 %v2920_v21  ;;  %v6251_v21 = vld [vmem:[%s6887_s2 + $0x60] sm:$0xff]  ;;  %v1493_v30 = vmul.f32 %v6260_v38, %v6255_v17  ;;  %7140 = vst [vmem:[#allocation15_spill] sm:$0xff] %v6280_v2 }
 0x3bd   :  { %7138 = vst [vmem:[#allocation3_spill] sm:$0xff] %v6251_v21  ;;  %v2898_v26 = vmul.f32 %v6251_v21, %v2885_v47  ;;  %v1400_v21 = vrot.slane %v6076_v24, 1 }
 0x3be   :  { %7142 = vst [vmem:[#allocation16_spill] sm:$0xff] %v6289_v27 }
 0x3bf   :  { %v2938_v42 = vsel %vm78_vm0, %v2898_v26, 0.0  ;;  %v6296_v26 = vld [vmem:[%s6885_s0 + $0x28] sm:$0xff] }
 0x3c1   :  { %2936 = vadd.xlane.f32.xlu0 %v2935_v55  ;;  %2942 = vadd.xlane.f32.xlu1 %v2941_v51  ;;  %v6267_v55 = vld [vmem:[%s6885_s0 + $0x8] sm:$0xff] }
 0x3c2   :  { %v1488_v51 = vmul.f32 %v6267_v55, %v1445_v8 }
 0x3c4   :  { %2930 = vadd.xlane.f32.xlu2 %v2929_v3  ;;  %v1521_v3 = vsel %vm78_vm0, %v1493_v30, 0.0  ;;  %v1506_v15 = vsel %vm78_vm0, %v1488_v51, 0.0  ;;  %v1453_v51 = vperm.slane %v6115_v60, %v7125_v56 }
 0x3c9   :  { %2945 = vadd.xlane.f32.xlu0 %v2944_v63  ;;  %1510 = vadd.xlane.f32.xlu1 %v1509_v12  ;;  %v2901_v63 = vmul.f32 %v6280_v2, %v2885_v47  ;;  %v6284_v12 = vsel %vm7141_vm9, %v1450_v16, %v1449_v58  ;;  %v1492_v47 = vmul.f32 %v6296_v26, %v6255_v17  ;;  %vm7151_vm9 = vmmov %vm7147_vm1 }
 0x3ca   :  { %v1496_v62 = vmul.f32 %v6289_v27, %v6284_v12 }
 0x3cb   :  { %v2947_v30 = vsel %vm78_vm0, %v2901_v63, 0.0  ;;  %v1518_v58 = vsel %vm78_vm0, %v1492_v47, 0.0  ;;  %v6328_v47 = vld [vmem:[%s6885_s0 + $0x60] sm:$0xff] }
 0x3cc   :  { %2939 = vadd.xlane.f32.xlu2 %v2938_v42  ;;  %v1452_v42 = vperm.slane %v6109_v33, %v7124_v11  ;;  %v1530_v16 = vsel %vm78_vm0, %v1496_v62, 0.0  ;;  %v6321_v33 = vld [vmem:[%s6885_s0 + $0x40] sm:$0xff]  ;;  %7144 = vst [vmem:[#allocation8_spill] sm:$0xff] %v6328_v47 }
 0x3cd   :  { %v1495_v62 = vmul.f32 %v6321_v33, %v6284_v12 }
 0x3ce   :  { %v6314_v63 = vsel %vm7143_vm12, %v1453_v51, %v1452_v42  ;;  %vm3070_vm12 = vcmask 257024  }
 0x3cf   :  { %v1527_v42 = vsel %vm78_vm0, %v1495_v62, 0.0  ;;  %v6350_v62 = vld [vmem:[%s6885_s0 + $0x58] sm:$0xff] }
 0x3d1   :  { %1522 = vadd.xlane.f32.xlu1 %v1521_v3  ;;  %1507 = vadd.xlane.f32.xlu0 %v1506_v15  ;;  %v6310_v3 = vld [vmem:[%s6885_s0] sm:$0xff] }
 0x3d2   :  { %v1487_v15 = vmul.f32 %v6310_v3, %v1445_v8 }
 0x3d4   :  { %2948 = vadd.xlane.f32.xlu2 %v2947_v30  ;;  %v1499_v30 = vmul.f32 %v6328_v47, %v6314_v63  ;;  %v1503_v51 = vsel %vm78_vm0, %v1487_v15, 0.0 }
 0x3d9   :  { %1531 = vadd.xlane.f32.xlu1 %v1530_v16  ;;  %1519 = vadd.xlane.f32.xlu0 %v1518_v58  ;;  %v1539_v16 = vsel %vm78_vm0, %v1499_v30, 0.0  ;;  %v6338_v58 = vld [vmem:[%s6885_s0 + $0x18] sm:$0xff]  ;;  %v1498_v30 = vmul.f32 %v6350_v62, %v6284_v12 }
 0x3da   :  { %v1490_v10 = vmul.f32 %v6338_v58, %v1445_v8  ;;  %v6357_v8 = vld [vmem:[%s6885_s0 + $0x78] sm:$0xff] }
 0x3db   :  { %7145 = vst [vmem:[#allocation20_spill] sm:$0xff] %v6357_v8  ;;  %v1502_v49 = vmul.f32 %v6357_v8, %v6314_v63  ;;  %v1536_v13 = vsel %vm78_vm0, %v1498_v30, 0.0  ;;  %v6384_v30 = vld [vmem:[%s6885_s0 + $0x70] sm:$0xff] }
 0x3dc   :  { %v6316_v60 = vpop.xlane.xlu0 %1575  ;;  %1504 = vadd.xlane.f32.xlu2 %v1503_v51  ;;  %v1512_v51 = vsel %vm78_vm0, %v1490_v10, 0.0 }
 0x3dd   :  { %v1548_v2 = vsel %vm78_vm0, %v1502_v49, 0.0  ;;  %v1501_v49 = vmul.f32 %v6384_v30, %v6314_v63 }
 0x3df   :  { %v1545_v29 = vsel %vm78_vm0, %v1501_v49, 0.0 }
 0x3e0   :  { %v6345_v15 = vpop.xlane.xlu1 %1578 }
 0x3e1   :  { %1528 = vadd.xlane.f32.xlu0 %v1527_v42  ;;  %1540 = vadd.xlane.f32.xlu1 %v1539_v16  ;;  %v1408_v42 = vmul.f32 %v1400_v21, %v5846_v59  ;;  %v1491_v59 = vmul.f32 %v6375_v14, %v6255_v17  ;;  %v3563_v21 = vpop.eup %3562 }
 0x3e2   :  { %vm2726_vm10 = vweird.f32 %v3563_v21 }
 0x3e3   :  { %v6370_v5 = vperm.slane %v1408_v42, 0  ;;  %v1515_v42 = vsel %vm78_vm0, %v1491_v59, 0.0  ;;  %v1401_v59 = vrot.slane %v6076_v24, 2  ;;  %vm2727_vm8 = vmor %vm2725_vm14, %vm2726_vm10 }
 0x3e4   :  { %1513 = vadd.xlane.f32.xlu2 %v1512_v51  ;;  %v6364_v16 = vpop.xlane.xlu0 %1584  ;;  %vm7152_vm10 = vmmov %vm7147_vm1 }
 0x3e5   :  { %v1627_v51 = vmul.f32 %v5958_v20, %v6370_v5  ;;  %v1494_v20 = vmul.f32 %v6401_v45, %v6255_v17  ;;  %v1629_v49 = vmul.f32 %v6016_v34, %v6370_v5  ;;  %v1409_v27 = vmul.f32 %v1401_v59, %v5862_v57  ;;  %vm7156_vm14 = vmmov %vm7147_vm1 }
 0x3e6   :  { %v1402_v17 = vrot.slane %v6076_v24, 3 }
 0x3e7   :  { %v6368_v37 = vpop.xlane.xlu2 %1572  ;;  %v1651_v41 = vsel %vm78_vm0, %v1627_v51, 0.0  ;;  %v1630_v51 = vmul.f32 %v5979_v54, %v6370_v5  ;;  %v1524_v0 = vsel %vm78_vm0, %v1494_v20, 0.0  ;;  %v6424_v54 = vld [vmem:[%s6885_s0 + $0x50] sm:$0xff]  ;;  %v2729_v20 = vand.u32 2147483647, %v6343_v6 }
 0x3e8   :  { %v6379_v10 = vpop.xlane.xlu1 %1587  ;;  %v1497_v57 = vmul.f32 %v6424_v54, %v6284_v12 }
 0x3e9   :  { %1537 = vadd.xlane.f32.xlu0 %v1536_v13  ;;  %1549 = vadd.xlane.f32.xlu1 %v1548_v2  ;;  %v2721_v13 = vmul.f32 %v3563_v21, %v6343_v6  ;;  %vm2730_vm7 = vcmp.eq.f32.partialorder %v2729_v20, 8.507059e+37 }
 0x3eb   :  { %v2722_v47 = vsub.f32 1.0, %v2721_v13  ;;  %v6419_v13 = vperm.slane %v1409_v27, 0  ;;  %v2731_v27 = vand.u32 2147483648, %v6343_v6 }
 0x3ec   :  { %1516 = vadd.xlane.f32.xlu2 %v1515_v42  ;;  %v6392_v2 = vpop.xlane.xlu0 %1593 }
 0x3ed   :  { %v2723_v43 = vmul.f32 %v3563_v21, %v2722_v47  ;;  %v1410_v47 = vmul.f32 %v1402_v17, %v5869_v31  ;;  %v1632_v59 = vmul.f32 %v6040_v44, %v6419_v13  ;;  %v1633_v12 = vmul.f32 %v6003_v9, %v6419_v13  ;;  %v6448_v44 = vld [vmem:[%s6885_s0 + $0x68] sm:$0xff] }
 0x3ee   :  { %v1500_v9 = vmul.f32 %v6448_v44, %v6314_v63  ;;  %v6464_v63 = vadd.s32 4294967280, %v7124_v11 }
 0x3ef   :  { %v6396_v8 = vpop.xlane.xlu2 %1581  ;;  %v2724_v24 = vadd.f32 %v3563_v21, %v2723_v43  ;;  %v1669_v31 = vsel %vm78_vm0, %v1633_v12, 0.0  ;;  %v3096_v12 = vperm.slane %v6379_v10, %v7125_v56  ;;  %v3095_v10 = vperm.slane %v6364_v16, %v7124_v11 }
 0x3f0   :  { %v6406_v42 = vpop.xlane.xlu1 %1596 }
 0x3f1   :  { %1546 = vadd.xlane.f32.xlu0 %v1545_v29  ;;  %1652 = vadd.xlane.f32.xlu1 %v1651_v41  ;;  %v1657_v29 = vsel %vm78_vm0, %v1629_v49, 0.0  ;;  %v1660_v41 = vsel %vm78_vm0, %v1630_v51, 0.0  ;;  %v1533_v49 = vsel %vm78_vm0, %v1497_v57, 0.0  ;;  %v2728_v43 = vsel %vm2727_vm8, %v3563_v21, %v2724_v24  ;;  %vm7157_vm8 = vmmov %vm7147_vm1 }
 0x3f2   :  { %v2732_v51 = vor.u32 1.1754944e-38, %v2731_v27 }
 0x3f4   :  { %1525 = vadd.xlane.f32.xlu2 %v1524_v0  ;;  %v6430_v0 = vpop.xlane.xlu0 %1602  ;;  %v6452_v17 = vsel %vm2730_vm7, %v2732_v51, %v2728_v43  ;;  %v3088_v43 = vperm.slane %v6368_v37, %v7124_v11  ;;  %vm7159_vm7 = vmmov %vm7147_vm1 }
 0x3f5   :  { %v2742_v20 = vmul.f32 %v6452_v17, %v5903_v18  ;;  %v3102_v18 = vperm.slane %v6406_v42, %v7124_v11  ;;  %v3097_v42 = vsel %vm7148_vm13, %v3096_v12, %v3095_v10  ;;  %v3105_v16 = vperm.slane %v6430_v0, %v6464_v63  ;;  %vm7173_vm13 = vmmov %vm7147_vm1 }
 0x3f7   :  { %v6417_v45 = vpop.xlane.xlu2 %1590 }
 0x3f8   :  { %v6428_v34 = vpop.xlane.xlu1 %1605  ;;  %v3098_v51 = vperm.slane %v6417_v45, %v6464_v63 }
 0x3f9   :  { %1658 = vadd.xlane.f32.xlu0 %v1657_v29  ;;  %1661 = vadd.xlane.f32.xlu1 %v1660_v41  ;;  %v6441_v29 = vperm.slane %v1410_v47, 0  ;;  %v1666_v41 = vsel %vm78_vm0, %v1632_v59, 0.0  ;;  %v1542_v47 = vsel %vm78_vm0, %v1500_v9, 0.0 }
 0x3fb   :  { %v1635_v57 = vmul.f32 %v6068_v46, %v6441_v29  ;;  %v1636_v24 = vmul.f32 %v6028_v19, %v6441_v29  ;;  %v1628_v19 = vmul.f32 %v5972_v40, %v6370_v5  ;;  %v2779_v40 = vperm.slane %v6137_v32, %v7125_v56 }
 0x3fc   :  { %1534 = vadd.xlane.f32.xlu2 %v1533_v49  ;;  %v1612_v27 = vpop.xlane.xlu0 %1611  ;;  %v3089_v5 = vperm.slane %v6316_v60, %v7125_v56  ;;  %v1638_v45 = vmul.f32 %v6102_v36, %v6441_v29  ;;  %v3099_v32 = vsel %vm3039_vm5, %v3098_v51, %v3097_v42 }
 0x3fd   :  { %v1675_v46 = vsel %vm78_vm0, %v1635_v57, 0.0  ;;  %v1678_v49 = vsel %vm78_vm0, %v1636_v24, 0.0  ;;  %v1654_v36 = vsel %vm78_vm0, %v1628_v19, 0.0 }
 0x3fe   :  { %v3090_v57 = vsel %vm7149_vm11, %v3089_v5, %v3088_v43  ;;  %vm7174_vm11 = vmmov %vm7147_vm1 }
 0x3ff   :  { %v1600_v6 = vpop.xlane.xlu2 %1599 }
 0x400   :  { %v6454_v21 = vpop.xlane.xlu1 %1614  ;;  %v3103_v59 = vperm.slane %v1600_v6, %v7125_v56  ;;  %v6484_v6 = vadd.s32 4294967272, %v7124_v11 }
 0x401   :  { %1667 = vadd.xlane.f32.xlu0 %v1666_v41  ;;  %1670 = vadd.xlane.f32.xlu1 %v1669_v31  ;;  %v6479_v31 = vperm.slane %v2742_v20, 0 }
 0x402   :  { %v3104_v37 = vsel %vm7147_vm1, %v3103_v59, %v3102_v18  ;;  %v3100_v20 = vperm.slane %v6392_v2, %v6484_v6  ;;  %v3093_v0 = vperm.slane %v6396_v8, %v6484_v6  ;;  %v3110_v59 = vperm.slane %v1612_v27, %v7125_v56 }
 0x403   :  { %v3106_v12 = vsel %vm3039_vm5, %v3105_v16, %v3104_v37  ;;  %v1684_v8 = vsel %vm78_vm0, %v1638_v45, 0.0  ;;  %v1631_v27 = vmul.f32 %v5997_v52, %v6419_v13  ;;  %v2955_v16 = vmul.f32 %v6094_v53, %v6479_v31 }
 0x404   :  { %1543 = vadd.xlane.f32.xlu2 %v1542_v47  ;;  %v2954_v47 = vmul.f32 %v6124_v7, %v6479_v31  ;;  %v3107_v7 = vperm.slane %v6428_v34, %v6484_v6  ;;  %v3101_v2 = vsel %vm3043_vm2, %v3100_v20, %v3099_v32 }
 0x405   :  { %v2973_v20 = vsel %vm78_vm0, %v2955_v16, 0.0 }
 0x406   :  { %v2970_v18 = vsel %vm78_vm0, %v2954_v47, 0.0 }
 0x407   :  { %v1609_v41 = vpop.xlane.xlu2 %1608 }
 0x408   :  { %v3109_v9 = vperm.slane %v1609_v41, %v7124_v11 }
 0x409   :  { %1676 = vadd.xlane.f32.xlu0 %v1675_v46  ;;  %1679 = vadd.xlane.f32.xlu1 %v1678_v49  ;;  %v2778_v46 = vperm.slane %v6127_v39, %v7124_v11  ;;  %v3091_v49 = vperm.slane %v6345_v15, %v6464_v63  ;;  %v3112_v39 = vperm.slane %v6454_v21, %v6464_v63 }
 0x40a   :  { %v3111_v19 = vsel %vm7150_vm6, %v3110_v59, %v3109_v9  ;;  %v3108_v15 = vsel %vm3043_vm2, %v3107_v7, %v3106_v12  ;;  %vm7175_vm6 = vmmov %vm7147_vm1 }
 0x40b   :  { %v3092_v43 = vsel %vm3039_vm5, %v3091_v49, %v3090_v57  ;;  %v6529_v34 = vsel %vm7151_vm9, %v2779_v40, %v2778_v46  ;;  %v3113_v5 = vsel %vm3039_vm5, %v3112_v39, %v3111_v19  ;;  %v1663_v57 = vsel %vm78_vm0, %v1631_v27, 0.0 }
 0x40c   :  { %v6499_v24 = vpop.xlane.xlu1 %2906  ;;  %v6501_v60 = vpop.xlane.xlu0 %2909  ;;  %1655 = vadd.xlane.f32.xlu2 %v1654_v36  ;;  %v3094_v41 = vsel %vm3043_vm2, %v3093_v0, %v3092_v43  ;;  %v2820_v9 = vmul.f32 %v6238_v35, %v6529_v34  ;;  %v1634_v35 = vmul.f32 %v6022_v48, %v6419_v13  ;;  %v2956_v46 = vmul.f32 %v6088_v25, %v6479_v31 }
 0x40d   :  { %v3116_v52 = vsel %vm1272_vm15, %v3101_v2, %v3094_v41  ;;  %v2823_v49 = vmul.f32 %v6296_v26, %v6157_v23  ;;  %v1637_v48 = vmul.f32 %v6046_v28, %v6441_v29  ;;  %v2818_v26 = vmul.f32 %v6310_v3, %v6529_v34 }
 0x40e   :  { %v3117_v37 = vsel %vm1274_vm3, %v3108_v15, %v3116_v52  ;;  %v2840_v53 = vsel %vm78_vm0, %v2820_v9, 0.0  ;;  %v1672_v7 = vsel %vm78_vm0, %v1634_v35, 0.0  ;;  %v2976_v2 = vsel %vm78_vm0, %v2956_v46, 0.0 }
 0x40f   :  { %v1618_v51 = vpop.xlane.xlu2 %1617  ;;  %v2849_v19 = vsel %vm78_vm0, %v2823_v49, 0.0  ;;  %v2826_v27 = vmul.f32 %v6321_v33, %v6175_v50  ;;  %v1681_v43 = vsel %vm78_vm0, %v1637_v48, 0.0  ;;  %v2834_v39 = vsel %vm78_vm0, %v2818_v26, 0.0 }
 0x410   :  { %v3114_v10 = vperm.slane %v1618_v51, %v6484_v6  ;;  %v2957_v29 = vmul.f32 %v6145_v61, %v6479_v31  ;;  %v2821_v52 = vmul.f32 %v6338_v58, %v6529_v34  ;;  %v2829_v61 = vmul.f32 %v6350_v62, %v6175_v50 }
 0x411   :  { %1685 = vadd.xlane.f32.xlu0 %v1684_v8  ;;  %2971 = vadd.xlane.f32.xlu1 %v2970_v18  ;;  %v2858_v15 = vsel %vm78_vm0, %v2826_v27, 0.0  ;;  %v2824_v62 = vmul.f32 %v6260_v38, %v6157_v23  ;;  %v2832_v9 = vmul.f32 %v6384_v30, %v6201_v22  ;;  %v7153_v30 = vld [vmem:[#allocation14_spill] sm:$0xff] }
 0x412   :  { %v3115_v21 = vsel %vm3043_vm2, %v3114_v10, %v3113_v5  ;;  %v2979_v31 = vsel %vm78_vm0, %v2957_v29, 0.0  ;;  %v2735_v5 = vrot.slane %v6452_v17, 1 }
 0x413   :  { %v3118_v40 = vsel %vm1276_vm4, %v3115_v21, %v3117_v37  ;;  %v2843_v21 = vsel %vm78_vm0, %v2821_v52, 0.0  ;;  %v2867_v37 = vsel %vm78_vm0, %v2829_v61, 0.0 }
 0x414   :  { %v1644_v45 = vpop.xlane.xlu1 %1643  ;;  %v1641_v42 = vpop.xlane.xlu0 %1640  ;;  %3342 = vst.msk [vmem:[%s6888_s3 + $0x4] sm:$0xf] %vm3070_vm12, %v3118_v40  ;;  %1664 = vadd.xlane.f32.xlu2 %v1663_v57  ;;  %v2743_v58 = vmul.f32 %v2735_v5, %v5898_v4 }
 0x415   :  { %v3139_v32 = vperm.slane %v1644_v45, %v7125_v56  ;;  %v3138_v47 = vperm.slane %v1641_v42, %v7124_v11  ;;  %v2819_v42 = vmul.f32 %v6267_v55, %v6529_v34  ;;  %v2852_v55 = vsel %vm78_vm0, %v2824_v62, 0.0 }
 0x416   :  { %v2876_v34 = vsel %vm78_vm0, %v2832_v9, 0.0  ;;  %v2737_v62 = vrot.slane %v6452_v17, 3 }
 0x417   :  { %v3140_v36 = vsel %vm7152_vm10, %v3139_v32, %v3138_v47  ;;  %v6552_v0 = vpop.xlane.xlu2 %2903  ;;  %v2837_v57 = vsel %vm78_vm0, %v2819_v42, 0.0  ;;  %v6606_v32 = vperm.slane %v2743_v58, 0  ;;  %v2736_v47 = vrot.slane %v6452_v17, 2 }
 0x418   :  { %v3238_v26 = vperm.slane %v6552_v0, %v7124_v11  ;;  %v3241_v42 = vperm.slane %v6501_v60, %v6464_v63 }
 0x419   :  { %2974 = vadd.xlane.f32.xlu0 %v2973_v20  ;;  %2841 = vadd.xlane.f32.xlu1 %v2840_v53  ;;  %v2959_v38 = vmul.f32 %v6153_v1, %v6606_v32  ;;  %v2744_v20 = vmul.f32 %v2736_v47, %v7153_v30  ;;  %v7155_v1 = vld [vmem:[#allocation21_spill] sm:$0xff] }
 0x41a   :  { %v2825_v48 = vmul.f32 %v7155_v1, %v6157_v23 }
 0x41c   :  { %v6556_v59 = vpop.xlane.xlu1 %2915  ;;  %v1650_v12 = vpop.xlane.xlu0 %1649  ;;  %1673 = vadd.xlane.f32.xlu2 %v1672_v7  ;;  %v2855_v5 = vsel %vm78_vm0, %v2825_v48, 0.0 }
 0x41d   :  { %v3143_v3 = vperm.slane %v1650_v12, %v6484_v6  ;;  %v7154_v12 = vld [vmem:[#allocation16_spill] sm:$0xff] }
 0x41e   :  { %v2827_v46 = vmul.f32 %v7154_v12, %v6175_v50 }
 0x41f   :  { %v6565_v8 = vpop.xlane.xlu2 %2912 }
 0x421   :  { %2977 = vadd.xlane.f32.xlu0 %v2976_v2  ;;  %2850 = vadd.xlane.f32.xlu1 %v2849_v19  ;;  %v2985_v2 = vsel %vm78_vm0, %v2959_v38, 0.0  ;;  %v6625_v19 = vperm.slane %v2744_v20, 0  ;;  %v7161_v38 = vld [vmem:[#allocation11_spill] sm:$0xff] }
 0x422   :  { %v2745_v30 = vmul.f32 %v2737_v62, %v7161_v38 }
 0x424   :  { %v6569_v13 = vpop.xlane.xlu1 %2924  ;;  %v6571_v25 = vpop.xlane.xlu0 %2918  ;;  %1682 = vadd.xlane.f32.xlu2 %v1681_v43 }
 0x427   :  { %v1647_v28 = vpop.xlane.xlu2 %1646 }
 0x428   :  { %v3141_v18 = vperm.slane %v1647_v28, %v6464_v63  ;;  %v3239_v28 = vperm.slane %v6499_v24, %v7125_v56  ;;  %v7160_v24 = vld [vmem:[#allocation8_spill] sm:$0xff] }
 0x429   :  { %2835 = vadd.xlane.f32.xlu0 %v2834_v39  ;;  %2859 = vadd.xlane.f32.xlu1 %v2858_v15  ;;  %v2861_v39 = vsel %vm78_vm0, %v2827_v46, 0.0  ;;  %v7162_v46 = vld [vmem:[#allocation20_spill] sm:$0xff] }
 0x42a   :  { %v3142_v51 = vsel %vm3039_vm5, %v3141_v18, %v3140_v36  ;;  %v2822_v36 = vmul.f32 %v6375_v14, %v6157_v23  ;;  %v3246_v14 = vperm.slane %v6571_v25, %v7125_v56  ;;  %v3245_v25 = vperm.slane %v6556_v59, %v7124_v11 }
 0x42b   :  { %v6588_v10 = vsel %vm3043_vm2, %v3143_v3, %v3142_v51  ;;  %v7158_v3 = vld [vmem:[#allocation23_spill] sm:$0xff] }
 0x42c   :  { %v6585_v33 = vpop.xlane.xlu1 %2933  ;;  %v2928_v41 = vpop.xlane.xlu0 %2927  ;;  %2980 = vadd.xlane.f32.xlu2 %v2979_v31  ;;  %v2846_v49 = vsel %vm78_vm0, %v2822_v36, 0.0  ;;  %v3247_v29 = vsel %vm7157_vm8, %v3246_v14, %v3245_v25  ;;  %v2962_v51 = vmul.f32 %v7158_v3, %v6625_v19  ;;  %v2830_v31 = vmul.f32 %v7160_v24, %v6201_v22  ;;  %v7164_v25 = vld [vmem:[#allocation13_spill] sm:$0xff]  ;;  %v7167_v24 = vld [vmem:[#allocation19_spill] sm:$0xff] }
 0x42d   :  { %v3252_v27 = vperm.slane %v2928_v41, %v7124_v11  ;;  %v3255_v0 = vperm.slane %v6585_v33, %v6464_v63  ;;  %v3240_v41 = vsel %vm7159_vm7, %v3239_v28, %v3238_v26  ;;  %v3250_v33 = vperm.slane %v6569_v13, %v6484_v6 }
 0x42e   :  { %v2994_v13 = vsel %vm78_vm0, %v2962_v51, 0.0  ;;  %v2870_v60 = vsel %vm78_vm0, %v2830_v31, 0.0  ;;  %v2963_v28 = vmul.f32 %v7164_v25, %v6625_v19  ;;  %v2964_v31 = vmul.f32 %v7167_v24, %v6625_v19 }
 0x42f   :  { %v2922_v45 = vpop.xlane.xlu2 %2921 }
 0x430   :  { %v3248_v43 = vperm.slane %v2922_v45, %v6464_v63 }
 0x431   :  { %2844 = vadd.xlane.f32.xlu0 %v2843_v21  ;;  %2868 = vadd.xlane.f32.xlu1 %v2867_v37  ;;  %v3243_v21 = vperm.slane %v6565_v8, %v6484_v6  ;;  %v2828_v8 = vmul.f32 %v6424_v54, %v6175_v50 }
 0x432   :  { %v3249_v59 = vsel %vm3039_vm5, %v3248_v43, %v3247_v29  ;;  %v2831_v43 = vmul.f32 %v6448_v44, %v6201_v22 }
 0x433   :  { %v3251_v9 = vsel %vm3043_vm2, %v3250_v33, %v3249_v59 }
 0x434   :  { %v2943_v40 = vpop.xlane.xlu1 %2942  ;;  %v2937_v16 = vpop.xlane.xlu0 %2936  ;;  %2838 = vadd.xlane.f32.xlu2 %v2837_v57 }
 0x435   :  { %v3260_v37 = vperm.slane %v2943_v40, %v7125_v56  ;;  %v3257_v58 = vperm.slane %v2937_v16, %v6484_v6  ;;  %v3242_v40 = vsel %vm3039_vm5, %v3241_v42, %v3240_v41 }
 0x436   :  { %v3244_v17 = vsel %vm3043_vm2, %v3243_v21, %v3242_v40 }
 0x437   :  { %v2931_v4 = vpop.xlane.xlu2 %2930 }
 0x438   :  { %v3253_v7 = vperm.slane %v2931_v4, %v7125_v56  ;;  %v3266_v4 = vsel %vm1272_vm15, %v3251_v9, %v3244_v17 }
 0x439   :  { %2853 = vadd.xlane.f32.xlu0 %v2852_v55  ;;  %2877 = vadd.xlane.f32.xlu1 %v2876_v34 }
 0x43a   :  { %v3254_v23 = vsel %vm7156_vm14, %v3253_v7, %v3252_v27  ;;  %v7163_v7 = vld [vmem:[#allocation18_spill] sm:$0xff]  ;;  %v2953_v27 = vperm.slane %v2745_v30, 0 }
 0x43b   :  { %v3256_v45 = vsel %vm3039_vm5, %v3255_v0, %v3254_v23  ;;  %v2961_v14 = vmul.f32 %v7163_v7, %v6606_v32  ;;  %v7165_v23 = vld [vmem:[#allocation9_spill] sm:$0xff]  ;;  %v2873_v0 = vsel %vm78_vm0, %v2831_v43, 0.0 }
 0x43c   :  { %v6616_v53 = vpop.xlane.xlu1 %1510  ;;  %v2946_v35 = vpop.xlane.xlu0 %2945  ;;  %2847 = vadd.xlane.f32.xlu2 %v2846_v49  ;;  %v3258_v55 = vsel %vm3043_vm2, %v3257_v58, %v3256_v45  ;;  %v2833_v49 = vmul.f32 %v7162_v46, %v6201_v22  ;;  %v2967_v29 = vmul.f32 %v7165_v23, %v2953_v27  ;;  %v7166_v22 = vld [vmem:[#allocation4_spill] sm:$0xff]  ;;  %v7169_v58 = vld [vmem:[#allocation5_spill] sm:$0xff] }
 0x43d   :  { %v3262_v47 = vperm.slane %v2946_v35, %v6464_v63  ;;  %v3267_v54 = vsel %vm1274_vm3, %v3258_v55, %v3266_v4  ;;  %v2991_v48 = vsel %vm78_vm0, %v2961_v14, 0.0  ;;  %v2958_v44 = vmul.f32 %v7166_v22, %v6606_v32 }
 0x43e   :  { %v2879_v1 = vsel %vm78_vm0, %v2833_v49, 0.0  ;;  %v3009_v3 = vsel %vm78_vm0, %v2967_v29, 0.0  ;;  %v2960_v62 = vmul.f32 %v7169_v58, %v6606_v32 }
 0x43f   :  { %v2940_v15 = vpop.xlane.xlu2 %2939  ;;  %v2982_v21 = vsel %vm78_vm0, %v2958_v44, 0.0 }
 0x440   :  { %v3259_v18 = vperm.slane %v2940_v15, %v7124_v11  ;;  %v2988_v40 = vsel %vm78_vm0, %v2960_v62, 0.0 }
 0x441   :  { %2862 = vadd.xlane.f32.xlu0 %v2861_v39  ;;  %2986 = vadd.xlane.f32.xlu1 %v2985_v2  ;;  %v2864_v2 = vsel %vm78_vm0, %v2828_v8, 0.0 }
 0x442   :  { %v3261_v57 = vsel %vm7147_vm1, %v3260_v37, %v3259_v18  ;;  %v2997_v18 = vsel %vm78_vm0, %v2963_v28, 0.0  ;;  %v3000_v37 = vsel %vm78_vm0, %v2964_v31, 0.0 }
 0x443   :  { %v3263_v36 = vsel %vm3039_vm5, %v3262_v47, %v3261_v57 }
 0x444   :  { %v6647_v52 = vpop.xlane.xlu1 %1522  ;;  %v6649_v61 = vpop.xlane.xlu0 %1507  ;;  %2856 = vadd.xlane.f32.xlu2 %v2855_v5  ;;  %v7168_v5 = vld [vmem:[#allocation15_spill] sm:$0xff] }
 0x445   :  { %v2969_v33 = vmul.f32 %v7168_v5, %v2953_v27 }
 0x447   :  { %v2949_v16 = vpop.xlane.xlu2 %2948  ;;  %v3015_v45 = vsel %vm78_vm0, %v2969_v33, 0.0 }
 0x448   :  { %v3264_v34 = vperm.slane %v2949_v16, %v6484_v6 }
 0x449   :  { %2871 = vadd.xlane.f32.xlu0 %v2870_v60  ;;  %2995 = vadd.xlane.f32.xlu1 %v2994_v13  ;;  %v7170_v13 = vld [vmem:[#allocation2_spill] sm:$0xff]  ;;  %v7171_v60 = vld [vmem:[#allocation3_spill] sm:$0xff] }
 0x44a   :  { %v3265_v50 = vsel %vm3043_vm2, %v3264_v34, %v3263_v36  ;;  %v2965_v8 = vmul.f32 %v7170_v13, %v6625_v19  ;;  %v2966_v16 = vmul.f32 %v7171_v60, %v2953_v27  ;;  %v7172_v36 = vld [vmem:[#allocation12_spill] sm:$0xff] }
 0x44b   :  { %v3268_v12 = vsel %vm1276_vm4, %v3265_v50, %v3267_v54  ;;  %v2968_v50 = vmul.f32 %v7172_v36, %v2953_v27 }
 0x44c   :  { %v6680_v20 = vpop.xlane.xlu1 %1531  ;;  %v6682_v35 = vpop.xlane.xlu0 %1519  ;;  %3345 = vst.msk [vmem:[%s6888_s3 + $0x10] sm:$0xf] %vm3070_vm12, %v3268_v12  ;;  %2865 = vadd.xlane.f32.xlu2 %v2864_v2  ;;  %v3003_v47 = vsel %vm78_vm0, %v2965_v8, 0.0  ;;  %v3006_v34 = vsel %vm78_vm0, %v2966_v16, 0.0  ;;  %v3035_v2 = vperm.slane %v6649_v61, %v7125_v56 }
 0x44d   :  { %v3046_v38 = vperm.slane %v6682_v35, %v7125_v56  ;;  %v3053_v46 = vperm.slane %v6680_v20, %v7125_v56  ;;  %v3012_v14 = vsel %vm78_vm0, %v2968_v50, 0.0  ;;  %v3048_v35 = vperm.slane %v6647_v52, %v6464_v63  ;;  %vm7176_vm0 = vmmov %vm7147_vm1 }
 0x44e   :  { %vm7177_vm9 = vmmov %vm7176_vm0 }
 0x44f   :  { %v1505_v26 = vpop.xlane.xlu2 %1504  ;;  %vm7178_vm10 = vmmov %vm7176_vm0 }
 0x450   :  { %v3034_v30 = vperm.slane %v1505_v26, %v7124_v11  ;;  %vm7179_vm14 = vmmov %vm7176_vm0 }
 0x451   :  { %2880 = vadd.xlane.f32.xlu0 %v2879_v1  ;;  %2992 = vadd.xlane.f32.xlu1 %v2991_v48  ;;  %vm7180_vm8 = vmmov %vm7176_vm0 }
 0x452   :  { %v3036_v20 = vsel %vm7175_vm6, %v3035_v2, %v3034_v30  ;;  %vm7181_vm7 = vmmov %vm7176_vm0 }
 0x453   :  { %vm7182_vm1 = vmmov %vm7176_vm0 }
 0x454   :  { %v6698_v39 = vpop.xlane.xlu1 %1540  ;;  %v1529_v15 = vpop.xlane.xlu0 %1528  ;;  %2874 = vadd.xlane.f32.xlu2 %v2873_v0  ;;  %vm7185_vm6 = vmmov %vm7176_vm0 }
 0x455   :  { %v3052_v54 = vperm.slane %v1529_v15, %v7124_v11  ;;  %v3038_v15 = vperm.slane %v6616_v53, %v6464_v63  ;;  %v3059_v23 = vperm.slane %v6698_v39, %v7124_v11 }
 0x457   :  { %v1514_v51 = vpop.xlane.xlu2 %1513  ;;  %v3054_v26 = vsel %vm7174_vm11, %v3053_v46, %v3052_v54  ;;  %v3040_v0 = vsel %vm3039_vm5, %v3038_v15, %v3036_v20  ;;  %vm7184_vm11 = vmmov %vm7176_vm0 }
 0x458   :  { %v3042_v27 = vperm.slane %v1514_v51, %v6484_v6 }
 0x459   :  { %2998 = vadd.xlane.f32.xlu0 %v2997_v18  ;;  %3010 = vadd.xlane.f32.xlu1 %v3009_v3 }
 0x45a   :  { %v3044_v51 = vsel %vm3043_vm2, %v3042_v27, %v3040_v0 }
 0x45c   :  { %v6708_v41 = vpop.xlane.xlu1 %1549  ;;  %v1538_v59 = vpop.xlane.xlu0 %1537  ;;  %2983 = vadd.xlane.f32.xlu2 %v2982_v21 }
 0x45d   :  { %v3057_v61 = vperm.slane %v1538_v59, %v6484_v6  ;;  %v3064_v53 = vperm.slane %v6708_v41, %v6484_v6 }
 0x45f   :  { %v1517_v42 = vpop.xlane.xlu2 %1516 }
 0x460   :  { %v3045_v19 = vperm.slane %v1517_v42, %v7124_v11 }
 0x461   :  { %3001 = vadd.xlane.f32.xlu0 %v3000_v37  ;;  %3016 = vadd.xlane.f32.xlu1 %v3015_v45 }
 0x462   :  { %v3047_v1 = vsel %vm7173_vm13, %v3046_v38, %v3045_v19  ;;  %vm7183_vm13 = vmmov %vm7176_vm0 }
 0x463   :  { %v3049_v25 = vsel %vm3039_vm5, %v3048_v35, %v3047_v1 }
 0x464   :  { %v6718_v9 = vpop.xlane.xlu1 %1652  ;;  %v1547_v57 = vpop.xlane.xlu0 %1546  ;;  %2989 = vadd.xlane.f32.xlu2 %v2988_v40 }
 0x465   :  { %v3062_v18 = vperm.slane %v1547_v57, %v6464_v63  ;;  %v3145_v40 = vperm.slane %v6718_v9, %v7124_v11 }
 0x467   :  { %v1526_v55 = vpop.xlane.xlu2 %1525 }
 0x468   :  { %v3050_v48 = vperm.slane %v1526_v55, %v6484_v6 }
 0x469   :  { %3004 = vadd.xlane.f32.xlu0 %v3003_v47 }
 0x46a   :  { %v3051_v52 = vsel %vm3043_vm2, %v3050_v48, %v3049_v25 }
 0x46b   :  { %v3066_v44 = vsel %vm1272_vm15, %v3051_v52, %v3044_v51 }
 0x46c   :  { %v6725_v17 = vpop.xlane.xlu1 %1661  ;;  %v6727_v32 = vpop.xlane.xlu0 %1658  ;;  %3007 = vadd.xlane.f32.xlu2 %v3006_v34 }
 0x46d   :  { %v3148_v16 = vperm.slane %v6727_v32, %v6464_v63  ;;  %v3150_v9 = vperm.slane %v6725_v17, %v6484_v6 }
 0x46f   :  { %v1535_v4 = vpop.xlane.xlu2 %1534 }
 0x470   :  { %v3055_v12 = vperm.slane %v1535_v4, %v6464_v63 }
 0x472   :  { %v3056_v43 = vsel %vm3039_vm5, %v3055_v12, %v3054_v26 }
 0x473   :  { %v3058_v3 = vsel %vm3043_vm2, %v3057_v61, %v3056_v43 }
 0x474   :  { %v6739_v49 = vpop.xlane.xlu1 %1670  ;;  %v1668_v7 = vpop.xlane.xlu0 %1667  ;;  %3013 = vadd.xlane.f32.xlu2 %v3012_v14  ;;  %v3067_v31 = vsel %vm1274_vm3, %v3058_v3, %v3066_v44 }
 0x475   :  { %v3153_v34 = vperm.slane %v1668_v7, %v7125_v56  ;;  %v3155_v38 = vperm.slane %v6739_v49, %v6464_v63 }
 0x477   :  { %v1544_v28 = vpop.xlane.xlu2 %1543 }
 0x478   :  { %v3060_v29 = vperm.slane %v1544_v28, %v7125_v56 }
 0x47a   :  { %v3061_v22 = vsel %vm7176_vm0, %v3060_v29, %v3059_v23 }
 0x47b   :  { %v3063_v24 = vsel %vm3039_vm5, %v3062_v18, %v3061_v22 }
 0x47c   :  { %v1680_v39 = vpop.xlane.xlu1 %1679  ;;  %v1677_v59 = vpop.xlane.xlu0 %1676  ;;  %v3065_v5 = vsel %vm3043_vm2, %v3064_v53, %v3063_v24 }
 0x47d   :  { %v3068_v33 = vsel %vm1276_vm4, %v3065_v5, %v3067_v31  ;;  %v3160_v30 = vperm.slane %v1680_v39, %v7125_v56  ;;  %v3159_v32 = vperm.slane %v1677_v59, %v7124_v11 }
 0x47e   :  { %3071 = vst.msk [vmem:[%s6888_s3] sm:$0xf] %vm3070_vm12, %v3068_v33 }
 0x47f   :  { %v1656_v41 = vpop.xlane.xlu2 %1655  ;;  %v3161_v17 = vsel %vm7180_vm8, %v3160_v30, %v3159_v32 }
 0x480   :  { %v3146_v13 = vperm.slane %v1656_v41, %v7125_v56 }
 0x482   :  { %v3147_v60 = vsel %vm7178_vm10, %v3146_v13, %v3145_v40 }
 0x483   :  { %v3149_v36 = vsel %vm3039_vm5, %v3148_v16, %v3147_v60 }
 0x484   :  { %v2972_v21 = vpop.xlane.xlu1 %2971  ;;  %v1686_v37 = vpop.xlane.xlu0 %1685  ;;  %v3151_v7 = vsel %vm3043_vm2, %v3150_v9, %v3149_v36 }
 0x485   :  { %v3288_v58 = vperm.slane %v2972_v21, %v7124_v11  ;;  %v3164_v49 = vperm.slane %v1686_v37, %v6484_v6  ;;  %v3166_v35 = vsel %vm1272_vm15, %v3151_v7, %v6588_v10 }
 0x487   :  { %v1665_v45 = vpop.xlane.xlu2 %1664 }
 0x488   :  { %v3152_v55 = vperm.slane %v1665_v45, %v7124_v11 }
 0x48a   :  { %v3154_v50 = vsel %vm7179_vm14, %v3153_v34, %v3152_v55 }
 0x48b   :  { %v3156_v14 = vsel %vm3039_vm5, %v3155_v38, %v3154_v50 }
 0x48c   :  { %v2975_v42 = vpop.xlane.xlu0 %2974  ;;  %v6777_v62 = vpop.xlane.xlu1 %2841 }
 0x48d   :  { %v3289_v57 = vperm.slane %v2975_v42, %v7125_v56 }
 0x48f   :  { %v3290_v8 = vsel %vm7177_vm9, %v3289_v57, %v3288_v58  ;;  %v1674_v47 = vpop.xlane.xlu2 %1673  ;;  %v3191_v58 = vperm.slane %v6777_v62, %v6464_v63  ;;  %vm7186_vm9 = vmmov %vm7176_vm0 }
 0x490   :  { %v3157_v54 = vperm.slane %v1674_v47, %v6484_v6 }
 0x492   :  { %v3158_v1 = vsel %vm3043_vm2, %v3157_v54, %v3156_v14 }
 0x493   :  { %v3167_v20 = vsel %vm1274_vm3, %v3158_v1, %v3166_v35 }
 0x494   :  { %v2978_v4 = vpop.xlane.xlu0 %2977  ;;  %v2851_v12 = vpop.xlane.xlu1 %2850 }
 0x495   :  { %v3291_v19 = vperm.slane %v2978_v4, %v6464_v63  ;;  %v3196_v5 = vperm.slane %v2851_v12, %v7125_v56 }
 0x497   :  { %v3292_v46 = vsel %vm3039_vm5, %v3291_v19, %v3290_v8  ;;  %v1683_v2 = vpop.xlane.xlu2 %1682 }
 0x498   :  { %v3162_v48 = vperm.slane %v1683_v2, %v6464_v63 }
 0x49a   :  { %v3163_v26 = vsel %vm3039_vm5, %v3162_v48, %v3161_v17 }
 0x49b   :  { %v3165_v43 = vsel %vm3043_vm2, %v3164_v49, %v3163_v26 }
 0x49c   :  { %v2836_v27 = vpop.xlane.xlu0 %2835  ;;  %v3168_v15 = vsel %vm1276_vm4, %v3165_v43, %v3167_v20  ;;  %v2860_v25 = vpop.xlane.xlu1 %2859 }
 0x49d   :  { %3343 = vst.msk [vmem:[%s6888_s3 + $0x8] sm:$0xf] %vm3070_vm12, %v3168_v15  ;;  %v3188_v33 = vperm.slane %v2836_v27, %v7124_v11  ;;  %v3202_v21 = vperm.slane %v2860_v25, %v7124_v11 }
 0x49f   :  { %v2981_v61 = vpop.xlane.xlu2 %2980 }
 0x4a0   :  { %v3293_v28 = vperm.slane %v2981_v61, %v6484_v6 }
 0x4a2   :  { %v6818_v10 = vsel %vm3043_vm2, %v3293_v28, %v3292_v46 }
 0x4a4   :  { %v2845_v23 = vpop.xlane.xlu0 %2844  ;;  %v2869_v29 = vpop.xlane.xlu1 %2868 }
 0x4a5   :  { %v3207_v47 = vperm.slane %v2869_v29, %v6484_v6  ;;  %v3193_v34 = vperm.slane %v2845_v23, %v6484_v6 }
 0x4a7   :  { %v2839_v52 = vpop.xlane.xlu2 %2838 }
 0x4a8   :  { %v3189_v59 = vperm.slane %v2839_v52, %v7125_v56 }
 0x4aa   :  { %v3190_v37 = vsel %vm7181_vm7, %v3189_v59, %v3188_v33 }
 0x4ab   :  { %v3192_v55 = vsel %vm3039_vm5, %v3191_v58, %v3190_v37 }
 0x4ac   :  { %v2854_v0 = vpop.xlane.xlu0 %2853  ;;  %v2878_v53 = vpop.xlane.xlu1 %2877  ;;  %v3194_v9 = vsel %vm3043_vm2, %v3193_v34, %v3192_v55 }
 0x4ad   :  { %v3198_v57 = vperm.slane %v2854_v0, %v6464_v63  ;;  %v3212_v19 = vperm.slane %v2878_v53, %v6464_v63 }
 0x4af   :  { %v2848_v18 = vpop.xlane.xlu2 %2847 }
 0x4b0   :  { %v3195_v24 = vperm.slane %v2848_v18, %v7124_v11 }
 0x4b2   :  { %v3197_v45 = vsel %vm7182_vm1, %v3196_v5, %v3195_v24 }
 0x4b3   :  { %v3199_v60 = vsel %vm3039_vm5, %v3198_v57, %v3197_v45 }
 0x4b4   :  { %v2863_v3 = vpop.xlane.xlu0 %2862  ;;  %v2987_v44 = vpop.xlane.xlu1 %2986 }
 0x4b5   :  { %v3203_v31 = vperm.slane %v2863_v3, %v7125_v56  ;;  %v3296_v27 = vperm.slane %v2987_v44, %v7125_v56 }
 0x4b7   :  { %v2857_v51 = vpop.xlane.xlu2 %2856  ;;  %v3204_v13 = vsel %vm7183_vm13, %v3203_v31, %v3202_v21 }
 0x4b8   :  { %v3200_v42 = vperm.slane %v2857_v51, %v6484_v6 }
 0x4ba   :  { %v3201_v62 = vsel %vm3043_vm2, %v3200_v42, %v3199_v60 }
 0x4bb   :  { %v3216_v32 = vsel %vm1272_vm15, %v3201_v62, %v3194_v9 }
 0x4bc   :  { %v2872_v22 = vpop.xlane.xlu0 %2871  ;;  %v2996_v4 = vpop.xlane.xlu1 %2995 }
 0x4bd   :  { %v3209_v36 = vperm.slane %v2872_v22, %v7124_v11  ;;  %v3302_v18 = vperm.slane %v2996_v4, %v7124_v11 }
 0x4bf   :  { %v2866_v39 = vpop.xlane.xlu2 %2865 }
 0x4c0   :  { %v3205_v41 = vperm.slane %v2866_v39, %v6464_v63 }
 0x4c2   :  { %v3206_v40 = vsel %vm3039_vm5, %v3205_v41, %v3204_v13 }
 0x4c3   :  { %v3208_v54 = vsel %vm3043_vm2, %v3207_v47, %v3206_v40 }
 0x4c4   :  { %v2881_v8 = vpop.xlane.xlu0 %2880  ;;  %v3217_v46 = vsel %vm1274_vm3, %v3208_v54, %v3216_v32  ;;  %v2993_v48 = vpop.xlane.xlu1 %2992 }
 0x4c5   :  { %v3214_v38 = vperm.slane %v2881_v8, %v6484_v6  ;;  %v3300_v25 = vperm.slane %v2993_v48, %v6484_v6 }
 0x4c7   :  { %v2875_v16 = vpop.xlane.xlu2 %2874 }
 0x4c8   :  { %v3210_v50 = vperm.slane %v2875_v16, %v7125_v56 }
 0x4ca   :  { %v3211_v30 = vsel %vm7184_vm11, %v3210_v50, %v3209_v36 }
 0x4cb   :  { %v3213_v12 = vsel %vm3039_vm5, %v3212_v19, %v3211_v30 }
 0x4cc   :  { %v3215_v7 = vsel %vm3043_vm2, %v3214_v38, %v3213_v12  ;;  %v2999_v2 = vpop.xlane.xlu0 %2998  ;;  %v3011_v35 = vpop.xlane.xlu1 %3010 }
 0x4cd   :  { %v3218_v14 = vsel %vm1276_vm4, %v3215_v7, %v3217_v46  ;;  %v3303_v23 = vperm.slane %v2999_v2, %v7125_v56  ;;  %v3310_v51 = vperm.slane %v3011_v35, %v7125_v56 }
 0x4ce   :  { %3344 = vst.msk [vmem:[%s6888_s3 + $0xc] sm:$0xf] %vm3070_vm12, %v3218_v14 }
 0x4cf   :  { %v2984_v1 = vpop.xlane.xlu2 %2983  ;;  %v3304_v44 = vsel %vm7176_vm0, %v3303_v23, %v3302_v18 }
 0x4d0   :  { %v3295_v26 = vperm.slane %v2984_v1, %v7124_v11 }
 0x4d2   :  { %v3297_v15 = vsel %vm7185_vm6, %v3296_v27, %v3295_v26 }
 0x4d4   :  { %v3002_v49 = vpop.xlane.xlu0 %3001  ;;  %v3017_v3 = vpop.xlane.xlu1 %3016 }
 0x4d5   :  { %v3305_v52 = vperm.slane %v3002_v49, %v6464_v63  ;;  %v3314_v24 = vperm.slane %v3017_v3, %v6484_v6 }
 0x4d7   :  { %v2990_v17 = vpop.xlane.xlu2 %2989  ;;  %v3306_v31 = vsel %vm3039_vm5, %v3305_v52, %v3304_v44 }
 0x4d8   :  { %v3298_v20 = vperm.slane %v2990_v17, %v6464_v63 }
 0x4da   :  { %v3299_v61 = vsel %vm3039_vm5, %v3298_v20, %v3297_v15 }
 0x4db   :  { %v3301_v29 = vsel %vm3043_vm2, %v3300_v25, %v3299_v61 }
 0x4dc   :  { %v3005_v28 = vpop.xlane.xlu0 %3004  ;;  %v3316_v39 = vsel %vm1272_vm15, %v3301_v29, %v6818_v10 }
 0x4dd   :  { %v3307_v53 = vperm.slane %v3005_v28, %v6484_v6 }
 0x4df   :  { %v3008_v43 = vpop.xlane.xlu2 %3007 }
 0x4e0   :  { %v3309_v0 = vperm.slane %v3008_v43, %v7124_v11  ;;  %v3308_v11 = vsel %vm3043_vm2, %v3307_v53, %v3306_v31 }
 0x4e1   :  { %v3317_v41 = vsel %vm1274_vm3, %v3308_v11, %v3316_v39 }
 0x4e2   :  { %v3311_v5 = vsel %vm7186_vm9, %v3310_v51, %v3309_v0 }
 0x4e7   :  { %v3014_v22 = vpop.xlane.xlu2 %3013 }
 0x4e8   :  { %v3312_v59 = vperm.slane %v3014_v22, %v6464_v63 }
 0x4ea   :  { %v3313_v33 = vsel %vm3039_vm5, %v3312_v59, %v3311_v5 }
 0x4eb   :  { %v3315_v56 = vsel %vm3043_vm2, %v3314_v24, %v3313_v33 }
 0x4ec   :  { %v3318_v21 = vsel %vm1276_vm4, %v3315_v56, %v3317_v41 }
 0x4ed   :  { %3346 = vst.msk [vmem:[%s6888_s3 + $0x14] sm:$0xf] %vm3070_vm12, %v3318_v21 }

</bundles_post_ra>
